<compile_context>
chip_gen: v6e
topology: v6e:2x2x1
jax: 0.10.0
libtpu: 0.0.40
codegen_flags: <defaults>
</compile_context>

<pallas_src>
import functools

import numpy as np
import jax
import jax.numpy as jnp
from jax.experimental import pallas as pl
from jax.experimental.pallas import tpu as pltpu


def st_lstm_kernel(patch_ref, cm_ref, w_ref, b_ref, wc_ref, bc_ref, out_ref, *, nh):
    """One batch element per grid step.

    patch : (1, L, Dpad) bf16  fused im2col patches [x | h | m] (zero-padded to Dpad).
    cm    : (1, L, 2*nh) f32   packed previous state [c | m].
    w     : (Dpad, 7*nh) bf16  fused conv weights, columns [i, i_, f, f_, o, g, g_].
    b     : (1, 7*nh)    f32   fused bias (forget bias baked into f / f_ blocks).
    wc    : (2*nh, nh)   bf16  1x1 c_cc conv weight.
    bc    : (1, nh)      f32   1x1 conv bias.
    out   : (1, L, 4*nh) f32   fused lane-dense slab [new_h | new_c | new_m | pad].
    """
    # All three 5x5 convs + cross-conv gate adds in ONE deep bf16 MXU matmul (f32 acc).
    pre = jnp.dot(patch_ref[0], w_ref[...],
                  preferred_element_type=jnp.float32) + b_ref[...]        # (L, 7*nh)

    # Batched transcendentals on full-lane slabs (no gate repacking needed).
    sg = jax.nn.sigmoid(pre[:, 0:5 * nh])        # [i | i_ | f | f_ | o]  (160 lanes)
    gg = jnp.tanh(pre[:, 5 * nh:7 * nh])         # [g | g_]               (64 lanes)

    ii = sg[:, 0:2 * nh]                         # [i  | i_]
    ff = sg[:, 2 * nh:4 * nh]                    # [f  | f_]
    o = sg[:, 4 * nh:5 * nh]                     # o

    # Packed state update: [new_c | new_m] = [f|f_] * [c|m] + [i|i_] * [g|g_]  (f32).
    new_cm = ff * cm_ref[0] + ii * gg            # (L, 2*nh)

    # 1x1 conv over [new_c | new_m] as one depth-2*nh matmul.
    cell = jnp.dot(new_cm.astype(jnp.bfloat16), wc_ref[...],
                   preferred_element_type=jnp.float32) + bc_ref[...]      # (L, nh)
    new_h = o * jnp.tanh(cell)

    # Lane-dense fused output slab: full 128-lane stores, no masked writebacks.
    out_ref[0] = jnp.concatenate([new_h, new_cm, jnp.zeros_like(new_h)], axis=-1)


def spatio_temporal_lstm_cell(x, h, c, m, params, filter_size=5):
    """x, h, c, m are NCHW float32 (PyTorch convention). Returns (new_h, new_c, new_m) NCHW."""
    K = filter_size
    pad = (K - 1) // 2  # PyTorch module uses padding=2 with a 5x5 filter ("same")

    def to_nhwc(a):
        return jnp.transpose(a, (0, 2, 3, 1)).astype(jnp.float32)

    x_, h_, c_, m_ = map(to_nhwc, (x, h, c, m))
    B, H, W, nh = c_.shape
    Cx = x_.shape[-1]
    Chin = h_.shape[-1]
    L = H * W
    D = K * K * (Cx + 2 * Chin)
    Dpad = params['w_all'].shape[0]

    # Wrapper-built im2col patches (plain XLA slicing, fused with the pad/transpose);
    # lane order per sub-patch is (kh, kw, cin), matching the fused weight rows.
    def im2col(a):
        cin = a.shape[-1]
        ap = jnp.pad(a, ((0, 0), (pad, pad), (pad, pad), (0, 0)))
        pieces = [ap[:, kh:kh + H, kw:kw + W, :] for kh in range(K) for kw in range(K)]
        return jnp.stack(pieces, axis=3).reshape(B, L, K * K * cin)

    patch = jnp.concatenate([im2col(x_), im2col(h_), im2col(m_)], axis=-1)   # (B, L, D)
    patch = jnp.pad(patch, ((0, 0), (0, 0), (0, Dpad - D))).astype(jnp.bfloat16)

    # Packed lane-dense previous state [c | m]  (B, L, 2*nh) f32.
    cm = jnp.concatenate([c_, m_], axis=-1).reshape(B, L, 2 * nh)

    kernel = functools.partial(st_lstm_kernel, nh=nh)
    p = params
    C4 = 4 * nh
    C7 = 7 * nh

    slab = pl.pallas_call(
        kernel,
        out_shape=jax.ShapeDtypeStruct((B, L, C4), jnp.float32),
        grid_spec=pltpu.PrefetchScalarGridSpec(
            num_scalar_prefetch=0,
            grid=(B,),
            in_specs=[
                pl.BlockSpec((1, L, Dpad), lambda b: (b, 0, 0)),
                pl.BlockSpec((1, L, 2 * nh), lambda b: (b, 0, 0)),
                pl.BlockSpec((Dpad, C7), lambda b: (0, 0)),
                pl.BlockSpec((1, C7), lambda b: (0, 0)),
                pl.BlockSpec((2 * nh, nh), lambda b: (0, 0)),
                pl.BlockSpec((1, nh), lambda b: (0, 0)),
            ],
            out_specs=pl.BlockSpec((1, L, C4), lambda b: (b, 0, 0)),
        ),
        compiler_params=pltpu.CompilerParams(dimension_semantics=("parallel",)),
    )(patch, cm, p['w_all'], p['b_all'], p['wc_k'], p['bc_k'])

    # (B, L, 4*nh) -> (B, H, W, 4*nh) -> split [h | c | m] -> NCHW
    grid4 = slab.reshape(B, H, W, C4)

    def pick(k):
        return jnp.transpose(grid4[..., k * nh:(k + 1) * nh], (0, 3, 1, 2))

    return pick(0), pick(1), pick(2)


def init_params(key, x_shape_in, num_hidden_in, num_hidden, K, forget_bias=1.0):
    """Deterministic synthetic parameters. PyTorch layouts kept for the reference;
    fused kernel layouts (flattened HWIO, bf16, gate-packed, bias/forget-bias baked)
    derived from them."""
    nh = num_hidden
    C4 = 4 * nh
    ks = jax.random.split(key, 8)
    s = 0.1
    wt_pt = s * jax.random.normal(ks[0], (C4, num_hidden_in, K, K), jnp.float32)
    ws_pt = s * jax.random.normal(ks[1], (C4, num_hidden_in, K, K), jnp.float32)
    wx_pt = s * jax.random.normal(ks[2], (C4, x_shape_in, K, K), jnp.float32)
    wc_pt = s * jax.random.normal(ks[3], (nh, 2 * nh, 1, 1), jnp.float32)
    bt = s * jax.random.normal(ks[4], (C4,), jnp.float32)
    bs = s * jax.random.normal(ks[5], (C4,), jnp.float32)
    bx = s * jax.random.normal(ks[6], (C4,), jnp.float32)
    bc = s * jax.random.normal(ks[7], (nh,), jnp.float32)

    # OIHW -> flattened HWIO: row index = (kh*K + kw)*cin + c  (matches patch lane order).
    def oihw_to_flat_hwio(w):
        K_ = w.shape[-1]
        cin = w.shape[1]
        return jnp.transpose(w, (2, 3, 1, 0)).reshape(K_ * K_ * cin, w.shape[0])

    wx = oihw_to_flat_hwio(wx_pt)     # (Dx, 4*nh), PyTorch gate order [i, g, f, o]
    wt = oihw_to_flat_hwio(wt_pt)     # (Dh, 4*nh)
    ws = oihw_to_flat_hwio(ws_pt)     # (Dm, 4*nh)
    Dx, Dh, Dm = wx.shape[0], wt.shape[0], ws.shape[0]
    I, G, F, O = 0, 1, 2, 3           # PyTorch torch.split order is [i, g, f, o]

    def wblk(w, g):
        return w[:, g * nh:(g + 1) * nh]

    def bblk(b, g):
        return b[g * nh:(g + 1) * nh]

    zh = jnp.zeros((Dh, nh), jnp.float32)
    zm = jnp.zeros((Dm, nh), jnp.float32)

    # Fused weight over contraction rows [x patch | h patch | m patch] with output
    # columns [i, i_, f, f_, o, g, g_]:
    #   i  = x_i + t_i        i_ = x_i + s_i
    #   f  = x_f + t_f        f_ = x_f + s_f
    #   o  = x_o + t_o + s_o
    #   g  = x_g + t_g        g_ = x_g + s_g
    cols = [
        jnp.concatenate([wblk(wx, I), wblk(wt, I), zm], axis=0),
        jnp.concatenate([wblk(wx, I), zh, wblk(ws, I)], axis=0),
        jnp.concatenate([wblk(wx, F), wblk(wt, F), zm], axis=0),
        jnp.concatenate([wblk(wx, F), zh, wblk(ws, F)], axis=0),
        jnp.concatenate([wblk(wx, O), wblk(wt, O), wblk(ws, O)], axis=0),
        jnp.concatenate([wblk(wx, G), wblk(wt, G), zm], axis=0),
        jnp.concatenate([wblk(wx, G), zh, wblk(ws, G)], axis=0),
    ]
    w_all = jnp.concatenate(cols, axis=1)                  # (D, 7*nh) f32
    D = Dx + Dh + Dm
    Dpad = ((D + 127) // 128) * 128                        # pad contraction to 128-mult
    w_all = jnp.pad(w_all, ((0, Dpad - D), (0, 0))).astype(jnp.bfloat16)

    fb = forget_bias
    b_all = jnp.concatenate([
        bblk(bx, I) + bblk(bt, I),
        bblk(bx, I) + bblk(bs, I),
        bblk(bx, F) + bblk(bt, F) + fb,
        bblk(bx, F) + bblk(bs, F) + fb,
        bblk(bx, O) + bblk(bt, O) + bblk(bs, O),
        bblk(bx, G) + bblk(bt, G),
        bblk(bx, G) + bblk(bs, G),
    ]).reshape(1, 7 * nh).astype(jnp.float32)

    wc_k = wc_pt[:, :, 0, 0].T.astype(jnp.bfloat16)        # (2*nh, nh)
    bc_k = bc.reshape(1, nh)

    return dict(
        num_hidden=nh,
        # PyTorch-layout params (for the pure-JAX reference)
        wt_pt=wt_pt, ws_pt=ws_pt, wx_pt=wx_pt, wc_pt=wc_pt,
        bt=bt, bs=bs, bx=bx, bc=bc,
        # Fused kernel-layout params
        w_all=w_all, b_all=b_all, wc_k=wc_k, bc_k=bc_k,
    )


def reference_forward(x, h, c, m, p, forget_bias=1.0):
    """Pure-JAX NCHW reference mirroring the PyTorch forward (tln=False)."""
    nh = p['num_hidden']

    def conv(a, w, b, pad):
        out = jax.lax.conv_general_dilated(
            a, w, window_strides=(1, 1), padding=[(pad, pad), (pad, pad)],
            dimension_numbers=('NCHW', 'OIHW', 'NCHW'),
            precision=jax.lax.Precision.HIGHEST)
        return out + b[None, :, None, None]

    t_cc = conv(h, p['wt_pt'], p['bt'], 2)
    s_cc = conv(m, p['ws_pt'], p['bs'], 2)
    x_cc = conv(x, p['wx_pt'], p['bx'], 2)

    def split4(a):
        return [a[:, k * nh:(k + 1) * nh] for k in range(4)]

    i_s, g_s, f_s, o_s = split4(s_cc)
    i_t, g_t, f_t, o_t = split4(t_cc)
    i_x, g_x, f_x, o_x = split4(x_cc)

    i = jax.nn.sigmoid(i_x + i_t)
    i_ = jax.nn.sigmoid(i_x + i_s)
    g = jnp.tanh(g_x + g_t)
    g_ = jnp.tanh(g_x + g_s)
    f = jax.nn.sigmoid(f_x + f_t + forget_bias)
    f_ = jax.nn.sigmoid(f_x + f_s + forget_bias)
    o = jax.nn.sigmoid(o_x + o_t + o_s)

    new_m = f_ * m + i_ * g_
    new_c = f * c + i * g
    cell = conv(jnp.concatenate([new_c, new_m], axis=1), p['wc_pt'], p['bc'], 0)
    new_h = o * jnp.tanh(cell)
    return new_h, new_c, new_m


if __name__ == "__main__":
    B, Cx, H, W = 2, 4, 16, 16
    num_hidden_in = 32
    num_hidden = 32
    K = 5

    key = jax.random.PRNGKey(0)
    kx, kh, kc, km, kp = jax.random.split(key, 5)
    x = jax.random.normal(kx, (B, Cx, H, W), jnp.float32)
    h = jax.random.normal(kh, (B, num_hidden_in, H, W), jnp.float32)
    c = jax.random.normal(kc, (B, num_hidden, H, W), jnp.float32)
    m = jax.random.normal(km, (B, num_hidden_in, H, W), jnp.float32)
    params = init_params(kp, Cx, num_hidden_in, num_hidden, K)

    fwd = jax.jit(spatio_temporal_lstm_cell, static_argnames=('filter_size',))
    new_h, new_c, new_m = fwd(x, h, c, m, params, filter_size=K)
    jax.block_until_ready((new_h, new_c, new_m))

    rh, rc, rm = reference_forward(x, h, c, m, params)
    # Conv operands run on the MXU in bf16 (f32 accumulation), so the conv
    # pre-activations differ from the exact-f32 reference at the ~1e-2 level.
    np.testing.assert_allclose(np.asarray(new_h), np.asarray(rh), rtol=2e-2, atol=5e-2)
    np.testing.assert_allclose(np.asarray(new_c), np.asarray(rc), rtol=2e-2, atol=5e-2)
    np.testing.assert_allclose(np.asarray(new_m), np.asarray(rm), rtol=2e-2, atol=5e-2)

    print("KERNEL_OK")
</pallas_src>

<mosaic_0001>
module attributes {stable_mosaic.version = 11 : i64} {
  func.func @st_lstm_kernel(%arg0: i32, %arg1: memref<1x256x1792xbf16, #tpu.memory_space<vmem>>, %arg2: memref<1x256x64xf32, #tpu.memory_space<vmem>>, %arg3: memref<1792x224xbf16, #tpu.memory_space<vmem>>, %arg4: memref<1x224xf32, #tpu.memory_space<vmem>>, %arg5: memref<64x32xbf16, #tpu.memory_space<vmem>>, %arg6: memref<1x32xf32, #tpu.memory_space<vmem>>, %arg7: memref<1x256x128xf32, #tpu.memory_space<vmem>>) attributes {dimension_semantics = [#tpu.dimension_semantics<parallel>], iteration_bounds = array<i64: 2>, scalar_prefetch = 0 : i64, scratch_operands = 0 : i64, tpu.core_type = #tpu.core_type<tc>, window_params = [{transform_indices = @transform_0, window_bounds = array<i64: 1, 256, 1792>}, {transform_indices = @transform_1, window_bounds = array<i64: 1, 256, 64>}, {pipeline_mode = #tpu.pipeline_mode<synchronous>, transform_indices = @transform_2, window_bounds = array<i64: 1792, 224>}, {pipeline_mode = #tpu.pipeline_mode<synchronous>, transform_indices = @transform_3, window_bounds = array<i64: 1, 224>}, {pipeline_mode = #tpu.pipeline_mode<synchronous>, transform_indices = @transform_4, window_bounds = array<i64: 64, 32>}, {pipeline_mode = #tpu.pipeline_mode<synchronous>, transform_indices = @transform_5, window_bounds = array<i64: 1, 32>}, {transform_indices = @transform_6, window_bounds = array<i64: 1, 256, 128>}]} {
    %c0 = arith.constant 0 : index
    %c0_0 = arith.constant 0 : index
    %c0_1 = arith.constant 0 : index
    %0 = vector.load %arg1[%c0, %c0_0, %c0_1] : memref<1x256x1792xbf16, #tpu.memory_space<vmem>>, vector<1x256x1792xbf16>
    %1 = vector.shape_cast %0 : vector<1x256x1792xbf16> to vector<256x1792xbf16>
    %c0_2 = arith.constant 0 : index
    %c0_3 = arith.constant 0 : index
    %2 = vector.load %arg3[%c0_2, %c0_3] : memref<1792x224xbf16, #tpu.memory_space<vmem>>, vector<1792x224xbf16>
    %cst = arith.constant dense<0.000000e+00> : vector<256x224xf32>
    %3 = tpu.matmul %1, %2, %cst {dimension_numbers = #tpu.dot_dimension_numbers<[1], [0], [0], [1], [0, 0, 1, 1], [], []>} : vector<256x1792xbf16>, vector<1792x224xbf16>, vector<256x224xf32> -> vector<256x224xf32>
    %c0_4 = arith.constant 0 : index
    %c0_5 = arith.constant 0 : index
    %4 = vector.load %arg4[%c0_4, %c0_5] : memref<1x224xf32, #tpu.memory_space<vmem>>, vector<1x224xf32>
    %5 = vector.broadcast %4 : vector<1x224xf32> to vector<256x224xf32>
    %6 = arith.addf %3, %5 : vector<256x224xf32>
    %7 = vector.extract_strided_slice %6 {offsets = [0, 0], sizes = [256, 160], strides = [1, 1]} : vector<256x224xf32> to vector<256x160xf32>
    %8 = arith.negf %7 : vector<256x160xf32>
    %9 = math.exp %8 : vector<256x160xf32>
    %cst_6 = arith.constant 1.000000e+00 : f32
    %10 = vector.broadcast %cst_6 : f32 to vector<256x160xf32>
    %11 = arith.addf %10, %9 : vector<256x160xf32>
    %12 = arith.divf %10, %11 : vector<256x160xf32>
    %13 = vector.extract_strided_slice %6 {offsets = [0, 160], sizes = [256, 64], strides = [1, 1]} : vector<256x224xf32> to vector<256x64xf32>
    %14 = math.tanh %13 : vector<256x64xf32>
    %15 = vector.extract_strided_slice %12 {offsets = [0, 0], sizes = [256, 64], strides = [1, 1]} : vector<256x160xf32> to vector<256x64xf32>
    %16 = vector.extract_strided_slice %12 {offsets = [0, 64], sizes = [256, 64], strides = [1, 1]} : vector<256x160xf32> to vector<256x64xf32>
    %17 = vector.extract_strided_slice %12 {offsets = [0, 128], sizes = [256, 32], strides = [1, 1]} : vector<256x160xf32> to vector<256x32xf32>
    %c0_7 = arith.constant 0 : index
    %c0_8 = arith.constant 0 : index
    %c0_9 = arith.constant 0 : index
    %18 = vector.load %arg2[%c0_7, %c0_8, %c0_9] : memref<1x256x64xf32, #tpu.memory_space<vmem>>, vector<1x256x64xf32>
    %19 = vector.shape_cast %18 : vector<1x256x64xf32> to vector<256x64xf32>
    %20 = arith.mulf %16, %19 : vector<256x64xf32>
    %21 = arith.mulf %15, %14 : vector<256x64xf32>
    %22 = arith.addf %20, %21 : vector<256x64xf32>
    %23 = arith.truncf %22 : vector<256x64xf32> to vector<256x64xbf16>
    %c0_10 = arith.constant 0 : index
    %c0_11 = arith.constant 0 : index
    %24 = vector.load %arg5[%c0_10, %c0_11] : memref<64x32xbf16, #tpu.memory_space<vmem>>, vector<64x32xbf16>
    %cst_12 = arith.constant dense<0.000000e+00> : vector<256x32xf32>
    %25 = tpu.matmul %23, %24, %cst_12 {dimension_numbers = #tpu.dot_dimension_numbers<[1], [0], [0], [1], [0, 0, 1, 1], [], []>} : vector<256x64xbf16>, vector<64x32xbf16>, vector<256x32xf32> -> vector<256x32xf32>
    %c0_13 = arith.constant 0 : index
    %c0_14 = arith.constant 0 : index
    %26 = vector.load %arg6[%c0_13, %c0_14] : memref<1x32xf32, #tpu.memory_space<vmem>>, vector<1x32xf32>
    %27 = vector.broadcast %26 : vector<1x32xf32> to vector<256x32xf32>
    %28 = arith.addf %25, %27 : vector<256x32xf32>
    %29 = math.tanh %28 : vector<256x32xf32>
    %30 = arith.mulf %17, %29 : vector<256x32xf32>
    %cst_15 = arith.constant 0.000000e+00 : f32
    %31 = vector.broadcast %cst_15 : f32 to vector<256x32xf32>
    %32 = tpu.concatenate %30, %22, %31 in 1 : vector<256x32xf32>, vector<256x64xf32>, vector<256x32xf32> -> vector<256x128xf32>
    %c0_16 = arith.constant 0 : index
    %c0_17 = arith.constant 0 : index
    %c0_18 = arith.constant 0 : index
    %33 = vector.load %arg7[%c0_16, %c0_17, %c0_18] : memref<1x256x128xf32, #tpu.memory_space<vmem>>, vector<1x256x128xf32>
    %34 = vector.shape_cast %33 : vector<1x256x128xf32> to vector<256x128xf32>
    %35 = vector.shape_cast %32 : vector<256x128xf32> to vector<1x256x128xf32>
    tpu.vector_store %arg7[%c0_16, %c0_17, %c0_18], %35 {strides = array<i32>} : memref<1x256x128xf32, #tpu.memory_space<vmem>>, vector<1x256x128xf32>,
    return
  }
  func.func @transform_0(%arg0: i32) -> (i32, i32, i32) {
    %c0_i32 = arith.constant 0 : i32
    %c0_i32_0 = arith.constant 0 : i32
    %c0_i32_1 = arith.constant 0 : i32
    return %arg0, %c0_i32, %c0_i32_0 : i32, i32, i32
  }
  func.func @transform_1(%arg0: i32) -> (i32, i32, i32) {
    %c0_i32 = arith.constant 0 : i32
    %c0_i32_0 = arith.constant 0 : i32
    %c0_i32_1 = arith.constant 0 : i32
    return %arg0, %c0_i32, %c0_i32_0 : i32, i32, i32
  }
  func.func @transform_2(%arg0: i32) -> (i32, i32) {
    %c0_i32 = arith.constant 0 : i32
    %c0_i32_0 = arith.constant 0 : i32
    %c0_i32_1 = arith.constant 0 : i32
    return %c0_i32, %c0_i32_0 : i32, i32
  }
  func.func @transform_3(%arg0: i32) -> (i32, i32) {
    %c0_i32 = arith.constant 0 : i32
    %c0_i32_0 = arith.constant 0 : i32
    %c0_i32_1 = arith.constant 0 : i32
    return %c0_i32, %c0_i32_0 : i32, i32
  }
  func.func @transform_4(%arg0: i32) -> (i32, i32) {
    %c0_i32 = arith.constant 0 : i32
    %c0_i32_0 = arith.constant 0 : i32
    %c0_i32_1 = arith.constant 0 : i32
    return %c0_i32, %c0_i32_0 : i32, i32
  }
  func.func @transform_5(%arg0: i32) -> (i32, i32) {
    %c0_i32 = arith.constant 0 : i32
    %c0_i32_0 = arith.constant 0 : i32
    %c0_i32_1 = arith.constant 0 : i32
    return %c0_i32, %c0_i32_0 : i32, i32
  }
  func.func @transform_6(%arg0: i32) -> (i32, i32, i32) {
    %c0_i32 = arith.constant 0 : i32
    %c0_i32_0 = arith.constant 0 : i32
    %c0_i32_1 = arith.constant 0 : i32
    return %arg0, %c0_i32, %c0_i32_0 : i32, i32, i32
  }
}

</mosaic_0001>

<bundles_post_ra>
// kernel: spatio_temporal_lstm_cell.1
= control target key start
LH: loop header
LB: loop body
LE: loop exit
PB: predicated region body
PF: predicated region fallthrough
CT: control target
= control target key end

     0   :  { %s7677_s21 = smov 0   ;;  %s10236_s0 = inlined_call_operand.vmem [shape: bf16[2,256,1792], index: 0, kind: input, shape index: {}]   ;;  %s10237_s1 = inlined_call_operand.vmem [shape: f32[2,256,64], index: 1, kind: input, shape index: {}]   ;;  %s10238_s2 = inlined_call_operand.vmem [shape: bf16[1792,224], index: 2, kind: input, shape index: {}]   ;;  %s10239_s3 = inlined_call_operand.vmem [shape: f32[1,224], index: 3, kind: input, shape index: {}]   ;;  %s10240_s4 = inlined_call_operand.vmem [shape: bf16[64,32], index: 4, kind: input, shape index: {}]   ;;  %s10241_s5 = inlined_call_operand.vmem [shape: f32[1,32], index: 5, kind: input, shape index: {}]   ;;  %s10242_s6 = inlined_call_operand.vmem [shape: f32[2,256,128], index: 6, kind: output, shape index: {}]  }
   0x1 LB: > { %s5922_s22 = sadd.s32 4294967295, %s7638_s21   ;;  %p5926_p0 = scmp.ge.s32.totalorder %s7638_s21, 1  ;;  %s7638_s21 = sphi %s7677_s21, %s16_s21  }
   0x2   : > { %p222_p1 = scmp.lt.s32.totalorder %s7638_s21, 3 }
   0x4   : > { %p223_p2 = pnand %p5926_p0, %p222_p1 }
   0x6   : > { %226 = sbr.rel (%p223_p2) target bundleno = 1385 (0x569), region = 44 }
   0xb   : > { %v6572_v0 = vld [vmem:[%s10238_s2 + $0x74] ss:$8 sps:$4 sm:$0xff]   ;;  %v6576_v2 = vld [vmem:[%s10238_s2 + $0x70] ss:$8 sps:$4 sm:$0xff]   ;;  %v6578_v4 = vld [vmem:[%s10238_s2 + $0x64] ss:$8 sps:$4 sm:$0xff]  }
   0xc   : > { %v6574_v1 = vld [vmem:[%s10238_s2 + $0x174] ss:$8 sps:$4 sm:$0xff]   ;;  %2973 = vmatprep.subr.bf16.mxu0 %v6572_v0  ;;  %v6577_v3 = vld [vmem:[%s10238_s2 + $0x170] ss:$8 sps:$4 sm:$0xff]   ;;  %v6580_v5 = vld [vmem:[%s10238_s2 + $0x164] ss:$8 sps:$4 sm:$0xff]  }
   0xd   : > { %3166 = vmatprep.subr.bf16.mxu1 %v6574_v1  ;;  %2974 = vmatpush1.bf16.msra.mxu0 %v6576_v2  ;;  %v6582_v6 = vld [vmem:[%s10238_s2 + $0x60] ss:$8 sps:$4 sm:$0xff]   ;;  %v6584_v8 = vld [vmem:[%s10238_s2 + $0x54] ss:$8 sps:$4 sm:$0xff]   ;;  %v6588_v10 = vld [vmem:[%s10238_s2 + $0x50] ss:$8 sps:$4 sm:$0xff]  }
   0xe   : > { %3167 = vmatpush1.bf16.msra.mxu1 %v6577_v3  ;;  %2975 = vmatprep.subr.bf16.mxu0 %v6578_v4  ;;  %v6583_v7 = vld [vmem:[%s10238_s2 + $0x160] ss:$8 sps:$4 sm:$0xff]   ;;  %v6586_v9 = vld [vmem:[%s10238_s2 + $0x154] ss:$8 sps:$4 sm:$0xff]   ;;  %v6589_v11 = vld [vmem:[%s10238_s2 + $0x150] ss:$8 sps:$4 sm:$0xff]  }
   0xf   : > { %3168 = vmatprep.subr.bf16.mxu1 %v6580_v5  ;;  %v6590_v12 = vld [vmem:[%s10238_s2 + $0x44] ss:$8 sps:$4 sm:$0xff]   ;;  %v6594_v14 = vld [vmem:[%s10238_s2 + $0x40] ss:$8 sps:$4 sm:$0xff]   ;;  %v6596_v16 = vld [vmem:[%s10238_s2 + $0x34] ss:$8 sps:$4 sm:$0xff]  }
  0x10   : > { %v6592_v13 = vld [vmem:[%s10238_s2 + $0x144] ss:$8 sps:$4 sm:$0xff]   ;;  %v6595_v15 = vld [vmem:[%s10238_s2 + $0x140] ss:$8 sps:$4 sm:$0xff]   ;;  %v6598_v17 = vld [vmem:[%s10238_s2 + $0x134] ss:$8 sps:$4 sm:$0xff]  }
  0x11   : > { %2976 = vmatpush1.bf16.msra.mxu0 %v6582_v6  ;;  %v6600_v18 = vld [vmem:[%s10238_s2 + $0x30] ss:$8 sps:$4 sm:$0xff]   ;;  %v6602_v20 = vld [vmem:[%s10238_s2 + $0x24] ss:$8 sps:$4 sm:$0xff]   ;;  %v6606_v22 = vld [vmem:[%s10238_s2 + $0x20] ss:$8 sps:$4 sm:$0xff]  }
  0x12   : > { %3169 = vmatpush1.bf16.msra.mxu1 %v6583_v7  ;;  %2977 = vmatprep.subr.bf16.mxu0 %v6584_v8  ;;  %v6601_v19 = vld [vmem:[%s10238_s2 + $0x130] ss:$8 sps:$4 sm:$0xff]   ;;  %v6604_v21 = vld [vmem:[%s10238_s2 + $0x124] ss:$8 sps:$4 sm:$0xff]   ;;  %v6607_v23 = vld [vmem:[%s10238_s2 + $0x120] ss:$8 sps:$4 sm:$0xff]  }
  0x13   : > { %3170 = vmatprep.subr.bf16.mxu1 %v6586_v9  ;;  %v6608_v24 = vld [vmem:[%s10238_s2 + $0x14] ss:$8 sps:$4 sm:$0xff]   ;;  %v6612_v26 = vld [vmem:[%s10238_s2 + $0x10] ss:$8 sps:$4 sm:$0xff]   ;;  %v6614_v28 = vld [vmem:[%s10238_s2 + $0x4] ss:$8 sps:$4 sm:$0xff]  }
  0x14   : > { %v6610_v25 = vld [vmem:[%s10238_s2 + $0x114] ss:$8 sps:$4 sm:$0xff]   ;;  %v6613_v27 = vld [vmem:[%s10238_s2 + $0x110] ss:$8 sps:$4 sm:$0xff]   ;;  %v6616_v29 = vld [vmem:[%s10238_s2 + $0x104] ss:$8 sps:$4 sm:$0xff]  }
  0x15   : > { %2978 = vmatpush1.bf16.msra.mxu0 %v6588_v10  ;;  %v6618_v30 = vld [vmem:[%s10238_s2] ss:$8 sps:$4 sm:$0xff]   ;;  %v6620_v32 = vld [vmem:[%s10238_s2 + $0xf4] ss:$8 sps:$4 sm:$0xff]   ;;  %p257_p3 = scmp.lt.s32.totalorder %s5922_s22, 1  ;;  %s7640_s12 = smov 64  }
  0x16   : > { %3171 = vmatpush1.bf16.msra.mxu1 %v6589_v11  ;;  %2979 = vmatprep.subr.bf16.mxu0 %v6590_v12  ;;  %v6619_v31 = vld [vmem:[%s10238_s2 + $0x100] ss:$8 sps:$4 sm:$0xff]   ;;  %v6622_v33 = vld [vmem:[%s10238_s2 + $0x1f4] ss:$8 sps:$4 sm:$0xff]   ;;  %v6624_v34 = vld [vmem:[%s10238_s2 + $0xf0] ss:$8 sps:$4 sm:$0xff]  }
  0x17   : > { %3172 = vmatprep.subr.bf16.mxu1 %v6592_v13  ;;  %v6625_v35 = vld [vmem:[%s10238_s2 + $0x1f0] ss:$8 sps:$4 sm:$0xff]   ;;  %v6626_v36 = vld [vmem:[%s10238_s2 + $0xe4] ss:$8 sps:$4 sm:$0xff]   ;;  %s10497_s22 = smov (!%p257_p3, %s5922_s22), 1  ;;  %vm5355_vm0 = vcmask 523264  }
  0x18   : > { %v6628_v37 = vld [vmem:[%s10238_s2 + $0x1e4] ss:$8 sps:$4 sm:$0xff]   ;;  %v6630_v38 = vld [vmem:[%s10238_s2 + $0xe0] ss:$8 sps:$4 sm:$0xff]   ;;  %v6632_v40 = vld [vmem:[%s10238_s2 + $0xd4] ss:$8 sps:$4 sm:$0xff]  }
  0x19   : > { %2980 = vmatpush1.bf16.msra.mxu0 %v6594_v14  ;;  %v6631_v39 = vld [vmem:[%s10238_s2 + $0x1e0] ss:$8 sps:$4 sm:$0xff]   ;;  %s6561_s15 = smul.u32 1792, %s10497_s22  ;;  %v6634_v41 = vld [vmem:[%s10238_s2 + $0x1d4] ss:$8 sps:$4 sm:$0xff]   ;;  %s6467_s8 = sshll.u32 %s10497_s22, 8 }
  0x1a   : > { %3173 = vmatpush1.bf16.msra.mxu1 %v6595_v15  ;;  %2981 = vmatprep.subr.bf16.mxu0 %v6596_v16  ;;  %v6636_v42 = vld [vmem:[%s10238_s2 + $0xd0] ss:$8 sps:$4 sm:$0xff]   ;;  %v6638_v44 = vld [vmem:[%s10238_s2 + $0xc4] ss:$8 sps:$4 sm:$0xff]   ;;  %v6642_v46 = vld [vmem:[%s10238_s2 + $0xc0] ss:$8 sps:$4 sm:$0xff]   ;;  %s8743_s11 = scalar_lea.vmem %s10237_s1, %s6467_s8  ;;  %s10081_s27 = scalar_lea.vmem %s10242_s6, %s6467_s8 }
  0x1b   : > { %3174 = vmatprep.subr.bf16.mxu1 %v6598_v17  ;;  %v6637_v43 = vld [vmem:[%s10238_s2 + $0x1d0] ss:$8 sps:$4 sm:$0xff]   ;;  %s7830_s28 = scalar_lea.vmem %s10236_s0, %s6561_s15  ;;  %v6640_v45 = vld [vmem:[%s10238_s2 + $0x1c4] ss:$8 sps:$4 sm:$0xff]   ;;  %v6643_v47 = vld [vmem:[%s10238_s2 + $0x1c0] ss:$8 sps:$4 sm:$0xff]  }
  0x1c   : > { %v6644_v48 = vld [vmem:[%s10238_s2 + $0xb4] ss:$8 sps:$4 sm:$0xff]   ;;  %v6673_v51 = vld [vmem:[%s7830_s28 + $0xc] ss:$56 sps:$4 sm:$0xff]   ;;  %v6648_v52 = vld [vmem:[%s10238_s2 + $0xb0] ss:$8 sps:$4 sm:$0xff]  }
  0x1d   : > { %2982 = vmatpush1.bf16.msra.mxu0 %v6600_v18  ;;  %v6670_v49 = vld [vmem:[%s7830_s28 + $0x4] ss:$56 sps:$4 sm:$0xff]   ;;  %3198 = vmatprep.mubr.bf16.mxu1 %v6673_v51  ;;  %v6649_v53 = vld [vmem:[%s10238_s2 + $0x1b0] ss:$8 sps:$4 sm:$0xff]   ;;  %v6654_v56 = vld [vmem:[%s10238_s2 + $0xa0] ss:$8 sps:$4 sm:$0xff]  }
  0x1e   : > { %3175 = vmatpush1.bf16.msra.mxu1 %v6601_v19  ;;  %2983 = vmatprep.subr.bf16.mxu0 %v6602_v20  ;;  %v6646_v50 = vld [vmem:[%s10238_s2 + $0x1b4] ss:$8 sps:$4 sm:$0xff]   ;;  %v6650_v54 = vld [vmem:[%s10238_s2 + $0xa4] ss:$8 sps:$4 sm:$0xff]   ;;  %v6655_v57 = vld [vmem:[%s10238_s2 + $0x1a0] ss:$8 sps:$4 sm:$0xff]  }
  0x1f   : > { %3176 = vmatprep.subr.bf16.mxu1 %v6604_v21  ;;  %3005 = vmatprep.mubr.bf16.mxu0 %v6670_v49  ;;  %v6652_v55 = vld [vmem:[%s10238_s2 + $0x1a4] ss:$8 sps:$4 sm:$0xff]   ;;  %v6656_v58 = vld [vmem:[%s10238_s2 + $0x94] ss:$8 sps:$4 sm:$0xff]   ;;  %v6660_v60 = vld [vmem:[%s10238_s2 + $0x90] ss:$8 sps:$4 sm:$0xff]  }
  0x20   : > { %v6658_v59 = vld [vmem:[%s10238_s2 + $0x194] ss:$8 sps:$4 sm:$0xff]   ;;  %v6661_v61 = vld [vmem:[%s10238_s2 + $0x190] ss:$8 sps:$4 sm:$0xff]   ;;  %v6662_v62 = vld [vmem:[%s10238_s2 + $0x84] ss:$8 sps:$4 sm:$0xff]  }
  0x21   : > { %2984 = vmatpush1.bf16.msra.mxu0 %v6606_v22  ;;  %v6664_v63 = vld [vmem:[%s10238_s2 + $0x184] ss:$8 sps:$4 sm:$0xff]   ;;  %v6666_v0 = vld [vmem:[%s10238_s2 + $0x80] ss:$8 sps:$4 sm:$0xff]   ;;  %v6676_v2 = vld [vmem:[%s10238_s2 + $0x274] ss:$8 sps:$4 sm:$0xff]  }
  0x22   : > { %3177 = vmatpush1.bf16.msra.mxu1 %v6607_v23  ;;  %2985 = vmatprep.subr.bf16.mxu0 %v6608_v24  ;;  %v6667_v1 = vld [vmem:[%s10238_s2 + $0x180] ss:$8 sps:$4 sm:$0xff]   ;;  %v6706_v3 = vld [vmem:[%s10238_s2 + $0x374] ss:$8 sps:$4 sm:$0xff]   ;;  %v6674_v6 = vld [vmem:[%s10238_s2 + $0x270] ss:$8 sps:$4 sm:$0xff]  }
  0x23   : > { %3178 = vmatprep.subr.bf16.mxu1 %v6610_v25  ;;  %v6668_v4 = vld [vmem:[%s7830_s28] ss:$56 sps:$4 sm:$0xff]   ;;  %v6677_v7 = vld [vmem:[%s7830_s28 + $0x74] ss:$56 sps:$4 sm:$0xff]   ;;  %v6681_v13 = vld [vmem:[%s7830_s28 + $0x70] ss:$56 sps:$4 sm:$0xff]  }
  0x24   : > { %v6671_v5 = vld [vmem:[%s7830_s28 + $0x8] ss:$56 sps:$4 sm:$0xff]   ;;  %v6679_v8 = vld [vmem:[%s7830_s28 + $0x7c] ss:$56 sps:$4 sm:$0xff]   ;;  %v6685_v9 = vld [vmem:[%s10238_s2 + $0x264] ss:$8 sps:$4 sm:$0xff]  }
  0x25   : > { %2986 = vmatpush1.bf16.msra.mxu0 %v6612_v26  ;;  %v6704_v10 = vld [vmem:[%s10238_s2 + $0x370] ss:$8 sps:$4 sm:$0xff]   ;;  %v6718_v11 = vld [vmem:[%s10238_s2 + $0x364] ss:$8 sps:$4 sm:$0xff]   ;;  %v6683_v12 = vld [vmem:[%s10238_s2 + $0x260] ss:$8 sps:$4 sm:$0xff]  }
  0x26   : > { %3179 = vmatpush1.bf16.msra.mxu1 %v6613_v27  ;;  %2987 = vmatprep.subr.bf16.mxu0 %v6614_v28  ;;  %v6694_v14 = vld [vmem:[%s10238_s2 + $0x254] ss:$8 sps:$4 sm:$0xff]   ;;  %v6682_v15 = vld [vmem:[%s7830_s28 + $0x78] ss:$56 sps:$4 sm:$0xff]   ;;  %v6716_v16 = vld [vmem:[%s10238_s2 + $0x360] ss:$8 sps:$4 sm:$0xff]  }
  0x27   : > { %3180 = vmatprep.subr.bf16.mxu1 %v6616_v29  ;;  %v6686_v17 = vld [vmem:[%s7830_s28 + $0xe4] ss:$56 sps:$4 sm:$0xff]   ;;  %v6692_v19 = vld [vmem:[%s10238_s2 + $0x250] ss:$8 sps:$4 sm:$0xff]   ;;  %v6691_v25 = vld [vmem:[%s7830_s28 + $0xe8] ss:$56 sps:$4 sm:$0xff]  }
  0x28   : > { %v6688_v18 = vld [vmem:[%s7830_s28 + $0xec] ss:$56 sps:$4 sm:$0xff]   ;;  %v6730_v20 = vld [vmem:[%s10238_s2 + $0x354] ss:$8 sps:$4 sm:$0xff]   ;;  %v6728_v22 = vld [vmem:[%s10238_s2 + $0x350] ss:$8 sps:$4 sm:$0xff]  }
  0x29   : > { %2988 = vmatpush1.bf16.msra.mxu0 %v6618_v30  ;;  %v6703_v21 = vld [vmem:[%s10238_s2 + $0x244] ss:$8 sps:$4 sm:$0xff]   ;;  %v6690_v24 = vld [vmem:[%s7830_s28 + $0xe0] ss:$56 sps:$4 sm:$0xff]   ;;  %v6715_v28 = vld [vmem:[%s10238_s2 + $0x234] ss:$8 sps:$4 sm:$0xff]  }
  0x2a   : > { %3181 = vmatpush1.bf16.msra.mxu1 %v6619_v31  ;;  %2989 = vmatprep.subr.bf16.mxu0 %v6620_v32  ;;  %v6742_v23 = vld [vmem:[%s10238_s2 + $0x344] ss:$8 sps:$4 sm:$0xff]   ;;  %v6701_v26 = vld [vmem:[%s10238_s2 + $0x240] ss:$8 sps:$4 sm:$0xff]   ;;  %v6697_v30 = vld [vmem:[%s7830_s28 + $0x15c] ss:$56 sps:$4 sm:$0xff]  }
  0x2b   : > { %3182 = vmatprep.subr.bf16.mxu1 %v6622_v33  ;;  %v6695_v27 = vld [vmem:[%s7830_s28 + $0x154] ss:$56 sps:$4 sm:$0xff]   ;;  %v6740_v29 = vld [vmem:[%s10238_s2 + $0x340] ss:$8 sps:$4 sm:$0xff]   ;;  %v6713_v31 = vld [vmem:[%s10238_s2 + $0x230] ss:$8 sps:$4 sm:$0xff]  }
  0x2c   : > { %v6727_v32 = vld [vmem:[%s10238_s2 + $0x224] ss:$8 sps:$4 sm:$0xff]   ;;  %v6754_v33 = vld [vmem:[%s10238_s2 + $0x334] ss:$8 sps:$4 sm:$0xff]   ;;  %v6749_v49 = vld [vmem:[%s10238_s2 + $0x200] ss:$8 sps:$4 sm:$0xff]  }
  0x2d   : > { %2990 = vmatpush2.bf16.msra.mxu0 %v6624_v34  ;;  %v6752_v34 = vld [vmem:[%s10238_s2 + $0x330] ss:$8 sps:$4 sm:$0xff]   ;;  %v6763_v51 = vld [vmem:[%s10238_s2 + $0x2f4] ss:$8 sps:$4 sm:$0xff]   ;;  %vm5757_vm1 = vcmask 261120   ;;  %vm5790_vm2 = vcmask 785408  }
  0x2e   : > { %3183 = vmatpush2.bf16.msra.mxu1 %v6625_v35  ;;  %2991 = vmatprep.subr.bf16.mxu0 %v6626_v36  ;;  %v6725_v35 = vld [vmem:[%s10238_s2 + $0x220] ss:$8 sps:$4 sm:$0xff]  }
  0x2f   : > { %3184 = vmatprep.subr.bf16.mxu1 %v6628_v37  ;;  %v6699_v36 = vld [vmem:[%s7830_s28 + $0x150] ss:$56 sps:$4 sm:$0xff]   ;;  %v6739_v37 = vld [vmem:[%s10238_s2 + $0x214] ss:$8 sps:$4 sm:$0xff]  }
  0x31   : > { %2992 = vmatpush2.bf16.msra.mxu0 %v6630_v38  ;;  %v6764_v38 = vld [vmem:[%s10238_s2 + $0x320] ss:$8 sps:$4 sm:$0xff]  }
  0x32   : > { %3185 = vmatpush2.bf16.msra.mxu1 %v6631_v39  ;;  %2993 = vmatprep.subr.bf16.mxu0 %v6632_v40  ;;  %v6766_v39 = vld [vmem:[%s10238_s2 + $0x324] ss:$8 sps:$4 sm:$0xff]   ;;  %v6700_v40 = vld [vmem:[%s7830_s28 + $0x158] ss:$56 sps:$4 sm:$0xff]  }
  0x33   : > { %3186 = vmatprep.subr.bf16.mxu1 %v6634_v41  ;;  %v6707_v41 = vld [vmem:[%s7830_s28 + $0x1c4] ss:$56 sps:$4 sm:$0xff]  }
  0x35   : > { %2994 = vmatpush2.bf16.msra.mxu0 %v6636_v42  ;;  %v6709_v42 = vld [vmem:[%s7830_s28 + $0x1cc] ss:$56 sps:$4 sm:$0xff]  }
  0x36   : > { %3187 = vmatpush2.bf16.msra.mxu1 %v6637_v43  ;;  %2995 = vmatprep.subr.bf16.mxu0 %v6638_v44  ;;  %v6737_v43 = vld [vmem:[%s10238_s2 + $0x210] ss:$8 sps:$4 sm:$0xff]   ;;  %v6751_v44 = vld [vmem:[%s10238_s2 + $0x204] ss:$8 sps:$4 sm:$0xff]  }
  0x37   : > { %3188 = vmatprep.subr.bf16.mxu1 %v6640_v45  ;;  %v6776_v45 = vld [vmem:[%s10238_s2 + $0x310] ss:$8 sps:$4 sm:$0xff]  }
  0x39   : > { %2996 = vmatpush2.bf16.msra.mxu0 %v6642_v46  ;;  %v6778_v46 = vld [vmem:[%s10238_s2 + $0x314] ss:$8 sps:$4 sm:$0xff]  }
  0x3a   : > { %3189 = vmatpush2.bf16.msra.mxu1 %v6643_v47  ;;  %2997 = vmatprep.subr.bf16.mxu0 %v6644_v48  ;;  %v6711_v47 = vld [vmem:[%s7830_s28 + $0x1c0] ss:$56 sps:$4 sm:$0xff]  }
  0x3b   : > { %3190 = vmatprep.subr.bf16.mxu1 %v6646_v50  ;;  %v6712_v48 = vld [vmem:[%s7830_s28 + $0x1c8] ss:$56 sps:$4 sm:$0xff]   ;;  %v6719_v50 = vld [vmem:[%s7830_s28 + $0x234] ss:$56 sps:$4 sm:$0xff]  }
  0x3d   : > { %2998 = vmatpush2.bf16.msra.mxu0 %v6648_v52  ;;  %v6721_v52 = vld [vmem:[%s7830_s28 + $0x23c] ss:$56 sps:$4 sm:$0xff]  }
  0x3e   : > { %3191 = vmatpush2.bf16.msra.mxu1 %v6649_v53  ;;  %2999 = vmatprep.subr.bf16.mxu0 %v6650_v54  ;;  %v6761_v53 = vld [vmem:[%s10238_s2 + $0x2f0] ss:$8 sps:$4 sm:$0xff]   ;;  %v6775_v54 = vld [vmem:[%s10238_s2 + $0x2e4] ss:$8 sps:$4 sm:$0xff]  }
  0x3f   : > { %3192 = vmatprep.subr.bf16.mxu1 %v6652_v55  ;;  %v6790_v55 = vld [vmem:[%s10238_s2 + $0x304] ss:$8 sps:$4 sm:$0xff]  }
  0x41   : > { %3000 = vmatpush2.bf16.msra.mxu0 %v6654_v56  ;;  %v6788_v56 = vld [vmem:[%s10238_s2 + $0x300] ss:$8 sps:$4 sm:$0xff]  }
  0x42   : > { %3193 = vmatpush2.bf16.msra.mxu1 %v6655_v57  ;;  %3001 = vmatprep.subr.bf16.mxu0 %v6656_v58  ;;  %v6773_v57 = vld [vmem:[%s10238_s2 + $0x2e0] ss:$8 sps:$4 sm:$0xff]  }
  0x43   : > { %3194 = vmatprep.subr.bf16.mxu1 %v6658_v59  ;;  %v6723_v58 = vld [vmem:[%s7830_s28 + $0x230] ss:$56 sps:$4 sm:$0xff]   ;;  %v6787_v59 = vld [vmem:[%s10238_s2 + $0x2d4] ss:$8 sps:$4 sm:$0xff]  }
  0x45   : > { %3002 = vmatpush2.bf16.msra.mxu0 %v6660_v60  ;;  %v6800_v60 = vld [vmem:[%s10238_s2 + $0x3f0] ss:$8 sps:$4 sm:$0xff]  }
  0x46   : > { %3195 = vmatpush2.bf16.msra.mxu1 %v6661_v61  ;;  %3003 = vmatprep.subr.bf16.mxu0 %v6662_v62  ;;  %v6802_v61 = vld [vmem:[%s10238_s2 + $0x3f4] ss:$8 sps:$4 sm:$0xff]   ;;  %v6724_v62 = vld [vmem:[%s7830_s28 + $0x238] ss:$56 sps:$4 sm:$0xff]  }
  0x47   : > { %3196 = vmatprep.subr.bf16.mxu1 %v6664_v63  ;;  %v6731_v63 = vld [vmem:[%s7830_s28 + $0x2a4] ss:$56 sps:$4 sm:$0xff]  }
  0x49   : > { %3004 = vmatpush2.bf16.msra.mxu0 %v6666_v0  ;;  %v6733_v0 = vld [vmem:[%s7830_s28 + $0x2ac] ss:$56 sps:$4 sm:$0xff]  }
  0x4a   : > { %3197 = vmatpush2.bf16.msra.mxu1 %v6667_v1  ;;  %3359 = vmatprep.subr.bf16.mxu0 %v6676_v2  ;;  %v6785_v1 = vld [vmem:[%s10238_s2 + $0x2d0] ss:$8 sps:$4 sm:$0xff]   ;;  %v6799_v2 = vld [vmem:[%s10238_s2 + $0x2c4] ss:$8 sps:$4 sm:$0xff]  }
  0x4b   : > { %3552 = vmatprep.subr.bf16.mxu1 %v6706_v3  ;;  %v6812_v3 = vld [vmem:[%s10238_s2 + $0x3e0] ss:$8 sps:$4 sm:$0xff]  }
  0x4c   : > { %3006 = vmatmul.mubr.bf16.vlgmr.msra.gmra.mxu0 %v6668_v4  ;;  %v6814_v4 = vld [vmem:[%s10238_s2 + $0x3e4] ss:$8 sps:$4 sm:$0xff]  }
  0x4d   : > { %3199 = vmatmul.mubr.bf16.vlgmr.msra.gmra.mxu1 %v6671_v5  ;;  %3360 = vmatpush1.bf16.msra.mxu0 %v6674_v6  ;;  %v6735_v5 = vld [vmem:[%s7830_s28 + $0x2a0] ss:$56 sps:$4 sm:$0xff]  }
  0x4e   : > { %3015 = vmatprep.mubr.bf16.mxu0 %v6677_v7  ;;  %3208 = vmatprep.mubr.bf16.mxu1 %v6679_v8  ;;  %v6797_v6 = vld [vmem:[%s10238_s2 + $0x2c0] ss:$8 sps:$4 sm:$0xff]   ;;  %v6811_v8 = vld [vmem:[%s10238_s2 + $0x2b4] ss:$8 sps:$4 sm:$0xff]  }
  0x4f   : > { %3361 = vmatprep.subr.bf16.mxu0 %v6685_v9  ;;  %3553 = vmatpush1.bf16.msra.mxu1 %v6704_v10  ;;  %v6736_v7 = vld [vmem:[%s7830_s28 + $0x2a8] ss:$56 sps:$4 sm:$0xff]   ;;  %v6743_v9 = vld [vmem:[%s7830_s28 + $0x314] ss:$56 sps:$4 sm:$0xff]  }
  0x50   : > { %3554 = vmatprep.subr.bf16.mxu1 %v6718_v11  ;;  %v6745_v10 = vld [vmem:[%s7830_s28 + $0x31c] ss:$56 sps:$4 sm:$0xff]   ;;  %v6809_v11 = vld [vmem:[%s10238_s2 + $0x2b0] ss:$8 sps:$4 sm:$0xff]  }
  0x51   : > { %3362 = vmatpush1.bf16.msra.mxu0 %v6683_v12  ;;  %v6826_v12 = vld [vmem:[%s10238_s2 + $0x3d4] ss:$8 sps:$4 sm:$0xff]  }
  0x52   : > { %3363 = vmatprep.subr.bf16.mxu0 %v6694_v14  ;;  %v6824_v14 = vld [vmem:[%s10238_s2 + $0x3d0] ss:$8 sps:$4 sm:$0xff]  }
  0x53   : > { %3555 = vmatpush1.bf16.msra.mxu1 %v6716_v16  ;;  %v6747_v16 = vld [vmem:[%s7830_s28 + $0x310] ss:$56 sps:$4 sm:$0xff]  }
  0x54   : > { %3016 = vmatmul.mubr.bf16.gmra.mxu0 %v6681_v13  ;;  %3556 = vmatprep.subr.bf16.mxu1 %v6730_v20  ;;  %v6823_v13 = vld [vmem:[%s10238_s2 + $0x2a4] ss:$8 sps:$4 sm:$0xff]   ;;  %v6838_v20 = vld [vmem:[%s10238_s2 + $0x294] ss:$8 sps:$4 sm:$0xff]  }
  0x55   : > { %3209 = vmatmul.mubr.bf16.gmra.mxu1 %v6682_v15  ;;  %3025 = vmatprep.mubr.bf16.mxu0 %v6686_v17  ;;  %v6829_v15 = vld [vmem:[%s10238_s2 + $0x3c4] ss:$8 sps:$4 sm:$0xff]   ;;  %v6748_v17 = vld [vmem:[%s7830_s28 + $0x318] ss:$56 sps:$4 sm:$0xff]  }
  0x56   : > { %3218 = vmatprep.mubr.bf16.mxu1 %v6688_v18  ;;  %3364 = vmatpush1.bf16.msra.mxu0 %v6692_v19  ;;  %v6821_v18 = vld [vmem:[%s10238_s2 + $0x2a0] ss:$8 sps:$4 sm:$0xff]  }
  0x57   : > { %3365 = vmatprep.subr.bf16.mxu0 %v6703_v21  ;;  %3557 = vmatpush1.bf16.msra.mxu1 %v6728_v22  ;;  %v6827_v19 = vld [vmem:[%s10238_s2 + $0x3c0] ss:$8 sps:$4 sm:$0xff]   ;;  %v6755_v21 = vld [vmem:[%s7830_s28 + $0x384] ss:$56 sps:$4 sm:$0xff]  }
  0x58   : > { %3558 = vmatprep.subr.bf16.mxu1 %v6742_v23  ;;  %v6757_v22 = vld [vmem:[%s7830_s28 + $0x38c] ss:$56 sps:$4 sm:$0xff]   ;;  %v6836_v23 = vld [vmem:[%s10238_s2 + $0x290] ss:$8 sps:$4 sm:$0xff]  }
  0x5a   : > { %3366 = vmatpush1.bf16.msra.mxu0 %v6701_v26  ;;  %v6844_v26 = vld [vmem:[%s10238_s2 + $0x3a4] ss:$8 sps:$4 sm:$0xff]  }
  0x5b   : > { %3367 = vmatprep.subr.bf16.mxu0 %v6715_v28  ;;  %3559 = vmatpush1.bf16.msra.mxu1 %v6740_v29  ;;  %v6853_v28 = vld [vmem:[%s10238_s2 + $0x284] ss:$8 sps:$4 sm:$0xff]   ;;  %v6759_v29 = vld [vmem:[%s7830_s28 + $0x380] ss:$56 sps:$4 sm:$0xff]  }
  0x5c   : > { %3026 = vmatmul.mubr.bf16.gmra.mxu0 %v6690_v24  ;;  %3560 = vmatprep.subr.bf16.mxu1 %v6754_v33  ;;  %v6841_v24 = vld [vmem:[%s10238_s2 + $0x3b4] ss:$8 sps:$4 sm:$0xff]  }
  0x5d   : > { %3219 = vmatmul.mubr.bf16.gmra.mxu1 %v6691_v25  ;;  %3035 = vmatprep.mubr.bf16.mxu0 %v6695_v27  ;;  %v6839_v25 = vld [vmem:[%s10238_s2 + $0x3b0] ss:$8 sps:$4 sm:$0xff]   ;;  %v6851_v27 = vld [vmem:[%s10238_s2 + $0x280] ss:$8 sps:$4 sm:$0xff]   ;;  %v6769_v33 = vld [vmem:[%s7830_s28 + $0x3fc] ss:$56 sps:$4 sm:$0xff]  }
  0x5e   : > { %3228 = vmatprep.mubr.bf16.mxu1 %v6697_v30  ;;  %3368 = vmatpush1.bf16.msra.mxu0 %v6713_v31  ;;  %v6842_v30 = vld [vmem:[%s10238_s2 + $0x3a0] ss:$8 sps:$4 sm:$0xff]  }
  0x5f   : > { %3369 = vmatprep.subr.bf16.mxu0 %v6727_v32  ;;  %3561 = vmatpush1.bf16.msra.mxu1 %v6752_v34  ;;  %v6760_v31 = vld [vmem:[%s7830_s28 + $0x388] ss:$56 sps:$4 sm:$0xff]   ;;  %v6767_v32 = vld [vmem:[%s7830_s28 + $0x3f4] ss:$56 sps:$4 sm:$0xff]  }
  0x60   : > { %3562 = vmatprep.subr.bf16.mxu1 %v6766_v39  ;;  %v6856_v34 = vld [vmem:[%s10238_s2 + $0x394] ss:$8 sps:$4 sm:$0xff]   ;;  %v6857_v39 = vld [vmem:[%s10238_s2 + $0x380] ss:$8 sps:$4 sm:$0xff]  }
  0x62   : > { %3370 = vmatpush1.bf16.msra.mxu0 %v6725_v35  ;;  %v6854_v35 = vld [vmem:[%s10238_s2 + $0x390] ss:$8 sps:$4 sm:$0xff]  }
  0x63   : > { %3371 = vmatprep.subr.bf16.mxu0 %v6739_v37  ;;  %3563 = vmatpush1.bf16.msra.mxu1 %v6764_v38  ;;  %v6868_v37 = vld [vmem:[%s10238_s2 + $0x474] ss:$8 sps:$4 sm:$0xff]   ;;  %v6771_v38 = vld [vmem:[%s7830_s28 + $0x3f0] ss:$56 sps:$4 sm:$0xff]  }
  0x64   : > { %3036 = vmatmul.mubr.bf16.gmra.mxu0 %v6699_v36  ;;  %3564 = vmatprep.subr.bf16.mxu1 %v6778_v46  ;;  %v6859_v36 = vld [vmem:[%s10238_s2 + $0x384] ss:$8 sps:$4 sm:$0xff]   ;;  %v6793_v46 = vld [vmem:[%s7830_s28 + $0x4dc] ss:$56 sps:$4 sm:$0xff]  }
  0x65   : > { %3229 = vmatmul.mubr.bf16.gmra.mxu1 %v6700_v40  ;;  %3045 = vmatprep.mubr.bf16.mxu0 %v6707_v41  ;;  %v6772_v40 = vld [vmem:[%s7830_s28 + $0x3f8] ss:$56 sps:$4 sm:$0xff]   ;;  %v6779_v41 = vld [vmem:[%s7830_s28 + $0x464] ss:$56 sps:$4 sm:$0xff]  }
  0x66   : > { %3238 = vmatprep.mubr.bf16.mxu1 %v6709_v42  ;;  %3372 = vmatpush1.bf16.msra.mxu0 %v6737_v43  ;;  %v6781_v42 = vld [vmem:[%s7830_s28 + $0x46c] ss:$56 sps:$4 sm:$0xff]   ;;  %v6783_v43 = vld [vmem:[%s7830_s28 + $0x460] ss:$56 sps:$4 sm:$0xff]  }
  0x67   : > { %3373 = vmatprep.subr.bf16.mxu0 %v6751_v44  ;;  %3565 = vmatpush1.bf16.msra.mxu1 %v6776_v45  ;;  %v6784_v44 = vld [vmem:[%s7830_s28 + $0x468] ss:$56 sps:$4 sm:$0xff]   ;;  %v6791_v45 = vld [vmem:[%s7830_s28 + $0x4d4] ss:$56 sps:$4 sm:$0xff]  }
  0x68   : > { %3566 = vmatprep.subr.bf16.mxu1 %v6790_v55  ;;  %v6815_v55 = vld [vmem:[%s7830_s28 + $0x5b4] ss:$56 sps:$4 sm:$0xff]  }
  0x6a   : > { %3374 = vmatpush1.bf16.msra.mxu0 %v6749_v49  ;;  %v6796_v49 = vld [vmem:[%s7830_s28 + $0x4d8] ss:$56 sps:$4 sm:$0xff]  }
  0x6b   : > { %3375 = vmatprep.subr.bf16.mxu0 %v6763_v51  ;;  %3567 = vmatpush1.bf16.msra.mxu1 %v6788_v56  ;;  %v6805_v51 = vld [vmem:[%s7830_s28 + $0x54c] ss:$56 sps:$4 sm:$0xff]   ;;  %v6817_v56 = vld [vmem:[%s7830_s28 + $0x5bc] ss:$56 sps:$4 sm:$0xff]  }
  0x6c   : > { %3046 = vmatmul.mubr.bf16.gmra.mxu0 %v6711_v47  ;;  %3568 = vmatprep.subr.bf16.mxu1 %v6802_v61  ;;  %v6898_v47 = vld [vmem:[%s10238_s2 + $0x574] ss:$8 sps:$4 sm:$0xff]  }
  0x6d   : > { %3239 = vmatmul.mubr.bf16.gmra.mxu1 %v6712_v48  ;;  %3055 = vmatprep.mubr.bf16.mxu0 %v6719_v50  ;;  %v6795_v48 = vld [vmem:[%s7830_s28 + $0x4d0] ss:$56 sps:$4 sm:$0xff]   ;;  %v6803_v50 = vld [vmem:[%s7830_s28 + $0x544] ss:$56 sps:$4 sm:$0xff]  }
  0x6e   : > { %3248 = vmatprep.mubr.bf16.mxu1 %v6721_v52  ;;  %3376 = vmatpush2.bf16.msra.mxu0 %v6761_v53  ;;  %v723_v52 = vlaneseq  ;;  %v6807_v53 = vld [vmem:[%s7830_s28 + $0x540] ss:$56 sps:$4 sm:$0xff]   ;;  %v6830_v61 = vld [vmem:[%s7830_s28 + $0x624] ss:$56 sps:$4 sm:$0xff]  }
  0x6f   : > { %3377 = vmatprep.subr.bf16.mxu0 %v6775_v54  ;;  %3569 = vmatpush2.bf16.msra.mxu1 %v6800_v60  ;;  %v6808_v54 = vld [vmem:[%s7830_s28 + $0x548] ss:$56 sps:$4 sm:$0xff]   ;;  %v6820_v60 = vld [vmem:[%s7830_s28 + $0x5b8] ss:$56 sps:$4 sm:$0xff]  }
  0x70   : > { %3570 = vmatprep.subr.bf16.mxu1 %v6814_v4  ;;  %v6847_v4 = vld [vmem:[%s7830_s28 + $0x69c] ss:$56 sps:$4 sm:$0xff]  }
  0x72   : > { %3378 = vmatpush2.bf16.msra.mxu0 %v6773_v57  ;;  %v8141_v57 = vshrl.u32 %v723_v52, 7  ;;  %v6982_v52 = vld [vmem:[%s10238_s2 + $0x504] ss:$8 sps:$4 sm:$0xff]  }
  0x73   : > { %3379 = vmatprep.subr.bf16.mxu0 %v6787_v59  ;;  %3571 = vmatpush2.bf16.msra.mxu1 %v6812_v3  ;;  %v6819_v59 = vld [vmem:[%s7830_s28 + $0x5b0] ss:$56 sps:$4 sm:$0xff]   ;;  %v6845_v3 = vld [vmem:[%s7830_s28 + $0x694] ss:$56 sps:$4 sm:$0xff]  }
  0x74   : > { %3056 = vmatmul.mubr.bf16.gmra.mxu0 %v6723_v58  ;;  %3572 = vmatprep.subr.bf16.mxu1 %v6826_v12  ;;  %v725_v58 = vsub.s32 0, %v8141_v57  ;;  %v6869_v12 = vld [vmem:[%s7830_s28 + $0x84] ss:$56 sps:$4 sm:$0xff]  }
  0x75   : > { %3249 = vmatmul.mubr.bf16.gmra.mxu1 %v6724_v62  ;;  %3065 = vmatprep.mubr.bf16.mxu0 %v6731_v63  ;;  %v6832_v62 = vld [vmem:[%s7830_s28 + $0x62c] ss:$56 sps:$4 sm:$0xff]   ;;  %v8151_v63 = vld [vmem:[%s10239_s3] sm:$0x3] }
  0x76   : > { %3258 = vmatprep.mubr.bf16.mxu1 %v6733_v0  ;;  %3380 = vmatpush2.bf16.msra.mxu0 %v6785_v1  ;;  %v8154_v0 = vrot.slane %v8151_v63, %v725_v58  ;;  %v6834_v1 = vld [vmem:[%s7830_s28 + $0x620] ss:$56 sps:$4 sm:$0xff]  }
  0x77   : > { %3381 = vmatprep.subr.bf16.mxu0 %v6799_v2  ;;  %3573 = vmatpush2.bf16.msra.mxu1 %v6824_v14  ;;  %v6835_v2 = vld [vmem:[%s7830_s28 + $0x628] ss:$56 sps:$4 sm:$0xff]   ;;  %v6877_v14 = vld [vmem:[%s10238_s2 + $0x464] ss:$8 sps:$4 sm:$0xff]  }
  0x78   : > { %3574 = vmatprep.subr.bf16.mxu1 %v6829_v15  ;;  %v6896_v15 = vld [vmem:[%s10238_s2 + $0x570] ss:$8 sps:$4 sm:$0xff]   ;;  %v6980_v58 = vld [vmem:[%s10238_s2 + $0x500] ss:$8 sps:$4 sm:$0xff]  }
  0x7a   : > { %3382 = vmatpush2.bf16.msra.mxu0 %v6797_v6  ;;  %v6850_v6 = vld [vmem:[%s7830_s28 + $0x698] ss:$56 sps:$4 sm:$0xff]  }
  0x7b   : > { %3383 = vmatprep.subr.bf16.mxu0 %v6811_v8  ;;  %3575 = vmatpush2.bf16.msra.mxu1 %v6827_v19  ;;  %v6865_v8 = vld [vmem:[%s7830_s28 + $0x1c] ss:$56 sps:$4 sm:$0xff]  }
  0x7c   : > { %3066 = vmatmul.mubr.bf16.gmra.mxu0 %v6735_v5  ;;  %3576 = vmatprep.subr.bf16.mxu1 %v6841_v24  ;;  %v6849_v5 = vld [vmem:[%s7830_s28 + $0x690] ss:$56 sps:$4 sm:$0xff]   ;;  %v6886_v19 = vld [vmem:[%s10238_s2 + $0x454] ss:$8 sps:$4 sm:$0xff]  }
  0x7d   : > { %3259 = vmatmul.mubr.bf16.gmra.mxu1 %v6736_v7  ;;  %3075 = vmatprep.mubr.bf16.mxu0 %v6743_v9  ;;  %v6862_v7 = vld [vmem:[%s7830_s28 + $0x14] ss:$56 sps:$4 sm:$0xff]   ;;  %v6860_v9 = vld [vmem:[%s7830_s28 + $0x10] ss:$56 sps:$4 sm:$0xff]  }
  0x7e   : > { %3268 = vmatprep.mubr.bf16.mxu1 %v6745_v10  ;;  %3384 = vmatpush2.bf16.msra.mxu0 %v6809_v11  ;;  %v6863_v10 = vld [vmem:[%s7830_s28 + $0x18] ss:$56 sps:$4 sm:$0xff]  }
  0x7f   : > { %3385 = vmatprep.subr.bf16.mxu0 %v6823_v13  ;;  %3577 = vmatpush2.bf16.msra.mxu1 %v6839_v25  ;;  %v6866_v11 = vld [vmem:[%s10238_s2 + $0x470] ss:$8 sps:$4 sm:$0xff]   ;;  %v6871_v13 = vld [vmem:[%s7830_s28 + $0x8c] ss:$56 sps:$4 sm:$0xff]   ;;  %v6922_v25 = vld [vmem:[%s10238_s2 + $0x554] ss:$8 sps:$4 sm:$0xff]  }
  0x80   : > { %3578 = vmatprep.subr.bf16.mxu1 %v6844_v26  ;;  %v6884_v24 = vld [vmem:[%s10238_s2 + $0x450] ss:$8 sps:$4 sm:$0xff]   ;;  %v6895_v26 = vld [vmem:[%s10238_s2 + $0x444] ss:$8 sps:$4 sm:$0xff]  }
  0x82   : > { %3386 = vmatpush2.bf16.msra.mxu0 %v6821_v18  ;;  %v6873_v18 = vld [vmem:[%s7830_s28 + $0x80] ss:$56 sps:$4 sm:$0xff]  }
  0x83   : > { %3387 = vmatprep.subr.bf16.mxu0 %v6838_v20  ;;  %3579 = vmatpush2.bf16.msra.mxu1 %v6842_v30  ;;  %v6874_v20 = vld [vmem:[%s7830_s28 + $0x88] ss:$56 sps:$4 sm:$0xff]   ;;  %v6883_v30 = vld [vmem:[%s7830_s28 + $0xf8] ss:$56 sps:$4 sm:$0xff]  }
  0x84   : > { %3076 = vmatmul.mubr.bf16.gmra.mxu0 %v6747_v16  ;;  %3580 = vmatprep.subr.bf16.mxu1 %v6856_v34  ;;  %v6910_v16 = vld [vmem:[%s10238_s2 + $0x564] ss:$8 sps:$4 sm:$0xff]  }
  0x85   : > { %3269 = vmatmul.mubr.bf16.gmra.mxu1 %v6748_v17  ;;  %3085 = vmatprep.mubr.bf16.mxu0 %v6755_v21  ;;  %v6875_v17 = vld [vmem:[%s10238_s2 + $0x460] ss:$8 sps:$4 sm:$0xff]   ;;  %v6887_v34 = vld [vmem:[%s7830_s28 + $0x164] ss:$56 sps:$4 sm:$0xff]  }
  0x86   : > { %3278 = vmatprep.mubr.bf16.mxu1 %v6757_v22  ;;  %3388 = vmatpush2.bf16.msra.mxu0 %v6836_v23  ;;  %v6908_v21 = vld [vmem:[%s10238_s2 + $0x560] ss:$8 sps:$4 sm:$0xff]   ;;  %v6878_v22 = vld [vmem:[%s7830_s28 + $0xf4] ss:$56 sps:$4 sm:$0xff]  }
  0x87   : > { %3389 = vmatprep.subr.bf16.mxu0 %v6853_v28  ;;  %3581 = vmatpush2.bf16.msra.mxu1 %v6854_v35  ;;  %v6880_v23 = vld [vmem:[%s7830_s28 + $0xfc] ss:$56 sps:$4 sm:$0xff]   ;;  %v6934_v28 = vld [vmem:[%s10238_s2 + $0x544] ss:$8 sps:$4 sm:$0xff]  }
  0x88   : > { %3582 = vmatprep.subr.bf16.mxu1 %v6859_v36  ;;  %v6889_v35 = vld [vmem:[%s7830_s28 + $0x16c] ss:$56 sps:$4 sm:$0xff]   ;;  %v6905_v36 = vld [vmem:[%s10238_s2 + $0x430] ss:$8 sps:$4 sm:$0xff]  }
  0x8a   : > { %3390 = vmatpush2.bf16.msra.mxu0 %v6851_v27  ;;  %v6920_v27 = vld [vmem:[%s10238_s2 + $0x550] ss:$8 sps:$4 sm:$0xff]  }
  0x8b   : > { %3745 = vmatprep.subr.bf16.mxu0 %v6868_v37  ;;  %3583 = vmatpush2.bf16.msra.mxu1 %v6857_v39  ;;  %v6946_v37 = vld [vmem:[%s10238_s2 + $0x534] ss:$8 sps:$4 sm:$0xff]   ;;  %v6944_v39 = vld [vmem:[%s10238_s2 + $0x530] ss:$8 sps:$4 sm:$0xff]  }
  0x8c   : > { %3086 = vmatmul.mubr.bf16.gmra.mxu0 %v6759_v29  ;;  %3938 = vmatprep.subr.bf16.mxu1 %v6898_v47  ;;  %v6882_v29 = vld [vmem:[%s7830_s28 + $0xf0] ss:$56 sps:$4 sm:$0xff]   ;;  %v6901_v47 = vld [vmem:[%s7830_s28 + $0x1dc] ss:$56 sps:$4 sm:$0xff]  }
  0x8d   : > { %3279 = vmatmul.mubr.bf16.gmra.mxu1 %v6760_v31  ;;  %3095 = vmatprep.mubr.bf16.mxu0 %v6767_v32  ;;  %v6893_v31 = vld [vmem:[%s10238_s2 + $0x440] ss:$8 sps:$4 sm:$0xff]   ;;  %v6907_v32 = vld [vmem:[%s10238_s2 + $0x434] ss:$8 sps:$4 sm:$0xff]  }
  0x8e   : > { %3288 = vmatprep.mubr.bf16.mxu1 %v6769_v33  ;;  %v6932_v33 = vld [vmem:[%s10238_s2 + $0x540] ss:$8 sps:$4 sm:$0xff]  }
  0x94   : > { %3096 = vmatmul.mubr.bf16.gmra.mxu0 %v6771_v38  ;;  %v6919_v38 = vld [vmem:[%s10238_s2 + $0x424] ss:$8 sps:$4 sm:$0xff]  }
  0x95   : > { %3289 = vmatmul.mubr.bf16.gmra.mxu1 %v6772_v40  ;;  %3105 = vmatprep.mubr.bf16.mxu0 %v6779_v41  ;;  %v6958_v40 = vld [vmem:[%s10238_s2 + $0x524] ss:$8 sps:$4 sm:$0xff]   ;;  %v6891_v41 = vld [vmem:[%s7830_s28 + $0x160] ss:$56 sps:$4 sm:$0xff]  }
  0x96   : > { %3298 = vmatprep.mubr.bf16.mxu1 %v6781_v42  ;;  %v6892_v42 = vld [vmem:[%s7830_s28 + $0x168] ss:$56 sps:$4 sm:$0xff]  }
  0x9c   : > { %3106 = vmatmul.mubr.bf16.gmra.mxu0 %v6783_v43  ;;  %v6917_v43 = vld [vmem:[%s10238_s2 + $0x420] ss:$8 sps:$4 sm:$0xff]  }
  0x9d   : > { %3299 = vmatmul.mubr.bf16.gmra.mxu1 %v6784_v44  ;;  %3115 = vmatprep.mubr.bf16.mxu0 %v6791_v45  ;;  %v6931_v44 = vld [vmem:[%s10238_s2 + $0x414] ss:$8 sps:$4 sm:$0xff]   ;;  %v6956_v45 = vld [vmem:[%s10238_s2 + $0x520] ss:$8 sps:$4 sm:$0xff]  }
  0x9e   : > { %3308 = vmatprep.mubr.bf16.mxu1 %v6793_v46  ;;  %v6899_v46 = vld [vmem:[%s7830_s28 + $0x1d4] ss:$56 sps:$4 sm:$0xff]  }
  0xa4   : > { %3116 = vmatmul.mubr.bf16.gmra.mxu0 %v6795_v48  ;;  %v6929_v48 = vld [vmem:[%s10238_s2 + $0x410] ss:$8 sps:$4 sm:$0xff]  }
  0xa5   : > { %3309 = vmatmul.mubr.bf16.gmra.mxu1 %v6796_v49  ;;  %3125 = vmatprep.mubr.bf16.mxu0 %v6803_v50  ;;  %v6970_v49 = vld [vmem:[%s10238_s2 + $0x514] ss:$8 sps:$4 sm:$0xff]   ;;  %v6943_v50 = vld [vmem:[%s10238_s2 + $0x404] ss:$8 sps:$4 sm:$0xff]  }
  0xa6   : > { %3318 = vmatprep.mubr.bf16.mxu1 %v6805_v51  ;;  %v6968_v51 = vld [vmem:[%s10238_s2 + $0x510] ss:$8 sps:$4 sm:$0xff]  }
  0xac   : > { %3126 = vmatmul.mubr.bf16.gmra.mxu0 %v6807_v53  ;;  %v6903_v53 = vld [vmem:[%s7830_s28 + $0x1d0] ss:$56 sps:$4 sm:$0xff]  }
  0xad   : > { %3319 = vmatmul.mubr.bf16.gmra.mxu1 %v6808_v54  ;;  %3135 = vmatprep.mubr.bf16.mxu0 %v6815_v55  ;;  %v6904_v54 = vld [vmem:[%s7830_s28 + $0x1d8] ss:$56 sps:$4 sm:$0xff]   ;;  %v6941_v55 = vld [vmem:[%s10238_s2 + $0x400] ss:$8 sps:$4 sm:$0xff]  }
  0xae   : > { %3328 = vmatprep.mubr.bf16.mxu1 %v6817_v56  ;;  %v6955_v56 = vld [vmem:[%s10238_s2 + $0x4f4] ss:$8 sps:$4 sm:$0xff]  }
  0xb4   : > { %3136 = vmatmul.mubr.bf16.gmra.mxu0 %v6819_v59  ;;  %v6911_v59 = vld [vmem:[%s7830_s28 + $0x244] ss:$56 sps:$4 sm:$0xff]  }
  0xb5   : > { %3329 = vmatmul.mubr.bf16.gmra.mxu1 %v6820_v60  ;;  %3145 = vmatprep.mubr.bf16.mxu0 %v6830_v61  ;;  %v6913_v60 = vld [vmem:[%s7830_s28 + $0x24c] ss:$56 sps:$4 sm:$0xff]   ;;  %v6953_v61 = vld [vmem:[%s10238_s2 + $0x4f0] ss:$8 sps:$4 sm:$0xff]  }
  0xb6   : > { %3338 = vmatprep.mubr.bf16.mxu1 %v6832_v62  ;;  %v6994_v62 = vld [vmem:[%s10238_s2 + $0x5f4] ss:$8 sps:$4 sm:$0xff]  }
  0xbc   : > { %3146 = vmatmul.mubr.bf16.gmra.mxu0 %v6834_v1  ;;  %v6967_v1 = vld [vmem:[%s10238_s2 + $0x4e4] ss:$8 sps:$4 sm:$0xff]  }
  0xbd   : > { %3339 = vmatmul.mubr.bf16.gmra.mxu1 %v6835_v2  ;;  %3155 = vmatprep.mubr.bf16.mxu0 %v6845_v3  ;;  %v6992_v2 = vld [vmem:[%s10238_s2 + $0x5f0] ss:$8 sps:$4 sm:$0xff]   ;;  %v7006_v3 = vld [vmem:[%s10238_s2 + $0x5e4] ss:$8 sps:$4 sm:$0xff]  }
  0xbe   : > { %3348 = vmatprep.mubr.bf16.mxu1 %v6847_v4  ;;  %v6915_v4 = vld [vmem:[%s7830_s28 + $0x240] ss:$56 sps:$4 sm:$0xff]  }
  0xc4   : > { %3156 = vmatmul.mubr.bf16.gmra.mxu0 %v6849_v5  ;;  %v6916_v5 = vld [vmem:[%s7830_s28 + $0x248] ss:$56 sps:$4 sm:$0xff]  }
  0xc5   : > { %3349 = vmatmul.mubr.bf16.gmra.mxu1 %v6850_v6  ;;  %3391 = vmatprep.mubr.bf16.mxu0 %v6862_v7  ;;  %v6965_v6 = vld [vmem:[%s10238_s2 + $0x4e0] ss:$8 sps:$4 sm:$0xff]   ;;  %v6979_v7 = vld [vmem:[%s10238_s2 + $0x4d4] ss:$8 sps:$4 sm:$0xff]  }
  0xc6   : > { %3584 = vmatprep.mubr.bf16.mxu1 %v6865_v8  ;;  %v7004_v8 = vld [vmem:[%s10238_s2 + $0x5e0] ss:$8 sps:$4 sm:$0xff]  }
  0xcc   : > { %3392 = vmatmul.mubr.bf16.vlgmr.msra.gmra.mxu0 %v6860_v9  ;;  %v6923_v9 = vld [vmem:[%s7830_s28 + $0x2b4] ss:$56 sps:$4 sm:$0xff]  }
  0xcd   : > { %3585 = vmatmul.mubr.bf16.vlgmr.msra.gmra.mxu1 %v6863_v10  ;;  %3746 = vmatpush1.bf16.msra.mxu0 %v6866_v11  ;;  %v6925_v10 = vld [vmem:[%s7830_s28 + $0x2bc] ss:$56 sps:$4 sm:$0xff]   ;;  %v6977_v11 = vld [vmem:[%s10238_s2 + $0x4d0] ss:$8 sps:$4 sm:$0xff]  }
  0xce   : > { %3401 = vmatprep.mubr.bf16.mxu0 %v6869_v12  ;;  %3594 = vmatprep.mubr.bf16.mxu1 %v6871_v13  ;;  %v7018_v12 = vld [vmem:[%s10238_s2 + $0x5d4] ss:$8 sps:$4 sm:$0xff]   ;;  %v6991_v13 = vld [vmem:[%s10238_s2 + $0x4c4] ss:$8 sps:$4 sm:$0xff]  }
  0xcf   : > { %3747 = vmatprep.subr.bf16.mxu0 %v6877_v14  ;;  %3939 = vmatpush1.bf16.msra.mxu1 %v6896_v15  ;;  %v7016_v14 = vld [vmem:[%s10238_s2 + $0x5d0] ss:$8 sps:$4 sm:$0xff]   ;;  %v7021_v15 = vld [vmem:[%s10238_s2 + $0x5c4] ss:$8 sps:$4 sm:$0xff]  }
  0xd0   : > { %3940 = vmatprep.subr.bf16.mxu1 %v6910_v16  ;;  %v6989_v16 = vld [vmem:[%s10238_s2 + $0x4c0] ss:$8 sps:$4 sm:$0xff]  }
  0xd1   : > { %3748 = vmatpush1.bf16.msra.mxu0 %v6875_v17  ;;  %v6927_v17 = vld [vmem:[%s7830_s28 + $0x2b0] ss:$56 sps:$4 sm:$0xff]  }
  0xd2   : > { %3749 = vmatprep.subr.bf16.mxu0 %v6886_v19  ;;  %v6935_v19 = vld [vmem:[%s7830_s28 + $0x324] ss:$56 sps:$4 sm:$0xff]  }
  0xd3   : > { %3941 = vmatpush1.bf16.msra.mxu1 %v6908_v21  ;;  %v7003_v21 = vld [vmem:[%s10238_s2 + $0x4b4] ss:$8 sps:$4 sm:$0xff]  }
  0xd4   : > { %3402 = vmatmul.mubr.bf16.gmra.mxu0 %v6873_v18  ;;  %3942 = vmatprep.subr.bf16.mxu1 %v6922_v25  ;;  %v6928_v18 = vld [vmem:[%s7830_s28 + $0x2b8] ss:$56 sps:$4 sm:$0xff]  }
  0xd5   : > { %3595 = vmatmul.mubr.bf16.gmra.mxu1 %v6874_v20  ;;  %3411 = vmatprep.mubr.bf16.mxu0 %v6878_v22  ;;  %v6937_v20 = vld [vmem:[%s7830_s28 + $0x32c] ss:$56 sps:$4 sm:$0xff]   ;;  %v7019_v22 = vld [vmem:[%s10238_s2 + $0x5c0] ss:$8 sps:$4 sm:$0xff]   ;;  %v7031_v25 = vld [vmem:[%s10238_s2 + $0x5b0] ss:$8 sps:$4 sm:$0xff]  }
  0xd6   : > { %3604 = vmatprep.mubr.bf16.mxu1 %v6880_v23  ;;  %3750 = vmatpush1.bf16.msra.mxu0 %v6884_v24  ;;  %v7001_v23 = vld [vmem:[%s10238_s2 + $0x4b0] ss:$8 sps:$4 sm:$0xff]   ;;  %v7015_v24 = vld [vmem:[%s10238_s2 + $0x4a4] ss:$8 sps:$4 sm:$0xff]  }
  0xd7   : > { %3751 = vmatprep.subr.bf16.mxu0 %v6895_v26  ;;  %3943 = vmatpush1.bf16.msra.mxu1 %v6920_v27  ;;  %v7033_v26 = vld [vmem:[%s10238_s2 + $0x5b4] ss:$8 sps:$4 sm:$0xff]   ;;  %v7036_v27 = vld [vmem:[%s10238_s2 + $0x5a4] ss:$8 sps:$4 sm:$0xff]  }
  0xd8   : > { %3944 = vmatprep.subr.bf16.mxu1 %v6934_v28  ;;  %v7013_v28 = vld [vmem:[%s10238_s2 + $0x4a0] ss:$8 sps:$4 sm:$0xff]  }
  0xda   : > { %3752 = vmatpush1.bf16.msra.mxu0 %v6893_v31  ;;  %v6947_v31 = vld [vmem:[%s7830_s28 + $0x394] ss:$56 sps:$4 sm:$0xff]  }
  0xdb   : > { %3753 = vmatprep.subr.bf16.mxu0 %v6907_v32  ;;  %3945 = vmatpush1.bf16.msra.mxu1 %v6932_v33  ;;  %v6949_v32 = vld [vmem:[%s7830_s28 + $0x39c] ss:$56 sps:$4 sm:$0xff]  }
  0xdc   : > { %3412 = vmatmul.mubr.bf16.gmra.mxu0 %v6882_v29  ;;  %3946 = vmatprep.subr.bf16.mxu1 %v6946_v37  ;;  %v6939_v29 = vld [vmem:[%s7830_s28 + $0x320] ss:$56 sps:$4 sm:$0xff]   ;;  %v7030_v33 = vld [vmem:[%s10238_s2 + $0x494] ss:$8 sps:$4 sm:$0xff]  }
  0xdd   : > { %3605 = vmatmul.mubr.bf16.gmra.mxu1 %v6883_v30  ;;  %3421 = vmatprep.mubr.bf16.mxu0 %v6887_v34  ;;  %v6940_v30 = vld [vmem:[%s7830_s28 + $0x328] ss:$56 sps:$4 sm:$0xff]   ;;  %v7046_v37 = vld [vmem:[%s10238_s2 + $0x590] ss:$8 sps:$4 sm:$0xff]  }
  0xde   : > { %3614 = vmatprep.mubr.bf16.mxu1 %v6889_v35  ;;  %3754 = vmatpush1.bf16.msra.mxu0 %v6905_v36  ;;  %v7034_v34 = vld [vmem:[%s10238_s2 + $0x5a0] ss:$8 sps:$4 sm:$0xff]   ;;  %v7028_v35 = vld [vmem:[%s10238_s2 + $0x490] ss:$8 sps:$4 sm:$0xff]   ;;  %v7045_v36 = vld [vmem:[%s10238_s2 + $0x484] ss:$8 sps:$4 sm:$0xff]  }
  0xdf   : > { %3755 = vmatprep.subr.bf16.mxu0 %v6919_v38  ;;  %3947 = vmatpush1.bf16.msra.mxu1 %v6944_v39  ;;  %v7048_v38 = vld [vmem:[%s10238_s2 + $0x594] ss:$8 sps:$4 sm:$0xff]   ;;  %v7051_v39 = vld [vmem:[%s10238_s2 + $0x584] ss:$8 sps:$4 sm:$0xff]  }
  0xe0   : > { %3948 = vmatprep.subr.bf16.mxu1 %v6958_v40  ;;  %v7043_v40 = vld [vmem:[%s10238_s2 + $0x480] ss:$8 sps:$4 sm:$0xff]  }
  0xe2   : > { %3756 = vmatpush1.bf16.msra.mxu0 %v6917_v43  ;;  %v729_v43 = vsub.s32 1, %v8141_v57 }
  0xe3   : > { %3757 = vmatprep.subr.bf16.mxu0 %v6931_v44  ;;  %3949 = vmatpush1.bf16.msra.mxu1 %v6956_v45  ;;  %v7049_v44 = vld [vmem:[%s10238_s2 + $0x580] ss:$8 sps:$4 sm:$0xff]   ;;  %v7060_v45 = vld [vmem:[%s10238_s2 + $0x674] ss:$8 sps:$4 sm:$0xff]  }
  0xe4   : > { %3422 = vmatmul.mubr.bf16.gmra.mxu0 %v6891_v41  ;;  %3950 = vmatprep.subr.bf16.mxu1 %v6970_v49  ;;  %v6951_v41 = vld [vmem:[%s7830_s28 + $0x390] ss:$56 sps:$4 sm:$0xff]  }
  0xe5   : > { %3615 = vmatmul.mubr.bf16.gmra.mxu1 %v6892_v42  ;;  %3431 = vmatprep.mubr.bf16.mxu0 %v6899_v46  ;;  %v6952_v42 = vld [vmem:[%s7830_s28 + $0x398] ss:$56 sps:$4 sm:$0xff]   ;;  %v6959_v46 = vld [vmem:[%s7830_s28 + $0x404] ss:$56 sps:$4 sm:$0xff]  }
  0xe6   : > { %3624 = vmatprep.mubr.bf16.mxu1 %v6901_v47  ;;  %3758 = vmatpush1.bf16.msra.mxu0 %v6929_v48  ;;  %v6961_v47 = vld [vmem:[%s7830_s28 + $0x40c] ss:$56 sps:$4 sm:$0xff]   ;;  %v8391_v48 = vrot.slane %v8151_v63, %v729_v43 }
  0xe7   : > { %3759 = vmatprep.subr.bf16.mxu0 %v6943_v50  ;;  %3951 = vmatpush1.bf16.msra.mxu1 %v6968_v51 }
  0xe8   : > { %3952 = vmatprep.subr.bf16.mxu1 %v6982_v52 }
  0xea   : > { %3760 = vmatpush1.bf16.msra.mxu0 %v6941_v55  ;;  %v6964_v55 = vld [vmem:[%s7830_s28 + $0x408] ss:$56 sps:$4 sm:$0xff]  }
  0xeb   : > { %3761 = vmatprep.subr.bf16.mxu0 %v6955_v56  ;;  %3953 = vmatpush1.bf16.msra.mxu1 %v6980_v58 }
  0xec   : > { %3432 = vmatmul.mubr.bf16.gmra.mxu0 %v6903_v53  ;;  %3954 = vmatprep.subr.bf16.mxu1 %v6994_v62  ;;  %v6973_v62 = vld [vmem:[%s7830_s28 + $0x47c] ss:$56 sps:$4 sm:$0xff]  }
  0xed   : > { %3625 = vmatmul.mubr.bf16.gmra.mxu1 %v6904_v54  ;;  %3441 = vmatprep.mubr.bf16.mxu0 %v6911_v59  ;;  %v6963_v54 = vld [vmem:[%s7830_s28 + $0x400] ss:$56 sps:$4 sm:$0xff]  }
  0xee   : > { %3634 = vmatprep.mubr.bf16.mxu1 %v6913_v60  ;;  %3762 = vmatpush2.bf16.msra.mxu0 %v6953_v61  ;;  %v6971_v61 = vld [vmem:[%s7830_s28 + $0x474] ss:$56 sps:$4 sm:$0xff]  }
  0xef   : > { %3763 = vmatprep.subr.bf16.mxu0 %v6967_v1  ;;  %3955 = vmatpush2.bf16.msra.mxu1 %v6992_v2 }
  0xf0   : > { %3956 = vmatprep.subr.bf16.mxu1 %v7006_v3 }
  0xf2   : > { %3764 = vmatpush2.bf16.msra.mxu0 %v6965_v6 }
  0xf3   : > { %3765 = vmatprep.subr.bf16.mxu0 %v6979_v7  ;;  %3957 = vmatpush2.bf16.msra.mxu1 %v7004_v8 }
  0xf4   : > { %3442 = vmatmul.mubr.bf16.gmra.mxu0 %v6915_v4  ;;  %3958 = vmatprep.subr.bf16.mxu1 %v7018_v12 }
  0xf5   : > { %3635 = vmatmul.mubr.bf16.gmra.mxu1 %v6916_v5  ;;  %3451 = vmatprep.mubr.bf16.mxu0 %v6923_v9 }
  0xf6   : > { %3644 = vmatprep.mubr.bf16.mxu1 %v6925_v10  ;;  %3766 = vmatpush2.bf16.msra.mxu0 %v6977_v11 }
  0xf7   : > { %3767 = vmatprep.subr.bf16.mxu0 %v6991_v13  ;;  %3959 = vmatpush2.bf16.msra.mxu1 %v7016_v14  ;;  %v6975_v13 = vld [vmem:[%s7830_s28 + $0x470] ss:$56 sps:$4 sm:$0xff]  }
  0xf8   : > { %3960 = vmatprep.subr.bf16.mxu1 %v7021_v15  ;;  %v6976_v14 = vld [vmem:[%s7830_s28 + $0x478] ss:$56 sps:$4 sm:$0xff]  }
  0xfa   : > { %3768 = vmatpush2.bf16.msra.mxu0 %v6989_v16 }
  0xfb   : > { %3769 = vmatprep.subr.bf16.mxu0 %v7003_v21  ;;  %3961 = vmatpush2.bf16.msra.mxu1 %v7019_v22 }
  0xfc   : > { %3452 = vmatmul.mubr.bf16.gmra.mxu0 %v6927_v17  ;;  %3962 = vmatprep.subr.bf16.mxu1 %v7033_v26 }
  0xfd   : > { %3645 = vmatmul.mubr.bf16.gmra.mxu1 %v6928_v18  ;;  %3461 = vmatprep.mubr.bf16.mxu0 %v6935_v19  ;;  %v6983_v19 = vld [vmem:[%s7830_s28 + $0x4e4] ss:$56 sps:$4 sm:$0xff]  }
  0xfe   : > { %3654 = vmatprep.mubr.bf16.mxu1 %v6937_v20  ;;  %3770 = vmatpush2.bf16.msra.mxu0 %v7001_v23  ;;  %v6985_v20 = vld [vmem:[%s7830_s28 + $0x4ec] ss:$56 sps:$4 sm:$0xff]  }
  0xff   : > { %3771 = vmatprep.subr.bf16.mxu0 %v7015_v24  ;;  %3963 = vmatpush2.bf16.msra.mxu1 %v7031_v25 }
 0x100   : > { %3964 = vmatprep.subr.bf16.mxu1 %v7036_v27 }
 0x102   : > { %3772 = vmatpush2.bf16.msra.mxu0 %v7013_v28 }
 0x103   : > { %3773 = vmatprep.subr.bf16.mxu0 %v7030_v33  ;;  %3965 = vmatpush2.bf16.msra.mxu1 %v7034_v34  ;;  %v6987_v33 = vld [vmem:[%s7830_s28 + $0x4e0] ss:$56 sps:$4 sm:$0xff]  }
 0x104   : > { %3462 = vmatmul.mubr.bf16.gmra.mxu0 %v6939_v29  ;;  %3966 = vmatprep.subr.bf16.mxu1 %v7048_v38  ;;  %v6988_v34 = vld [vmem:[%s7830_s28 + $0x4e8] ss:$56 sps:$4 sm:$0xff]  }
 0x105   : > { %3655 = vmatmul.mubr.bf16.gmra.mxu1 %v6940_v30  ;;  %3471 = vmatprep.mubr.bf16.mxu0 %v6947_v31 }
 0x106   : > { %3664 = vmatprep.mubr.bf16.mxu1 %v6949_v32  ;;  %3774 = vmatpush2.bf16.msra.mxu0 %v7028_v35 }
 0x107   : > { %3775 = vmatprep.subr.bf16.mxu0 %v7045_v36  ;;  %3967 = vmatpush2.bf16.msra.mxu1 %v7046_v37 }
 0x108   : > { %3968 = vmatprep.subr.bf16.mxu1 %v7051_v39  ;;  %v6997_v39 = vld [vmem:[%s7830_s28 + $0x554] ss:$56 sps:$4 sm:$0xff]  }
 0x10a   : > { %3776 = vmatpush2.bf16.msra.mxu0 %v7043_v40  ;;  %v7000_v40 = vld [vmem:[%s7830_s28 + $0x55c] ss:$56 sps:$4 sm:$0xff]  }
 0x10b   : > { %3969 = vmatpush2.bf16.msra.mxu1 %v7049_v44  ;;  %4131 = vmatprep.subr.bf16.mxu0 %v7060_v45 }
 0x10c   : > { %v3007_v57 = vpop.f32.mrf.mxu0  ;;  %3472 = vmatmul.mubr.bf16.gmra.mxu0 %v6951_v41  ;;  %6529 = vmatprep.subr.bf16.mxu1 %v7060_v45 }
 0x10d   : > { %v3200_v49 = vpop.f32.mrf.mxu1  ;;  %3665 = vmatmul.mubr.bf16.gmra.mxu1 %v6952_v42  ;;  %v3008_v50 = vadd.f32 %v3007_v57, %v8154_v0  ;;  %3481 = vmatprep.mubr.bf16.mxu0 %v6959_v46 }
 0x10e   : > { %3674 = vmatprep.mubr.bf16.mxu1 %v6961_v47  ;;  %v3009_v51 = vpop.f32.mrf.mxu0 }
 0x10f   : > { %v3202_v52 = vpop.f32.mrf.mxu1  ;;  %v8394_v53 = vadd.f32 %v3200_v49, %v3008_v50  ;;  %v3010_v63 = vadd.f32 %v3009_v51, %v8391_v48 }
 0x110   : > { %v3011_v56 = vpop.f32.mrf.mxu0 }
 0x111   : > { %v3204_v58 = vpop.f32.mrf.mxu1  ;;  %v8399_v59 = vadd.f32 %v3202_v52, %v3010_v63  ;;  %v3012_v60 = vadd.f32 %v3011_v56, %v8154_v0  ;;  %v6998_v56 = vld [vmem:[%s7830_s28 + $0x558] ss:$56 sps:$4 sm:$0xff]  }
 0x112   : > { %v3013_v1 = vpop.f32.mrf.mxu0 }
 0x113   : > { %v3206_v2 = vpop.f32.mrf.mxu1  ;;  %v8404_v3 = vadd.f32 %v3204_v58, %v3012_v60  ;;  %v3014_v4 = vadd.f32 %v3013_v1, %v8391_v48 }
 0x114   : > { %v3017_v5 = vpop.f32.mrf.mxu0  ;;  %3482 = vmatmul.mubr.bf16.gmra.mxu0 %v6963_v54 }
 0x115   : > { %v3210_v6 = vpop.f32.mrf.mxu1  ;;  %3675 = vmatmul.mubr.bf16.gmra.mxu1 %v6964_v55  ;;  %v8407_v7 = vadd.f32 %v3206_v2, %v3014_v4  ;;  %v3018_v8 = vadd.f32 %v3017_v5, %v8154_v0  ;;  %3491 = vmatprep.mubr.bf16.mxu0 %v6971_v61  ;;  %v6995_v55 = vld [vmem:[%s7830_s28 + $0x550] ss:$56 sps:$4 sm:$0xff]   ;;  %v7009_v61 = vld [vmem:[%s7830_s28 + $0x5c4] ss:$56 sps:$4 sm:$0xff]  }
 0x116   : > { %3684 = vmatprep.mubr.bf16.mxu1 %v6973_v62  ;;  %v3019_v9 = vpop.f32.mrf.mxu0  ;;  %v7012_v62 = vld [vmem:[%s7830_s28 + $0x5cc] ss:$56 sps:$4 sm:$0xff]  }
 0x117   : > { %v3212_v10 = vpop.f32.mrf.mxu1  ;;  %v8410_v11 = vadd.f32 %v3210_v6, %v3018_v8  ;;  %v3020_v12 = vadd.f32 %v3019_v9, %v8391_v48 }
 0x118   : > { %v3021_v15 = vpop.f32.mrf.mxu0 }
 0x119   : > { %v3214_v16 = vpop.f32.mrf.mxu1  ;;  %v8415_v17 = vadd.f32 %v3212_v10, %v3020_v12  ;;  %v3022_v18 = vadd.f32 %v3021_v15, %v8154_v0 }
 0x11a   : > { %v3023_v21 = vpop.f32.mrf.mxu0 }
 0x11b   : > { %v3216_v22 = vpop.f32.mrf.mxu1  ;;  %v8420_v23 = vadd.f32 %v3214_v16, %v3022_v18  ;;  %v3024_v24 = vadd.f32 %v3023_v21, %v8391_v48 }
 0x11c   : > { %v3027_v25 = vpop.f32.mrf.mxu0  ;;  %3492 = vmatmul.mubr.bf16.gmra.mxu0 %v6975_v13 }
 0x11d   : > { %v3220_v26 = vpop.f32.mrf.mxu1  ;;  %3685 = vmatmul.mubr.bf16.gmra.mxu1 %v6976_v14  ;;  %v8423_v27 = vadd.f32 %v3216_v22, %v3024_v24  ;;  %v3028_v28 = vadd.f32 %v3027_v25, %v8154_v0  ;;  %3501 = vmatprep.mubr.bf16.mxu0 %v6983_v19  ;;  %v7007_v19 = vld [vmem:[%s7830_s28 + $0x5c0] ss:$56 sps:$4 sm:$0xff]   ;;  %v7024_v24 = vld [vmem:[%s7830_s28 + $0x634] ss:$56 sps:$4 sm:$0xff]  }
 0x11e   : > { %3694 = vmatprep.mubr.bf16.mxu1 %v6985_v20  ;;  %v3029_v29 = vpop.f32.mrf.mxu0  ;;  %v7010_v20 = vld [vmem:[%s7830_s28 + $0x5c8] ss:$56 sps:$4 sm:$0xff]   ;;  %v7027_v25 = vld [vmem:[%s7830_s28 + $0x63c] ss:$56 sps:$4 sm:$0xff]  }
 0x11f   : > { %v3222_v30 = vpop.f32.mrf.mxu1  ;;  %v8426_v31 = vadd.f32 %v3220_v26, %v3028_v28  ;;  %v3030_v32 = vadd.f32 %v3029_v29, %v8391_v48 }
 0x120   : > { %v3031_v35 = vpop.f32.mrf.mxu0 }
 0x121   : > { %v3224_v36 = vpop.f32.mrf.mxu1  ;;  %v8431_v37 = vadd.f32 %v3222_v30, %v3030_v32  ;;  %v3032_v38 = vadd.f32 %v3031_v35, %v8154_v0 }
 0x122   : > { %v3033_v41 = vpop.f32.mrf.mxu0 }
 0x123   : > { %v3226_v42 = vpop.f32.mrf.mxu1  ;;  %v8436_v43 = vadd.f32 %v3224_v36, %v3032_v38  ;;  %v3034_v44 = vadd.f32 %v3033_v41, %v8391_v48 }
 0x124   : > { %v3037_v45 = vpop.f32.mrf.mxu0  ;;  %3502 = vmatmul.mubr.bf16.gmra.mxu0 %v6987_v33 }
 0x125   : > { %v3230_v46 = vpop.f32.mrf.mxu1  ;;  %3695 = vmatmul.mubr.bf16.gmra.mxu1 %v6988_v34  ;;  %v8439_v47 = vadd.f32 %v3226_v42, %v3034_v44  ;;  %v3038_v57 = vadd.f32 %v3037_v45, %v8154_v0  ;;  %3511 = vmatprep.mubr.bf16.mxu0 %v6997_v39  ;;  %v7022_v44 = vld [vmem:[%s7830_s28 + $0x630] ss:$56 sps:$4 sm:$0xff]  }
 0x126   : > { %3704 = vmatprep.mubr.bf16.mxu1 %v7000_v40  ;;  %v3039_v49 = vpop.f32.mrf.mxu0  ;;  %v7025_v45 = vld [vmem:[%s7830_s28 + $0x638] ss:$56 sps:$4 sm:$0xff]  }
 0x127   : > { %v3232_v50 = vpop.f32.mrf.mxu1  ;;  %v8442_v51 = vadd.f32 %v3230_v46, %v3038_v57  ;;  %v3040_v52 = vadd.f32 %v3039_v49, %v8391_v48  ;;  %v7039_v49 = vld [vmem:[%s7830_s28 + $0x6a4] ss:$56 sps:$4 sm:$0xff]  }
 0x128   : > { %v3041_v63 = vpop.f32.mrf.mxu0 }
 0x129   : > { %v3234_v54 = vpop.f32.mrf.mxu1  ;;  %v8447_v58 = vadd.f32 %v3232_v50, %v3040_v52  ;;  %v3042_v60 = vadd.f32 %v3041_v63, %v8154_v0  ;;  %v7042_v50 = vld [vmem:[%s7830_s28 + $0x6ac] ss:$56 sps:$4 sm:$0xff]  }
 0x12a   : > { %v3043_v1 = vpop.f32.mrf.mxu0 }
 0x12b   : > { %v3236_v2 = vpop.f32.mrf.mxu1  ;;  %v8452_v4 = vadd.f32 %v3234_v54, %v3042_v60  ;;  %v3044_v5 = vadd.f32 %v3043_v1, %v8391_v48 }
 0x12c   : > { %v3047_v6 = vpop.f32.mrf.mxu0  ;;  %3512 = vmatmul.mubr.bf16.gmra.mxu0 %v6995_v55 }
 0x12d   : > { %v3240_v8 = vpop.f32.mrf.mxu1  ;;  %3705 = vmatmul.mubr.bf16.gmra.mxu1 %v6998_v56  ;;  %v8455_v9 = vadd.f32 %v3236_v2, %v3044_v5  ;;  %v3048_v10 = vadd.f32 %v3047_v6, %v8154_v0  ;;  %3521 = vmatprep.mubr.bf16.mxu0 %v7009_v61 }
 0x12e   : > { %3714 = vmatprep.mubr.bf16.mxu1 %v7012_v62  ;;  %v3049_v12 = vpop.f32.mrf.mxu0 }
 0x12f   : > { %v3242_v13 = vpop.f32.mrf.mxu1  ;;  %v8458_v14 = vadd.f32 %v3240_v8, %v3048_v10  ;;  %v3050_v15 = vadd.f32 %v3049_v12, %v8391_v48  ;;  %v7037_v12 = vld [vmem:[%s7830_s28 + $0x6a0] ss:$56 sps:$4 sm:$0xff]  }
 0x130   : > { %v3051_v16 = vpop.f32.mrf.mxu0 }
 0x131   : > { %v3244_v18 = vpop.f32.mrf.mxu1  ;;  %v8463_v21 = vadd.f32 %v3242_v13, %v3050_v15  ;;  %v3052_v22 = vadd.f32 %v3051_v16, %v8154_v0  ;;  %v7040_v13 = vld [vmem:[%s7830_s28 + $0x6a8] ss:$56 sps:$4 sm:$0xff]  }
 0x132   : > { %v3053_v26 = vpop.f32.mrf.mxu0 }
 0x133   : > { %v3246_v28 = vpop.f32.mrf.mxu1  ;;  %v8468_v29 = vadd.f32 %v3244_v18, %v3052_v22  ;;  %v3054_v30 = vadd.f32 %v3053_v26, %v8391_v48  ;;  %v7054_v18 = vld [vmem:[%s7830_s28 + $0x24] ss:$56 sps:$4 sm:$0xff]  }
 0x134   : > { %v3057_v32 = vpop.f32.mrf.mxu0  ;;  %3522 = vmatmul.mubr.bf16.gmra.mxu0 %v7007_v19  ;;  %v7057_v19 = vld [vmem:[%s7830_s28 + $0x2c] ss:$56 sps:$4 sm:$0xff]  }
 0x135   : > { %v3250_v33 = vpop.f32.mrf.mxu1  ;;  %3715 = vmatmul.mubr.bf16.gmra.mxu1 %v7010_v20  ;;  %v8471_v34 = vadd.f32 %v3246_v28, %v3054_v30  ;;  %v3058_v35 = vadd.f32 %v3057_v32, %v8154_v0  ;;  %3531 = vmatprep.mubr.bf16.mxu0 %v7024_v24 }
 0x136   : > { %3724 = vmatprep.mubr.bf16.mxu1 %v7027_v25  ;;  %v3059_v36 = vpop.f32.mrf.mxu0 }
 0x137   : > { %v3252_v38 = vpop.f32.mrf.mxu1  ;;  %v8474_v39 = vadd.f32 %v3250_v33, %v3058_v35  ;;  %v3060_v40 = vadd.f32 %v3059_v36, %v8391_v48 }
 0x138   : > { %v3061_v41 = vpop.f32.mrf.mxu0 }
 0x139   : > { %v3254_v42 = vpop.f32.mrf.mxu1  ;;  %v8479_v46 = vadd.f32 %v3252_v38, %v3060_v40  ;;  %v3062_v57 = vadd.f32 %v3061_v41, %v8154_v0 }
 0x13a   : > { %v3063_v52 = vpop.f32.mrf.mxu0 }
 0x13b   : > { %v3256_v63 = vpop.f32.mrf.mxu1  ;;  %v8484_v54 = vadd.f32 %v3254_v42, %v3062_v57  ;;  %v3064_v55 = vadd.f32 %v3063_v52, %v8391_v48  ;;  %v7052_v42 = vld [vmem:[%s7830_s28 + $0x20] ss:$56 sps:$4 sm:$0xff]  }
 0x13c   : > { %v3067_v56 = vpop.f32.mrf.mxu0  ;;  %3532 = vmatmul.mubr.bf16.gmra.mxu0 %v7022_v44  ;;  %v7055_v44 = vld [vmem:[%s7830_s28 + $0x28] ss:$56 sps:$4 sm:$0xff]  }
 0x13d   : > { %v3260_v60 = vpop.f32.mrf.mxu1  ;;  %3725 = vmatmul.mubr.bf16.gmra.mxu1 %v7025_v45  ;;  %v8487_v61 = vadd.f32 %v3256_v63, %v3064_v55  ;;  %v3068_v62 = vadd.f32 %v3067_v56, %v8154_v0  ;;  %3541 = vmatprep.mubr.bf16.mxu0 %v7039_v49  ;;  %v7058_v49 = vld [vmem:[%s10238_s2 + $0x670] ss:$8 sps:$4 sm:$0xff]   ;;  %v7066_v55 = vld [vmem:[%s7830_s28 + $0x9c] ss:$56 sps:$4 sm:$0xff]   ;;  %v7069_v56 = vld [vmem:[%s10238_s2 + $0x664] ss:$8 sps:$4 sm:$0xff]  }
 0x13e   : > { %3734 = vmatprep.mubr.bf16.mxu1 %v7042_v50  ;;  %v3069_v1 = vpop.f32.mrf.mxu0  ;;  %v7063_v50 = vld [vmem:[%s7830_s28 + $0x94] ss:$56 sps:$4 sm:$0xff]  }
 0x13f   : > { %v3262_v2 = vpop.f32.mrf.mxu1  ;;  %v8490_v5 = vadd.f32 %v3260_v60, %v3068_v62  ;;  %v3070_v6 = vadd.f32 %v3069_v1, %v8391_v48 }
 0x140   : > { %v3071_v8 = vpop.f32.mrf.mxu0 }
 0x141   : > { %v3264_v10 = vpop.f32.mrf.mxu1  ;;  %v8495_v15 = vadd.f32 %v3262_v2, %v3070_v6  ;;  %v3072_v16 = vadd.f32 %v3071_v8, %v8154_v0 }
 0x142   : > { %v3073_v20 = vpop.f32.mrf.mxu0 }
 0x143   : > { %v3266_v22 = vpop.f32.mrf.mxu1  ;;  %v8500_v24 = vadd.f32 %v3264_v10, %v3072_v16  ;;  %v3074_v25 = vadd.f32 %v3073_v20, %v8391_v48  ;;  %v7067_v10 = vld [vmem:[%s10238_s2 + $0x660] ss:$8 sps:$4 sm:$0xff]   ;;  %v7078_v16 = vld [vmem:[%s10238_s2 + $0x654] ss:$8 sps:$4 sm:$0xff]  }
 0x144   : > { %v3077_v26 = vpop.f32.mrf.mxu0  ;;  %3542 = vmatmul.mubr.bf16.gmra.mxu0 %v7037_v12 }
 0x145   : > { %v3270_v28 = vpop.f32.mrf.mxu1  ;;  %3735 = vmatmul.mubr.bf16.gmra.mxu1 %v7040_v13  ;;  %v8503_v30 = vadd.f32 %v3266_v22, %v3074_v25  ;;  %v3078_v32 = vadd.f32 %v3077_v26, %v8154_v0  ;;  %3777 = vmatprep.mubr.bf16.mxu0 %v7054_v18  ;;  %v7061_v25 = vld [vmem:[%s7830_s28 + $0x90] ss:$56 sps:$4 sm:$0xff]  }
 0x146   : > { %3970 = vmatprep.mubr.bf16.mxu1 %v7057_v19  ;;  %v3079_v33 = vpop.f32.mrf.mxu0  ;;  %v7064_v26 = vld [vmem:[%s7830_s28 + $0x98] ss:$56 sps:$4 sm:$0xff]  }
 0x147   : > { %v3272_v35 = vpop.f32.mrf.mxu1  ;;  %v8506_v36 = vadd.f32 %v3270_v28, %v3078_v32  ;;  %v3080_v38 = vadd.f32 %v3079_v33, %v8391_v48  ;;  %v7072_v33 = vld [vmem:[%s7830_s28 + $0x104] ss:$56 sps:$4 sm:$0xff]  }
 0x148   : > { %v3081_v40 = vpop.f32.mrf.mxu0 }
 0x149   : > { %v3274_v41 = vpop.f32.mrf.mxu1  ;;  %v8511_v45 = vadd.f32 %v3272_v35, %v3080_v38  ;;  %v3082_v57 = vadd.f32 %v3081_v40, %v8154_v0  ;;  %v7075_v35 = vld [vmem:[%s7830_s28 + $0x10c] ss:$56 sps:$4 sm:$0xff]  }
 0x14a   : > { %v3083_v52 = vpop.f32.mrf.mxu0 }
 0x14b   : > { %v3276_v63 = vpop.f32.mrf.mxu1  ;;  %v8522_v60 = vadd.f32 %v3274_v41, %v3082_v57  ;;  %v3084_v62 = vadd.f32 %v3083_v52, %v8391_v48  ;;  %v7076_v41 = vld [vmem:[%s10238_s2 + $0x650] ss:$8 sps:$4 sm:$0xff]   ;;  %v7087_v57 = vld [vmem:[%s10238_s2 + $0x644] ss:$8 sps:$4 sm:$0xff]  }
 0x14c   : > { %v3087_v1 = vpop.f32.mrf.mxu0  ;;  %3778 = vmatmul.mubr.bf16.vlgmr.msra.gmra.mxu0 %v7052_v42 }
 0x14d   : > { %v3280_v2 = vpop.f32.mrf.mxu1  ;;  %3971 = vmatmul.mubr.bf16.vlgmr.msra.gmra.mxu1 %v7055_v44  ;;  %v8525_v6 = vadd.f32 %v3276_v63, %v3084_v62  ;;  %v3088_v8 = vadd.f32 %v3087_v1, %v8154_v0  ;;  %4132 = vmatpush1.bf16.msra.mxu0 %v7058_v49  ;;  %v7085_v62 = vld [vmem:[%s10238_s2 + $0x640] ss:$8 sps:$4 sm:$0xff]  }
 0x14e   : > { %3787 = vmatprep.mubr.bf16.mxu0 %v7063_v50  ;;  %v3089_v12 = vpop.f32.mrf.mxu0  ;;  %3980 = vmatprep.mubr.bf16.mxu1 %v7066_v55 }
 0x14f   : > { %v3282_v13 = vpop.f32.mrf.mxu1  ;;  %4133 = vmatprep.subr.bf16.mxu0 %v7069_v56  ;;  %v8534_v18 = vadd.f32 %v3280_v2, %v3088_v8  ;;  %v3090_v19 = vadd.f32 %v3089_v12, %v8391_v48  ;;  %6545 = vmatpush1.bf16.msra.mxu1 %v7058_v49  ;;  %v7096_v8 = vld [vmem:[%s10238_s2 + $0x634] ss:$8 sps:$4 sm:$0xff]  }
 0x150   : > { %v3091_v20 = vpop.f32.mrf.mxu0  ;;  %6530 = vmatprep.subr.bf16.mxu1 %v7069_v56 }
 0x151   : > { %v3284_v22 = vpop.f32.mrf.mxu1  ;;  %v8539_v28 = vadd.f32 %v3282_v13, %v3090_v19  ;;  %v3092_v32 = vadd.f32 %v3091_v20, %v8154_v0  ;;  %4134 = vmatpush1.bf16.msra.mxu0 %v7067_v10  ;;  %v7070_v13 = vld [vmem:[%s7830_s28 + $0x100] ss:$56 sps:$4 sm:$0xff]  }
 0x152   : > { %v3093_v38 = vpop.f32.mrf.mxu0  ;;  %4135 = vmatprep.subr.bf16.mxu0 %v7078_v16  ;;  %v7073_v19 = vld [vmem:[%s7830_s28 + $0x108] ss:$56 sps:$4 sm:$0xff]  }
 0x153   : > { %v3286_v40 = vpop.f32.mrf.mxu1  ;;  %v8547_v42 = vadd.f32 %v3284_v22, %v3092_v32  ;;  %v3094_v44 = vadd.f32 %v3093_v38, %v8391_v48  ;;  %6546 = vmatpush1.bf16.msra.mxu1 %v7067_v10 }
 0x154   : > { %v3097_v49 = vpop.f32.mrf.mxu0  ;;  %3788 = vmatmul.mubr.bf16.gmra.mxu0 %v7061_v25  ;;  %6531 = vmatprep.subr.bf16.mxu1 %v7078_v16  ;;  %v7081_v16 = vld [vmem:[%s7830_s28 + $0x174] ss:$56 sps:$4 sm:$0xff]  }
 0x155   : > { %v3290_v50 = vpop.f32.mrf.mxu1  ;;  %3981 = vmatmul.mubr.bf16.gmra.mxu1 %v7064_v26  ;;  %v8553_v52 = vadd.f32 %v3286_v40, %v3094_v44  ;;  %v3098_v63 = vadd.f32 %v3097_v49, %v8154_v0  ;;  %3797 = vmatprep.mubr.bf16.mxu0 %v7072_v33  ;;  %v7084_v25 = vld [vmem:[%s7830_s28 + $0x17c] ss:$56 sps:$4 sm:$0xff]   ;;  %v7094_v33 = vld [vmem:[%s10238_s2 + $0x630] ss:$8 sps:$4 sm:$0xff]   ;;  %v7105_v40 = vld [vmem:[%s10238_s2 + $0x624] ss:$8 sps:$4 sm:$0xff]  }
 0x156   : > { %3990 = vmatprep.mubr.bf16.mxu1 %v7075_v35  ;;  %v3099_v55 = vpop.f32.mrf.mxu0  ;;  %4136 = vmatpush1.bf16.msra.mxu0 %v7076_v41 }
 0x157   : > { %v3292_v56 = vpop.f32.mrf.mxu1  ;;  %v8559_v1 = vadd.f32 %v3290_v50, %v3098_v63  ;;  %v3100_v2 = vadd.f32 %v3099_v55, %v8391_v48  ;;  %4137 = vmatprep.subr.bf16.mxu0 %v7087_v57  ;;  %6547 = vmatpush1.bf16.msra.mxu1 %v7076_v41  ;;  %v7103_v55 = vld [vmem:[%s10238_s2 + $0x620] ss:$8 sps:$4 sm:$0xff]  }
 0x158   : > { %v3101_v10 = vpop.f32.mrf.mxu0  ;;  %6532 = vmatprep.subr.bf16.mxu1 %v7087_v57 }
 0x159   : > { %v3294_v12 = vpop.f32.mrf.mxu1  ;;  %v8567_v20 = vadd.f32 %v3292_v56, %v3100_v2  ;;  %v3102_v22 = vadd.f32 %v3101_v10, %v8154_v0  ;;  %v7114_v2 = vld [vmem:[%s10238_s2 + $0x614] ss:$8 sps:$4 sm:$0xff]  }
 0x15a   : > { %v3103_v26 = vpop.f32.mrf.mxu0  ;;  %4138 = vmatpush1.bf16.msra.mxu0 %v7085_v62 }
 0x15b   : > { %v3296_v32 = vpop.f32.mrf.mxu1  ;;  %v8575_v35 = vadd.f32 %v3294_v12, %v3102_v22  ;;  %v3104_v38 = vadd.f32 %v3103_v26, %v8391_v48  ;;  %4139 = vmatprep.subr.bf16.mxu0 %v7096_v8  ;;  %6548 = vmatpush1.bf16.msra.mxu1 %v7085_v62 }
 0x15c   : > { %v3107_v41 = vpop.f32.mrf.mxu0  ;;  %3798 = vmatmul.mubr.bf16.gmra.mxu0 %v7070_v13  ;;  %6533 = vmatprep.subr.bf16.mxu1 %v7096_v8  ;;  %v7079_v13 = vld [vmem:[%s7830_s28 + $0x170] ss:$56 sps:$4 sm:$0xff]   ;;  %v7090_v8 = vld [vmem:[%s7830_s28 + $0x1e4] ss:$56 sps:$4 sm:$0xff]  }
 0x15d   : > { %v3300_v44 = vpop.f32.mrf.mxu1  ;;  %3991 = vmatmul.mubr.bf16.gmra.mxu1 %v7073_v19  ;;  %v8581_v57 = vadd.f32 %v3296_v32, %v3104_v38  ;;  %v3108_v49 = vadd.f32 %v3107_v41, %v8154_v0  ;;  %3807 = vmatprep.mubr.bf16.mxu0 %v7081_v16  ;;  %v7082_v19 = vld [vmem:[%s7830_s28 + $0x178] ss:$56 sps:$4 sm:$0xff]  }
 0x15e   : > { %4000 = vmatprep.mubr.bf16.mxu1 %v7084_v25  ;;  %v3109_v50 = vpop.f32.mrf.mxu0  ;;  %4140 = vmatpush1.bf16.msra.mxu0 %v7094_v33  ;;  %v7093_v25 = vld [vmem:[%s7830_s28 + $0x1ec] ss:$56 sps:$4 sm:$0xff]   ;;  %v7112_v38 = vld [vmem:[%s10238_s2 + $0x610] ss:$8 sps:$4 sm:$0xff]  }
 0x15f   : > { %v3302_v63 = vpop.f32.mrf.mxu1  ;;  %v8587_v56 = vadd.f32 %v3300_v44, %v3108_v49  ;;  %v3110_v62 = vadd.f32 %v3109_v50, %v8391_v48  ;;  %4141 = vmatprep.subr.bf16.mxu0 %v7105_v40  ;;  %6549 = vmatpush1.bf16.msra.mxu1 %v7094_v33 }
 0x160   : > { %v3111_v10 = vpop.f32.mrf.mxu0  ;;  %6534 = vmatprep.subr.bf16.mxu1 %v7105_v40  ;;  %v7123_v40 = vld [vmem:[%s10238_s2 + $0x604] ss:$8 sps:$4 sm:$0xff]  }
 0x161   : > { %v3304_v12 = vpop.f32.mrf.mxu1  ;;  %v8595_v22 = vadd.f32 %v3302_v63, %v3110_v62  ;;  %v3112_v16 = vadd.f32 %v3111_v10, %v8154_v0 }
 0x162   : > { %v3113_v26 = vpop.f32.mrf.mxu0  ;;  %4142 = vmatpush1.bf16.msra.mxu0 %v7103_v55 }
 0x163   : > { %v3306_v32 = vpop.f32.mrf.mxu1  ;;  %v8603_v41 = vadd.f32 %v3304_v12, %v3112_v16  ;;  %v3114_v33 = vadd.f32 %v3113_v26, %v8391_v48  ;;  %4143 = vmatprep.subr.bf16.mxu0 %v7114_v2  ;;  %6550 = vmatpush1.bf16.msra.mxu1 %v7103_v55  ;;  %v7121_v55 = vld [vmem:[%s10238_s2 + $0x600] ss:$8 sps:$4 sm:$0xff]  }
 0x164   : > { %v3117_v44 = vpop.f32.mrf.mxu0  ;;  %3808 = vmatmul.mubr.bf16.gmra.mxu0 %v7079_v13  ;;  %6535 = vmatprep.subr.bf16.mxu1 %v7114_v2  ;;  %v7091_v26 = vld [vmem:[%s7830_s28 + $0x1e8] ss:$56 sps:$4 sm:$0xff]   ;;  %v7099_v2 = vld [vmem:[%s7830_s28 + $0x254] ss:$56 sps:$4 sm:$0xff]  }
 0x165   : > { %v3310_v49 = vpop.f32.mrf.mxu1  ;;  %4001 = vmatmul.mubr.bf16.gmra.mxu1 %v7082_v19  ;;  %v8609_v50 = vadd.f32 %v3306_v32, %v3114_v33  ;;  %v3118_v63 = vadd.f32 %v3117_v44, %v8154_v0  ;;  %3817 = vmatprep.mubr.bf16.mxu0 %v7090_v8  ;;  %v7132_v19 = vld [vmem:[%s10238_s2 + $0x6f4] ss:$8 sps:$4 sm:$0xff]  }
 0x166   : > { %4010 = vmatprep.mubr.bf16.mxu1 %v7093_v25  ;;  %v3119_v62 = vpop.f32.mrf.mxu0  ;;  %4144 = vmatpush1.bf16.msra.mxu0 %v7112_v38  ;;  %v7088_v25 = vld [vmem:[%s7830_s28 + $0x1e0] ss:$56 sps:$4 sm:$0xff]   ;;  %v7102_v44 = vld [vmem:[%s7830_s28 + $0x25c] ss:$56 sps:$4 sm:$0xff]  }
 0x167   : > { %v3312_v10 = vpop.f32.mrf.mxu1  ;;  %v8615_v12 = vadd.f32 %v3310_v49, %v3118_v63  ;;  %v3120_v13 = vadd.f32 %v3119_v62, %v8391_v48  ;;  %4145 = vmatprep.subr.bf16.mxu0 %v7123_v40  ;;  %6551 = vmatpush1.bf16.msra.mxu1 %v7112_v38  ;;  %v7130_v62 = vld [vmem:[%s10238_s2 + $0x6f0] ss:$8 sps:$4 sm:$0xff]  }
 0x168   : > { %v3121_v16 = vpop.f32.mrf.mxu0  ;;  %6536 = vmatprep.subr.bf16.mxu1 %v7123_v40  ;;  %v7141_v40 = vld [vmem:[%s10238_s2 + $0x6e4] ss:$8 sps:$4 sm:$0xff]  }
 0x169   : > { %10280 = vst [vmem:[#allocation2_spill] sm:$0xff] %v8615_v12  ;;  %v3314_v8 = vpop.f32.mrf.mxu1  ;;  %v8623_v32 = vadd.f32 %v3312_v10, %v3120_v13  ;;  %v3122_v33 = vadd.f32 %v3121_v16, %v8154_v0 }
 0x16a   : > { %v3123_v49 = vpop.f32.mrf.mxu0  ;;  %4146 = vmatpush1.bf16.msra.mxu0 %v7121_v55 }
 0x16b   : > { %10281 = vst [vmem:[#allocation3_spill] sm:$0xff] %v8623_v32  ;;  %v3316_v63 = vpop.f32.mrf.mxu1  ;;  %v8631_v12 = vadd.f32 %v3314_v8, %v3122_v33  ;;  %v3124_v38 = vadd.f32 %v3123_v49, %v8391_v48  ;;  %4147 = vmatprep.subr.bf16.mxu0 %v7132_v19  ;;  %6552 = vmatpush1.bf16.msra.mxu1 %v7121_v55  ;;  %v7139_v55 = vld [vmem:[%s10238_s2 + $0x6e0] ss:$8 sps:$4 sm:$0xff]  }
 0x16c   : > { %v3127_v10 = vpop.f32.mrf.mxu0  ;;  %3818 = vmatmul.mubr.bf16.gmra.mxu0 %v7088_v25  ;;  %6537 = vmatprep.subr.bf16.mxu1 %v7132_v19  ;;  %v7108_v19 = vld [vmem:[%s7830_s28 + $0x2c4] ss:$56 sps:$4 sm:$0xff]  }
 0x16d   : > { %10282 = vst [vmem:[#allocation4_spill] sm:$0xff] %v8631_v12  ;;  %v3320_v13 = vpop.f32.mrf.mxu1  ;;  %4011 = vmatmul.mubr.bf16.gmra.mxu1 %v7091_v26  ;;  %v8637_v16 = vadd.f32 %v3316_v63, %v3124_v38  ;;  %v3128_v32 = vadd.f32 %v3127_v10, %v8154_v0  ;;  %3827 = vmatprep.mubr.bf16.mxu0 %v7099_v2  ;;  %v7150_v2 = vld [vmem:[%s10238_s2 + $0x6d4] ss:$8 sps:$4 sm:$0xff]   ;;  %v7097_v63 = vld [vmem:[%s7830_s28 + $0x250] ss:$56 sps:$4 sm:$0xff]  }
 0x16e   : > { %4020 = vmatprep.mubr.bf16.mxu1 %v7102_v44  ;;  %v3129_v8 = vpop.f32.mrf.mxu0  ;;  %4148 = vmatpush2.bf16.msra.mxu0 %v7130_v62  ;;  %v7100_v38 = vld [vmem:[%s7830_s28 + $0x258] ss:$56 sps:$4 sm:$0xff]  }
 0x16f   : > { %10283 = vst [vmem:[#allocation5_spill] sm:$0xff] %v8637_v16  ;;  %v3322_v33 = vpop.f32.mrf.mxu1  ;;  %v8643_v25 = vadd.f32 %v3320_v13, %v3128_v32  ;;  %v3130_v26 = vadd.f32 %v3129_v8, %v8391_v48  ;;  %4149 = vmatprep.subr.bf16.mxu0 %v7141_v40  ;;  %6553 = vmatpush2.bf16.msra.mxu1 %v7130_v62  ;;  %v7111_v32 = vld [vmem:[%s7830_s28 + $0x2cc] ss:$56 sps:$4 sm:$0xff]   ;;  %v7148_v8 = vld [vmem:[%s10238_s2 + $0x6d0] ss:$8 sps:$4 sm:$0xff]  }
 0x170   : > { %v3131_v44 = vpop.f32.mrf.mxu0  ;;  %6538 = vmatprep.subr.bf16.mxu1 %v7141_v40  ;;  %v7159_v40 = vld [vmem:[%s10238_s2 + $0x6c4] ss:$8 sps:$4 sm:$0xff]  }
 0x171   : > { %10284 = vst [vmem:[#allocation6_spill] sm:$0xff] %v8643_v25  ;;  %v3324_v49 = vpop.f32.mrf.mxu1  ;;  %v8651_v10 = vadd.f32 %v3322_v33, %v3130_v26  ;;  %v3132_v16 = vadd.f32 %v3131_v44, %v8154_v0 }
 0x172   : > { %v3133_v13 = vpop.f32.mrf.mxu0  ;;  %4150 = vmatpush2.bf16.msra.mxu0 %v7139_v55 }
 0x173   : > { %10285 = vst [vmem:[#allocation7_spill] sm:$0xff] %v8651_v10  ;;  %v3326_v25 = vpop.f32.mrf.mxu1  ;;  %v8659_v12 = vadd.f32 %v3324_v49, %v3132_v16  ;;  %v3134_v62 = vadd.f32 %v3133_v13, %v8391_v48  ;;  %4151 = vmatprep.subr.bf16.mxu0 %v7150_v2  ;;  %6554 = vmatpush2.bf16.msra.mxu1 %v7139_v55  ;;  %v7157_v55 = vld [vmem:[%s10238_s2 + $0x6c0] ss:$8 sps:$4 sm:$0xff]  }
 0x174   : > { %v3137_v33 = vpop.f32.mrf.mxu0  ;;  %3828 = vmatmul.mubr.bf16.gmra.mxu0 %v7097_v63  ;;  %6539 = vmatprep.subr.bf16.mxu1 %v7150_v2  ;;  %v7106_v13 = vld [vmem:[%s7830_s28 + $0x2c0] ss:$56 sps:$4 sm:$0xff]   ;;  %v7117_v2 = vld [vmem:[%s7830_s28 + $0x334] ss:$56 sps:$4 sm:$0xff]  }
 0x175   : > { %10286 = vst [vmem:[#allocation8_spill] sm:$0xff] %v8659_v12  ;;  %v3330_v26 = vpop.f32.mrf.mxu1  ;;  %4021 = vmatmul.mubr.bf16.gmra.mxu1 %v7100_v38  ;;  %v8665_v44 = vadd.f32 %v3326_v25, %v3134_v62  ;;  %v3138_v10 = vadd.f32 %v3137_v33, %v8154_v0  ;;  %3837 = vmatprep.mubr.bf16.mxu0 %v7108_v19  ;;  %v7168_v38 = vld [vmem:[%s10238_s2 + $0x6b4] ss:$8 sps:$4 sm:$0xff]   ;;  %v7109_v62 = vld [vmem:[%s7830_s28 + $0x2c8] ss:$56 sps:$4 sm:$0xff]  }
 0x176   : > { %4030 = vmatprep.mubr.bf16.mxu1 %v7111_v32  ;;  %v3139_v16 = vpop.f32.mrf.mxu0  ;;  %4152 = vmatpush2.bf16.msra.mxu0 %v7148_v8 }
 0x177   : > { %10287 = vst [vmem:[#allocation9_spill] sm:$0xff] %v8665_v44  ;;  %v3332_v49 = vpop.f32.mrf.mxu1  ;;  %v8671_v63 = vadd.f32 %v3330_v26, %v3138_v10  ;;  %v3140_v25 = vadd.f32 %v3139_v16, %v8391_v48  ;;  %4153 = vmatprep.subr.bf16.mxu0 %v7159_v40  ;;  %6555 = vmatpush2.bf16.msra.mxu1 %v7148_v8  ;;  %v7120_v10 = vld [vmem:[%s7830_s28 + $0x33c] ss:$56 sps:$4 sm:$0xff]   ;;  %v7166_v16 = vld [vmem:[%s10238_s2 + $0x6b0] ss:$8 sps:$4 sm:$0xff]  }
 0x178   : > { %v3141_v19 = vpop.f32.mrf.mxu0  ;;  %6540 = vmatprep.subr.bf16.mxu1 %v7159_v40  ;;  %v7177_v40 = vld [vmem:[%s10238_s2 + $0x6a4] ss:$8 sps:$4 sm:$0xff]  }
 0x179   : > { %10288 = vst [vmem:[#allocation10_spill] sm:$0xff] %v8671_v63  ;;  %v3334_v32 = vpop.f32.mrf.mxu1  ;;  %v8679_v33 = vadd.f32 %v3332_v49, %v3140_v25  ;;  %v3142_v44 = vadd.f32 %v3141_v19, %v8154_v0 }
 0x17a   : > { %v3143_v26 = vpop.f32.mrf.mxu0  ;;  %4154 = vmatpush2.bf16.msra.mxu0 %v7157_v55 }
 0x17b   : > { %10289 = vst [vmem:[#allocation11_spill] sm:$0xff] %v8679_v33  ;;  %v3336_v63 = vpop.f32.mrf.mxu1  ;;  %v8687_v12 = vadd.f32 %v3334_v32, %v3142_v44  ;;  %v3144_v8 = vadd.f32 %v3143_v26, %v8391_v48  ;;  %4155 = vmatprep.subr.bf16.mxu0 %v7168_v38  ;;  %6556 = vmatpush2.bf16.msra.mxu1 %v7157_v55  ;;  %v7175_v55 = vld [vmem:[%s10238_s2 + $0x6a0] ss:$8 sps:$4 sm:$0xff]  }
 0x17c   : > { %v3147_v49 = vpop.f32.mrf.mxu0  ;;  %3838 = vmatmul.mubr.bf16.gmra.mxu0 %v7106_v13  ;;  %6541 = vmatprep.subr.bf16.mxu1 %v7168_v38  ;;  %v7115_v26 = vld [vmem:[%s7830_s28 + $0x330] ss:$56 sps:$4 sm:$0xff]   ;;  %v7126_v38 = vld [vmem:[%s7830_s28 + $0x3a4] ss:$56 sps:$4 sm:$0xff]  }
 0x17d   : > { %10290 = vst [vmem:[#allocation12_spill] sm:$0xff] %v8687_v12  ;;  %v3340_v25 = vpop.f32.mrf.mxu1  ;;  %4031 = vmatmul.mubr.bf16.gmra.mxu1 %v7109_v62  ;;  %v8693_v19 = vadd.f32 %v3336_v63, %v3144_v8  ;;  %v3148_v33 = vadd.f32 %v3147_v49, %v8154_v0  ;;  %3847 = vmatprep.mubr.bf16.mxu0 %v7117_v2  ;;  %v7186_v62 = vld [vmem:[%s10238_s2 + $0x694] ss:$8 sps:$4 sm:$0xff]   ;;  %v7118_v8 = vld [vmem:[%s7830_s28 + $0x338] ss:$56 sps:$4 sm:$0xff]  }
 0x17e   : > { %4040 = vmatprep.mubr.bf16.mxu1 %v7120_v10  ;;  %v3149_v44 = vpop.f32.mrf.mxu0  ;;  %4156 = vmatpush2.bf16.msra.mxu0 %v7166_v16 }
 0x17f   : > { %10291 = vst [vmem:[#allocation13_spill] sm:$0xff] %v8693_v19  ;;  %v3342_v32 = vpop.f32.mrf.mxu1  ;;  %v8699_v13 = vadd.f32 %v3340_v25, %v3148_v33  ;;  %v3150_v63 = vadd.f32 %v3149_v44, %v8391_v48  ;;  %4157 = vmatprep.subr.bf16.mxu0 %v7177_v40  ;;  %6557 = vmatpush2.bf16.msra.mxu1 %v7166_v16  ;;  %v7129_v33 = vld [vmem:[%s7830_s28 + $0x3ac] ss:$56 sps:$4 sm:$0xff]   ;;  %v7184_v44 = vld [vmem:[%s10238_s2 + $0x690] ss:$8 sps:$4 sm:$0xff]  }
 0x180   : > { %v3151_v2 = vpop.f32.mrf.mxu0  ;;  %6542 = vmatprep.subr.bf16.mxu1 %v7177_v40  ;;  %v7195_v40 = vld [vmem:[%s10238_s2 + $0x684] ss:$8 sps:$4 sm:$0xff]  }
 0x181   : > { %10292 = vst [vmem:[#allocation14_spill] sm:$0xff] %v8699_v13  ;;  %v3344_v10 = vpop.f32.mrf.mxu1  ;;  %v8707_v49 = vadd.f32 %v3342_v32, %v3150_v63  ;;  %v3152_v19 = vadd.f32 %v3151_v2, %v8154_v0 }
 0x182   : > { %v3153_v25 = vpop.f32.mrf.mxu0  ;;  %4158 = vmatpush2.bf16.msra.mxu0 %v7175_v55 }
 0x183   : > { %10293 = vst [vmem:[#allocation15_spill] sm:$0xff] %v8707_v49  ;;  %v3346_v13 = vpop.f32.mrf.mxu1  ;;  %v8715_v12 = vadd.f32 %v3344_v10, %v3152_v19  ;;  %v3154_v16 = vadd.f32 %v3153_v25, %v8391_v48  ;;  %4159 = vmatprep.subr.bf16.mxu0 %v7186_v62  ;;  %6558 = vmatpush2.bf16.msra.mxu1 %v7175_v55  ;;  %v7193_v55 = vld [vmem:[%s10238_s2 + $0x680] ss:$8 sps:$4 sm:$0xff]  }
 0x184   : > { %v3157_v32 = vpop.f32.mrf.mxu0  ;;  %3848 = vmatmul.mubr.bf16.gmra.mxu0 %v7115_v26  ;;  %6543 = vmatprep.subr.bf16.mxu1 %v7186_v62  ;;  %v7127_v25 = vld [vmem:[%s7830_s28 + $0x3a8] ss:$56 sps:$4 sm:$0xff]  }
 0x185   : > { %10294 = vst [vmem:[#allocation16_spill] sm:$0xff] %v8715_v12  ;;  %v3350_v63 = vpop.f32.mrf.mxu1  ;;  %4041 = vmatmul.mubr.bf16.gmra.mxu1 %v7118_v8  ;;  %v8721_v2 = vadd.f32 %v3346_v13, %v3154_v16  ;;  %v3158_v49 = vadd.f32 %v3157_v32, %v8154_v0  ;;  %3857 = vmatprep.mubr.bf16.mxu0 %v7126_v38  ;;  %v7135_v32 = vld [vmem:[%s7830_s28 + $0x414] ss:$56 sps:$4 sm:$0xff]  }
 0x186   : > { %4050 = vmatprep.mubr.bf16.mxu1 %v7129_v33  ;;  %v3159_v19 = vpop.f32.mrf.mxu0  ;;  %4160 = vmatpush2.bf16.msra.mxu0 %v7184_v44  ;;  %v7124_v33 = vld [vmem:[%s7830_s28 + $0x3a0] ss:$56 sps:$4 sm:$0xff]  }
 0x187   : > { %10295 = vst [vmem:[#allocation17_spill] sm:$0xff] %v8721_v2  ;;  %v3352_v10 = vpop.f32.mrf.mxu1  ;;  %v8727_v26 = vadd.f32 %v3350_v63, %v3158_v49  ;;  %v3160_v13 = vadd.f32 %v3159_v19, %v8391_v48  ;;  %4161 = vmatprep.subr.bf16.mxu0 %v7195_v40  ;;  %6559 = vmatpush2.bf16.msra.mxu1 %v7184_v44  ;;  %v7138_v2 = vld [vmem:[%s7830_s28 + $0x41c] ss:$56 sps:$4 sm:$0xff]  }
 0x188   : > { %v3161_v8 = vpop.f32.mrf.mxu0  ;;  %6544 = vmatprep.subr.bf16.mxu1 %v7195_v40 }
 0x189   : > { %v3354_v38 = vpop.f32.mrf.mxu1  ;;  %v8732_v16 = vadd.f32 %v3352_v10, %v3160_v13  ;;  %v3162_v62 = vadd.f32 %v3161_v8, %v8154_v0  ;;  %v4740_v0 = vld [vmem:[%s8743_s11] sm:$0xff] }
 0x18a   : > { %v3163_v12 = vpop.f32.mrf.mxu0  ;;  %4162 = vmatpush2.bf16.msra.mxu0 %v7193_v55  ;;  %4804 = vrot.lane.b32.xlu0 %v4740_v0, %s7640_s12  ;;  %v7147_v0 = vld [vmem:[%s7830_s28 + $0x48c] ss:$56 sps:$4 sm:$0xff]  }
 0x18b   : > { %v3356_v49 = vpop.f32.mrf.mxu1  ;;  %v8745_v44 = vadd.f32 %v3354_v38, %v3162_v62  ;;  %v3164_v40 = vadd.f32 %v3163_v12, %v8391_v48  ;;  %6560 = vmatpush2.bf16.msra.mxu1 %v7193_v55  ;;  %v4741_v38 = vld [vmem:[%s8743_s11 + $0x8] sm:$0xff] }
 0x18c   : > { %v3393_v63 = vpop.f32.mrf.mxu0  ;;  %3858 = vmatmul.mubr.bf16.gmra.mxu0 %v7124_v33  ;;  %v4742_v33 = vld [vmem:[%s8743_s11 + $0x10] sm:$0xff]  ;;  %4806 = vrot.lane.b32.xlu1 %v4741_v38, %s7640_s12 }
 0x18d   : > { %v3586_v19 = vpop.f32.mrf.mxu1  ;;  %4051 = vmatmul.mubr.bf16.gmra.mxu1 %v7127_v25  ;;  %v8749_v10 = vadd.f32 %v3356_v49, %v3164_v40  ;;  %v3394_v13 = vadd.f32 %v3393_v63, %v8394_v53  ;;  %3867 = vmatprep.mubr.bf16.mxu0 %v7135_v32  ;;  %v7133_v53 = vld [vmem:[%s7830_s28 + $0x410] ss:$56 sps:$4 sm:$0xff]   ;;  %v7144_v40 = vld [vmem:[%s7830_s28 + $0x484] ss:$56 sps:$4 sm:$0xff]  }
 0x18e   : > { %4060 = vmatprep.mubr.bf16.mxu1 %v7138_v2  ;;  %v3395_v8 = vpop.f32.mrf.mxu0  ;;  %v7136_v32 = vld [vmem:[%s7830_s28 + $0x418] ss:$56 sps:$4 sm:$0xff]   ;;  %4808 = vrot.lane.b32.xlu0 %v4742_v33, %s7640_s12 }
 0x18f   : > { %10296 = vst [vmem:[#allocation18_spill] sm:$0xff] %v8749_v10  ;;  %v3588_v48 = vpop.f32.mrf.mxu1  ;;  %v8753_v12 = vadd.f32 %v3586_v19, %v3394_v13  ;;  %v3396_v55 = vadd.f32 %v3395_v8, %v8399_v59  ;;  %v4743_v8 = vld [vmem:[%s8743_s11 + $0x18] sm:$0xff] }
 0x190   : > { %v3397_v25 = vpop.f32.mrf.mxu0  ;;  %4810 = vrot.lane.b32.xlu1 %v4743_v8, %s7640_s12 }
 0x191   : > { %10297 = vst [vmem:[#allocation19_spill] sm:$0xff] %v8753_v12  ;;  %v3590_v62 = vpop.f32.mrf.mxu1  ;;  %v8761_v2 = vadd.f32 %v3588_v48, %v3396_v55  ;;  %v3398_v49 = vadd.f32 %v3397_v25, %v8404_v3  ;;  %v4744_v12 = vld [vmem:[%s8743_s11 + $0x20] sm:$0xff] }
 0x192   : > { %v3399_v63 = vpop.f32.mrf.mxu0  ;;  %4812 = vrot.lane.b32.xlu0 %v4744_v12, %s7640_s12 }
 0x193   : > { %v3592_v19 = vpop.f32.mrf.mxu1  ;;  %v8767_v59 = vadd.f32 %v3590_v62, %v3398_v49  ;;  %v3400_v13 = vadd.f32 %v3399_v63, %v8407_v7  ;;  %v4745_v62 = vld [vmem:[%s8743_s11 + $0x28] sm:$0xff] }
 0x194   : > { %v3403_v10 = vpop.f32.mrf.mxu0  ;;  %3868 = vmatmul.mubr.bf16.gmra.mxu0 %v7133_v53  ;;  %v4746_v53 = vld [vmem:[%s8743_s11 + $0x30] sm:$0xff]  ;;  %v7145_v49 = vld [vmem:[%s7830_s28 + $0x488] ss:$56 sps:$4 sm:$0xff]   ;;  %4814 = vrot.lane.b32.xlu1 %v4745_v62, %s7640_s12 }
 0x195   : > { %v3596_v38 = vpop.f32.mrf.mxu1  ;;  %4061 = vmatmul.mubr.bf16.gmra.mxu1 %v7136_v32  ;;  %v8772_v3 = vadd.f32 %v3592_v19, %v3400_v13  ;;  %v3404_v48 = vadd.f32 %v3403_v10, %v8410_v11  ;;  %3877 = vmatprep.mubr.bf16.mxu0 %v7144_v40  ;;  %v7142_v10 = vld [vmem:[%s7830_s28 + $0x480] ss:$56 sps:$4 sm:$0xff]   ;;  %v7153_v63 = vld [vmem:[%s7830_s28 + $0x4f4] ss:$56 sps:$4 sm:$0xff]  }
 0x196   : > { %4070 = vmatprep.mubr.bf16.mxu1 %v7147_v0  ;;  %v3405_v55 = vpop.f32.mrf.mxu0  ;;  %v7156_v19 = vld [vmem:[%s7830_s28 + $0x4fc] ss:$56 sps:$4 sm:$0xff]   ;;  %4816 = vrot.lane.b32.xlu0 %v4746_v53, %s7640_s12 }
 0x197   : > { %v3598_v7 = vpop.f32.mrf.mxu1  ;;  %v8777_v33 = vadd.f32 %v3596_v38, %v3404_v48  ;;  %v3406_v25 = vadd.f32 %v3405_v55, %v8415_v17  ;;  %v4747_v38 = vld [vmem:[%s8743_s11 + $0x38] sm:$0xff]  ;;  %v4748_v48 = vld [vmem:[%s8743_s11 + $0x40] sm:$0xff] }
 0x198   : > { %v3407_v32 = vpop.f32.mrf.mxu0  ;;  %4818 = vrot.lane.b32.xlu1 %v4747_v38, %s7640_s12 }
 0x199   : > { %v3600_v11 = vpop.f32.mrf.mxu1  ;;  %v8784_v40 = vadd.f32 %v3598_v7, %v3406_v25  ;;  %v3408_v0 = vadd.f32 %v3407_v32, %v8420_v23 }
 0x19a   : > { %v3409_v13 = vpop.f32.mrf.mxu0  ;;  %4820 = vrot.lane.b32.xlu0 %v4748_v48, %s7640_s12 }
 0x19b   : > { %v3602_v12 = vpop.f32.mrf.mxu1  ;;  %v8791_v17 = vadd.f32 %v3600_v11, %v3408_v0  ;;  %v3410_v8 = vadd.f32 %v3409_v13, %v8423_v27  ;;  %v4749_v11 = vld [vmem:[%s8743_s11 + $0x48] sm:$0xff] }
 0x19c   : > { %v3413_v55 = vpop.f32.mrf.mxu0  ;;  %3878 = vmatmul.mubr.bf16.gmra.mxu0 %v7142_v10  ;;  %v4750_v10 = vld [vmem:[%s8743_s11 + $0x50] sm:$0xff]  ;;  %4822 = vrot.lane.b32.xlu1 %v4749_v11, %s7640_s12 }
 0x19d   : > { %v3606_v7 = vpop.f32.mrf.mxu1  ;;  %4071 = vmatmul.mubr.bf16.gmra.mxu1 %v7145_v49  ;;  %v8796_v23 = vadd.f32 %v3602_v12, %v3410_v8  ;;  %v3414_v25 = vadd.f32 %v3413_v55, %v8426_v31  ;;  %3887 = vmatprep.mubr.bf16.mxu0 %v7153_v63  ;;  %v7151_v0 = vld [vmem:[%s7830_s28 + $0x4f0] ss:$56 sps:$4 sm:$0xff]   ;;  %v7162_v12 = vld [vmem:[%s7830_s28 + $0x564] ss:$56 sps:$4 sm:$0xff]  }
 0x19e   : > { %4080 = vmatprep.mubr.bf16.mxu1 %v7156_v19  ;;  %v3415_v62 = vpop.f32.mrf.mxu0  ;;  %v7154_v63 = vld [vmem:[%s7830_s28 + $0x4f8] ss:$56 sps:$4 sm:$0xff]   ;;  %v7165_v8 = vld [vmem:[%s7830_s28 + $0x56c] ss:$56 sps:$4 sm:$0xff]   ;;  %4824 = vrot.lane.b32.xlu0 %v4750_v10, %s7640_s12 }
 0x19f   : > { %v3608_v27 = vpop.f32.mrf.mxu1  ;;  %v8801_v53 = vadd.f32 %v3606_v7, %v3414_v25  ;;  %v3416_v32 = vadd.f32 %v3415_v62, %v8431_v37  ;;  %v4751_v7 = vld [vmem:[%s8743_s11 + $0x58] sm:$0xff]  ;;  %v4752_v25 = vld [vmem:[%s8743_s11 + $0x60] sm:$0xff] }
 0x1a0   : > { %v3417_v49 = vpop.f32.mrf.mxu0  ;;  %4826 = vrot.lane.b32.xlu1 %v4751_v7, %s7640_s12 }
 0x1a1   : > { %v3610_v31 = vpop.f32.mrf.mxu1  ;;  %v8808_v19 = vadd.f32 %v3608_v27, %v3416_v32  ;;  %v3418_v13 = vadd.f32 %v3417_v49, %v8436_v43 }
 0x1a2   : > { %v3419_v38 = vpop.f32.mrf.mxu0  ;;  %4828 = vrot.lane.b32.xlu0 %v4752_v25, %s7640_s12 }
 0x1a3   : > { %v3612_v48 = vpop.f32.mrf.mxu1  ;;  %v8815_v37 = vadd.f32 %v3610_v31, %v3418_v13  ;;  %v3420_v55 = vadd.f32 %v3419_v38, %v8439_v47  ;;  %v4753_v31 = vld [vmem:[%s8743_s11 + $0x68] sm:$0xff]  ;;  %v7160_v13 = vld [vmem:[%s7830_s28 + $0x560] ss:$56 sps:$4 sm:$0xff]  }
 0x1a4   : > { %v3423_v62 = vpop.f32.mrf.mxu0  ;;  %3888 = vmatmul.mubr.bf16.gmra.mxu0 %v7151_v0  ;;  %v4754_v0 = vld [vmem:[%s8743_s11 + $0x70] sm:$0xff]  ;;  %4830 = vrot.lane.b32.xlu1 %v4753_v31, %s7640_s12 }
 0x1a5   : > { %v3616_v27 = vpop.f32.mrf.mxu1  ;;  %4081 = vmatmul.mubr.bf16.gmra.mxu1 %v7154_v63  ;;  %v8820_v43 = vadd.f32 %v3612_v48, %v3420_v55  ;;  %v3424_v32 = vadd.f32 %v3423_v62, %v8442_v51  ;;  %3897 = vmatprep.mubr.bf16.mxu0 %v7162_v12  ;;  %v7163_v12 = vld [vmem:[%s7830_s28 + $0x568] ss:$56 sps:$4 sm:$0xff]   ;;  %v7171_v48 = vld [vmem:[%s7830_s28 + $0x5d4] ss:$56 sps:$4 sm:$0xff]  }
 0x1a6   : > { %4090 = vmatprep.mubr.bf16.mxu1 %v7165_v8  ;;  %v3425_v11 = vpop.f32.mrf.mxu0  ;;  %v7174_v55 = vld [vmem:[%s7830_s28 + $0x5dc] ss:$56 sps:$4 sm:$0xff]   ;;  %4832 = vrot.lane.b32.xlu0 %v4754_v0, %s7640_s12 }
 0x1a7   : > { %v3618_v47 = vpop.f32.mrf.mxu1  ;;  %v8825_v10 = vadd.f32 %v3616_v27, %v3424_v32  ;;  %v3426_v49 = vadd.f32 %v3425_v11, %v8447_v58  ;;  %v4755_v27 = vld [vmem:[%s8743_s11 + $0x78] sm:$0xff]  ;;  %v4756_v32 = vld [vmem:[%s8743_s11 + $0x80] sm:$0xff] }
 0x1a8   : > { %v3427_v63 = vpop.f32.mrf.mxu0  ;;  %4834 = vrot.lane.b32.xlu1 %v4755_v27, %s7640_s12 }
 0x1a9   : > { %v3620_v51 = vpop.f32.mrf.mxu1  ;;  %v8832_v8 = vadd.f32 %v3618_v47, %v3426_v49  ;;  %v3428_v38 = vadd.f32 %v3427_v63, %v8452_v4 }
 0x1aa   : > { %v3429_v7 = vpop.f32.mrf.mxu0  ;;  %4836 = vrot.lane.b32.xlu0 %v4756_v32, %s7640_s12 }
 0x1ab   : > { %v3622_v25 = vpop.f32.mrf.mxu1  ;;  %v8839_v58 = vadd.f32 %v3620_v51, %v3428_v38  ;;  %v3430_v62 = vadd.f32 %v3429_v7, %v8455_v9  ;;  %v4757_v51 = vld [vmem:[%s8743_s11 + $0x88] sm:$0xff] }
 0x1ac   : > { %v3433_v11 = vpop.f32.mrf.mxu0  ;;  %3898 = vmatmul.mubr.bf16.gmra.mxu0 %v7160_v13  ;;  %v4758_v13 = vld [vmem:[%s8743_s11 + $0x90] sm:$0xff]  ;;  %4838 = vrot.lane.b32.xlu1 %v4757_v51, %s7640_s12 }
 0x1ad   : > { %v3626_v47 = vpop.f32.mrf.mxu1  ;;  %4091 = vmatmul.mubr.bf16.gmra.mxu1 %v7163_v12  ;;  %v8844_v4 = vadd.f32 %v3622_v25, %v3430_v62  ;;  %v3434_v49 = vadd.f32 %v3433_v11, %v8458_v14  ;;  %3907 = vmatprep.mubr.bf16.mxu0 %v7171_v48  ;;  %v7169_v38 = vld [vmem:[%s7830_s28 + $0x5d0] ss:$56 sps:$4 sm:$0xff]   ;;  %v7180_v25 = vld [vmem:[%s7830_s28 + $0x644] ss:$56 sps:$4 sm:$0xff]  }
 0x1ae   : > { %4100 = vmatprep.mubr.bf16.mxu1 %v7174_v55  ;;  %v3435_v31 = vpop.f32.mrf.mxu0  ;;  %v7172_v48 = vld [vmem:[%s7830_s28 + $0x5d8] ss:$56 sps:$4 sm:$0xff]   ;;  %v7183_v62 = vld [vmem:[%s7830_s28 + $0x64c] ss:$56 sps:$4 sm:$0xff]   ;;  %4840 = vrot.lane.b32.xlu0 %v4758_v13, %s7640_s12 }
 0x1af   : > { %v3628_v9 = vpop.f32.mrf.mxu1  ;;  %v8849_v0 = vadd.f32 %v3626_v47, %v3434_v49  ;;  %v3436_v63 = vadd.f32 %v3435_v31, %v8463_v21  ;;  %v4759_v47 = vld [vmem:[%s8743_s11 + $0x98] sm:$0xff]  ;;  %v4760_v49 = vld [vmem:[%s8743_s11 + $0xa0] sm:$0xff] }
 0x1b0   : > { %v3437_v12 = vpop.f32.mrf.mxu0  ;;  %4842 = vrot.lane.b32.xlu1 %v4759_v47, %s7640_s12 }
 0x1b1   : > { %v3630_v14 = vpop.f32.mrf.mxu1  ;;  %v8856_v55 = vadd.f32 %v3628_v9, %v3436_v63  ;;  %v3438_v7 = vadd.f32 %v3437_v12, %v8468_v29 }
 0x1b2   : > { %v3439_v27 = vpop.f32.mrf.mxu0  ;;  %4844 = vrot.lane.b32.xlu0 %v4760_v49, %s7640_s12 }
 0x1b3   : > { %v3632_v32 = vpop.f32.mrf.mxu1  ;;  %v8863_v21 = vadd.f32 %v3630_v14, %v3438_v7  ;;  %v3440_v11 = vadd.f32 %v3439_v27, %v8471_v34  ;;  %v4761_v14 = vld [vmem:[%s8743_s11 + $0xa8] sm:$0xff]  ;;  %v7178_v7 = vld [vmem:[%s7830_s28 + $0x640] ss:$56 sps:$4 sm:$0xff]  }
 0x1b4   : > { %v3443_v31 = vpop.f32.mrf.mxu0  ;;  %3908 = vmatmul.mubr.bf16.gmra.mxu0 %v7169_v38  ;;  %v4762_v38 = vld [vmem:[%s8743_s11 + $0xb0] sm:$0xff]  ;;  %4846 = vrot.lane.b32.xlu1 %v4761_v14, %s7640_s12 }
 0x1b5   : > { %v3636_v9 = vpop.f32.mrf.mxu1  ;;  %4101 = vmatmul.mubr.bf16.gmra.mxu1 %v7172_v48  ;;  %v8868_v29 = vadd.f32 %v3632_v32, %v3440_v11  ;;  %v3444_v63 = vadd.f32 %v3443_v31, %v8474_v39  ;;  %3917 = vmatprep.mubr.bf16.mxu0 %v7180_v25  ;;  %v7181_v25 = vld [vmem:[%s7830_s28 + $0x648] ss:$56 sps:$4 sm:$0xff]   ;;  %v7189_v32 = vld [vmem:[%s7830_s28 + $0x6b4] ss:$56 sps:$4 sm:$0xff]  }
 0x1b6   : > { %4110 = vmatprep.mubr.bf16.mxu1 %v7183_v62  ;;  %v3445_v51 = vpop.f32.mrf.mxu0  ;;  %v7192_v11 = vld [vmem:[%s7830_s28 + $0x6bc] ss:$56 sps:$4 sm:$0xff]   ;;  %4848 = vrot.lane.b32.xlu0 %v4762_v38, %s7640_s12 }
 0x1b7   : > { %v3638_v34 = vpop.f32.mrf.mxu1  ;;  %v8873_v13 = vadd.f32 %v3636_v9, %v3444_v63  ;;  %v3446_v12 = vadd.f32 %v3445_v51, %v8479_v46  ;;  %v4763_v9 = vld [vmem:[%s8743_s11 + $0xb8] sm:$0xff]  ;;  %v4764_v63 = vld [vmem:[%s8743_s11 + $0xc0] sm:$0xff] }
 0x1b8   : > { %v3447_v48 = vpop.f32.mrf.mxu0  ;;  %4850 = vrot.lane.b32.xlu1 %v4763_v9, %s7640_s12 }
 0x1b9   : > { %v3640_v39 = vpop.f32.mrf.mxu1  ;;  %v8880_v62 = vadd.f32 %v3638_v34, %v3446_v12  ;;  %v3448_v27 = vadd.f32 %v3447_v48, %v8484_v54 }
 0x1ba   : > { %v3449_v47 = vpop.f32.mrf.mxu0  ;;  %4852 = vrot.lane.b32.xlu0 %v4764_v63, %s7640_s12 }
 0x1bb   : > { %v3642_v49 = vpop.f32.mrf.mxu1  ;;  %v8887_v46 = vadd.f32 %v3640_v39, %v3448_v27  ;;  %v3450_v31 = vadd.f32 %v3449_v47, %v8487_v61  ;;  %v4765_v39 = vld [vmem:[%s8743_s11 + $0xc8] sm:$0xff]  ;;  %v7190_v47 = vld [vmem:[%s7830_s28 + $0x6b8] ss:$56 sps:$4 sm:$0xff]  }
 0x1bc   : > { %v3453_v51 = vpop.f32.mrf.mxu0  ;;  %3918 = vmatmul.mubr.bf16.gmra.mxu0 %v7178_v7  ;;  %v7187_v27 = vld [vmem:[%s7830_s28 + $0x6b0] ss:$56 sps:$4 sm:$0xff]   ;;  %4854 = vrot.lane.b32.xlu1 %v4765_v39, %s7640_s12 }
 0x1bd   : > { %v3646_v34 = vpop.f32.mrf.mxu1  ;;  %4111 = vmatmul.mubr.bf16.gmra.mxu1 %v7181_v25  ;;  %v8892_v54 = vadd.f32 %v3642_v49, %v3450_v31  ;;  %v3454_v12 = vadd.f32 %v3453_v51, %v8490_v5  ;;  %3927 = vmatprep.mubr.bf16.mxu0 %v7189_v32  ;;  %v7201_v49 = vld [vmem:[%s7830_s28 + $0x574] ss:$56 sps:$4 sm:$0xff]  }
 0x1be   : > { %4120 = vmatprep.mubr.bf16.mxu1 %v7192_v11  ;;  %v3455_v14 = vpop.f32.mrf.mxu0  ;;  %v7198_v11 = vld [vmem:[%s7830_s28 + $0x34] ss:$56 sps:$4 sm:$0xff]  }
 0x1bf   : > { %v3648_v38 = vpop.f32.mrf.mxu1  ;;  %v8897_v61 = vadd.f32 %v3646_v34, %v3454_v12  ;;  %v3456_v48 = vadd.f32 %v3455_v14, %v8495_v15 }
 0x1c0   : > { %v3457_v7 = vpop.f32.mrf.mxu0 }
 0x1c1   : > { %v3650_v25 = vpop.f32.mrf.mxu1  ;;  %v8903_v5 = vadd.f32 %v3648_v38, %v3456_v48  ;;  %v3458_v32 = vadd.f32 %v3457_v7, %v8500_v24 }
 0x1c2   : > { %v3459_v31 = vpop.f32.mrf.mxu0 }
 0x1c3   : > { %v3652_v51 = vpop.f32.mrf.mxu1  ;;  %v8909_v9 = vadd.f32 %v3650_v25, %v3458_v32  ;;  %v3460_v15 = vadd.f32 %v3459_v31, %v8503_v30  ;;  %v7196_v25 = vld [vmem:[%s7830_s28 + $0x30] ss:$56 sps:$4 sm:$0xff]   ;;  %v7204_v31 = vld [vmem:[%s7830_s28 + $0xa4] ss:$56 sps:$4 sm:$0xff]  }
 0x1c4   : > { %v3463_v63 = vpop.f32.mrf.mxu0  ;;  %3928 = vmatmul.mubr.bf16.gmra.mxu0 %v7187_v27  ;;  %v7199_v32 = vld [vmem:[%s7830_s28 + $0x570] ss:$56 sps:$4 sm:$0xff]  }
 0x1c5   : > { %v3656_v34 = vpop.f32.mrf.mxu1  ;;  %4121 = vmatmul.mubr.bf16.gmra.mxu1 %v7190_v47  ;;  %v8912_v12 = vadd.f32 %v3652_v51, %v3460_v15  ;;  %v3464_v24 = vadd.f32 %v3463_v63, %v8506_v36  ;;  %4163 = vmatprep.mubr.bf16.mxu0 %v7198_v11  ;;  %v7207_v51 = vld [vmem:[%s7830_s28 + $0x5e4] ss:$56 sps:$4 sm:$0xff]  }
 0x1c6   : > { %4283 = vmatprep.mubr.bf16.mxu1 %v7201_v49  ;;  %v3465_v14 = vpop.f32.mrf.mxu0 }
 0x1c7   : > { %v3658_v38 = vpop.f32.mrf.mxu1  ;;  %v8915_v48 = vadd.f32 %v3656_v34, %v3464_v24  ;;  %v3466_v39 = vadd.f32 %v3465_v14, %v8511_v45 }
 0x1c8   : > { %v3467_v30 = vpop.f32.mrf.mxu0 }
 0x1c9   : > { %v3660_v7 = vpop.f32.mrf.mxu1  ;;  %v8920_v27 = vadd.f32 %v3658_v38, %v3466_v39  ;;  %v3468_v47 = vadd.f32 %v3467_v30, %v8522_v60 }
 0x1ca   : > { %v3469_v15 = vpop.f32.mrf.mxu0 }
 0x1cb   : > { %v3662_v36 = vpop.f32.mrf.mxu1  ;;  %v8925_v11 = vadd.f32 %v3660_v7, %v3468_v47  ;;  %v3470_v49 = vadd.f32 %v3469_v15, %v8525_v6  ;;  %v7202_v7 = vld [vmem:[%s7830_s28 + $0xa0] ss:$56 sps:$4 sm:$0xff]   ;;  %v7210_v15 = vld [vmem:[%s7830_s28 + $0x114] ss:$56 sps:$4 sm:$0xff]  }
 0x1cc   : > { %v3473_v63 = vpop.f32.mrf.mxu0  ;;  %4164 = vmatmul.mubr.bf16.vlgmr.msra.gmra.mxu0 %v7196_v25  ;;  %v7205_v47 = vld [vmem:[%s7830_s28 + $0x5e0] ss:$56 sps:$4 sm:$0xff]  }
 0x1cd   : > { %v3666_v45 = vpop.f32.mrf.mxu1  ;;  %4284 = vmatmul.mubr.bf16.vlgmr.msra.gmra.mxu1 %v7199_v32  ;;  %v8928_v34 = vadd.f32 %v3662_v36, %v3470_v49  ;;  %v3474_v60 = vadd.f32 %v3473_v63, %v8534_v18  ;;  %4173 = vmatprep.mubr.bf16.mxu0 %v7204_v31  ;;  %v7213_v36 = vld [vmem:[%s7830_s28 + $0x654] ss:$56 sps:$4 sm:$0xff]  }
 0x1ce   : > { %4293 = vmatprep.mubr.bf16.mxu1 %v7207_v51  ;;  %v3475_v24 = vpop.f32.mrf.mxu0 }
 0x1cf   : > { %v3668_v14 = vpop.f32.mrf.mxu1  ;;  %v8931_v38 = vadd.f32 %v3666_v45, %v3474_v60  ;;  %v3476_v39 = vadd.f32 %v3475_v24, %v8539_v28 }
 0x1d0   : > { %v3477_v6 = vpop.f32.mrf.mxu0 }
 0x1d1   : > { %v3670_v30 = vpop.f32.mrf.mxu1  ;;  %v8936_v25 = vadd.f32 %v3668_v14, %v3476_v39  ;;  %v3478_v32 = vadd.f32 %v3477_v6, %v8547_v42 }
 0x1d2   : > { %v3479_v49 = vpop.f32.mrf.mxu0 }
 0x1d3   : > { %v8941_v18 = vpop.f32.mrf.mxu1  ;;  %v8943_v31 = vadd.f32 %v3670_v30, %v3478_v32  ;;  %v8946_v51 = vadd.f32 %v3479_v49, %v8553_v52  ;;  %v7208_v52 = vld [vmem:[%s7830_s28 + $0x110] ss:$56 sps:$4 sm:$0xff]   ;;  %v7216_v49 = vld [vmem:[%s7830_s28 + $0x184] ss:$56 sps:$4 sm:$0xff]  }
 0x1d4   : > { %v3483_v28 = vpop.f32.mrf.mxu0  ;;  %4174 = vmatmul.mubr.bf16.gmra.mxu0 %v7202_v7  ;;  %v7211_v30 = vld [vmem:[%s7830_s28 + $0x650] ss:$56 sps:$4 sm:$0xff]  }
 0x1d5   : > { %10298 = vst [vmem:[#allocation20_spill] sm:$0xff] %v8943_v31  ;;  %v3676_v63 = vpop.f32.mrf.mxu1  ;;  %4294 = vmatmul.mubr.bf16.gmra.mxu1 %v7205_v47  ;;  %v3484_v42 = vadd.f32 %v3483_v28, %v8559_v1  ;;  %4183 = vmatprep.mubr.bf16.mxu0 %v7210_v15  ;;  %v7219_v47 = vld [vmem:[%s7830_s28 + $0x6c4] ss:$56 sps:$4 sm:$0xff]  }
 0x1d6   : > { %4303 = vmatprep.mubr.bf16.mxu1 %v7213_v36  ;;  %v3485_v45 = vpop.f32.mrf.mxu0 }
 0x1d7   : > { %v3678_v60 = vpop.f32.mrf.mxu1  ;;  %v8949_v24 = vadd.f32 %v3676_v63, %v3484_v42  ;;  %v3486_v14 = vadd.f32 %v3485_v45, %v8567_v20 }
 0x1d8   : > { %v3487_v39 = vpop.f32.mrf.mxu0 }
 0x1d9   : > { %v3680_v6 = vpop.f32.mrf.mxu1  ;;  %v8954_v32 = vadd.f32 %v3678_v60, %v3486_v14  ;;  %v3488_v7 = vadd.f32 %v3487_v39, %v8575_v35 }
 0x1da   : > { %v3489_v31 = vpop.f32.mrf.mxu0 }
 0x1db   : > { %v8959_v1 = vpop.f32.mrf.mxu1  ;;  %v8961_v15 = vadd.f32 %v3680_v6, %v3488_v7  ;;  %v8964_v36 = vadd.f32 %v3489_v31, %v8581_v57  ;;  %v7214_v6 = vld [vmem:[%s7830_s28 + $0x180] ss:$56 sps:$4 sm:$0xff]  }
 0x1dc   : > { %v3493_v20 = vpop.f32.mrf.mxu0  ;;  %4184 = vmatmul.mubr.bf16.gmra.mxu0 %v7208_v52  ;;  %v7217_v57 = vld [vmem:[%s7830_s28 + $0x6c0] ss:$56 sps:$4 sm:$0xff]   ;;  %v7222_v52 = vld [vmem:[%s7830_s28 + $0x1f4] ss:$56 sps:$4 sm:$0xff]  }
 0x1dd   : > { %v3686_v28 = vpop.f32.mrf.mxu1  ;;  %4304 = vmatmul.mubr.bf16.gmra.mxu1 %v7211_v30  ;;  %v3494_v63 = vadd.f32 %v3493_v20, %v8587_v56  ;;  %4193 = vmatprep.mubr.bf16.mxu0 %v7216_v49 }
 0x1de   : > { %4313 = vmatprep.mubr.bf16.mxu1 %v7219_v47  ;;  %v3495_v35 = vpop.f32.mrf.mxu0 }
 0x1df   : > { %v3688_v42 = vpop.f32.mrf.mxu1  ;;  %v8967_v45 = vadd.f32 %v3686_v28, %v3494_v63  ;;  %v3496_v60 = vadd.f32 %v3495_v35, %v8595_v22  ;;  %v10302_v28 = vld [vmem:[#allocation2_spill] sm:$0xff] }
 0x1e0   : > { %v3497_v14 = vpop.f32.mrf.mxu0 }
 0x1e1   : > { %v3690_v39 = vpop.f32.mrf.mxu1  ;;  %v8972_v31 = vadd.f32 %v3688_v42, %v3496_v60  ;;  %v3498_v7 = vadd.f32 %v3497_v14, %v8603_v41  ;;  %v10304_v60 = vld [vmem:[#allocation3_spill] sm:$0xff] }
 0x1e2   : > { %v3499_v30 = vpop.f32.mrf.mxu0 }
 0x1e3   : > { %v8976_v56 = vpop.f32.mrf.mxu1  ;;  %v8978_v49 = vadd.f32 %v3690_v39, %v3498_v7  ;;  %v8981_v47 = vadd.f32 %v3499_v30, %v8609_v50  ;;  %v7220_v7 = vld [vmem:[%s7830_s28 + $0x1f0] ss:$56 sps:$4 sm:$0xff]  }
 0x1e4   : > { %10299 = vst [vmem:[#allocation21_spill] sm:$0xff] %v8976_v56  ;;  %v3503_v22 = vpop.f32.mrf.mxu0  ;;  %4194 = vmatmul.mubr.bf16.gmra.mxu0 %v7214_v6  ;;  %v10306_v50 = vld [vmem:[#allocation4_spill] sm:$0xff] }
 0x1e5   : > { %10300 = vst [vmem:[#allocation22_spill] sm:$0xff] %v8978_v49  ;;  %10301 = vst [vmem:[#allocation23_spill] sm:$0xff] %v8981_v47  ;;  %v3696_v20 = vpop.f32.mrf.mxu1  ;;  %4314 = vmatmul.mubr.bf16.gmra.mxu1 %v7217_v57  ;;  %v3504_v63 = vadd.f32 %v3503_v22, %v10302_v28  ;;  %4203 = vmatprep.mubr.bf16.mxu0 %v7222_v52  ;;  %v7225_v47 = vld [vmem:[%s7830_s28 + $0x264] ss:$56 sps:$4 sm:$0xff]  }
 0x1e6   : > { %v3505_v35 = vpop.f32.mrf.mxu0  ;;  %v10309_v52 = vld [vmem:[#allocation5_spill] sm:$0xff] }
 0x1e7   : > { %v3698_v41 = vpop.f32.mrf.mxu1  ;;  %v8984_v42 = vadd.f32 %v3696_v20, %v3504_v63  ;;  %v3506_v14 = vadd.f32 %v3505_v35, %v10304_v60  ;;  %v10311_v35 = vld [vmem:[#allocation6_spill] sm:$0xff] }
 0x1e8   : > { %v3507_v56 = vpop.f32.mrf.mxu0 }
 0x1e9   : > { %10303 = vst [vmem:[#allocation2_spill] sm:$0xff] %v8984_v42  ;;  %v3700_v39 = vpop.f32.mrf.mxu1  ;;  %v8988_v49 = vadd.f32 %v3698_v41, %v3506_v14  ;;  %v3508_v30 = vadd.f32 %v3507_v56, %v10306_v50  ;;  %v10313_v50 = vld [vmem:[#allocation7_spill] sm:$0xff] }
 0x1ea   : > { %v3509_v6 = vpop.f32.mrf.mxu0 }
 0x1eb   : > { %10305 = vst [vmem:[#allocation3_spill] sm:$0xff] %v8988_v49  ;;  %v8992_v57 = vpop.f32.mrf.mxu1  ;;  %v8994_v22 = vadd.f32 %v3700_v39, %v3508_v30  ;;  %v8997_v20 = vadd.f32 %v3509_v6, %v10309_v52  ;;  %v7223_v39 = vld [vmem:[%s7830_s28 + $0x260] ss:$56 sps:$4 sm:$0xff]   ;;  %v7228_v52 = vld [vmem:[%s7830_s28 + $0x2d4] ss:$56 sps:$4 sm:$0xff]  }
 0x1ec   : > { %10307 = vst [vmem:[#allocation4_spill] sm:$0xff] %v8992_v57  ;;  %v3513_v28 = vpop.f32.mrf.mxu0  ;;  %4204 = vmatmul.mubr.bf16.gmra.mxu0 %v7220_v7 }
 0x1ed   : > { %10308 = vst [vmem:[#allocation24_spill] sm:$0xff] %v8994_v22  ;;  %10310 = vst [vmem:[#allocation5_spill] sm:$0xff] %v8997_v20  ;;  %v3706_v63 = vpop.f32.mrf.mxu1  ;;  %v3514_v60 = vadd.f32 %v3513_v28, %v10311_v35  ;;  %4213 = vmatprep.mubr.bf16.mxu0 %v7225_v47  ;;  %v10315_v22 = vld [vmem:[#allocation8_spill] sm:$0xff]  ;;  %v10318_v47 = vld [vmem:[#allocation9_spill] sm:$0xff] }
 0x1ee   : > { %v3515_v41 = vpop.f32.mrf.mxu0 }
 0x1ef   : > { %v3708_v14 = vpop.f32.mrf.mxu1  ;;  %v9000_v56 = vadd.f32 %v3706_v63, %v3514_v60  ;;  %v3516_v49 = vadd.f32 %v3515_v41, %v10313_v50  ;;  %v10320_v41 = vld [vmem:[#allocation10_spill] sm:$0xff] }
 0x1f0   : > { %v3517_v42 = vpop.f32.mrf.mxu0 }
 0x1f1   : > { %10312 = vst [vmem:[#allocation6_spill] sm:$0xff] %v9000_v56  ;;  %v3710_v57 = vpop.f32.mrf.mxu1  ;;  %v9004_v30 = vadd.f32 %v3708_v14, %v3516_v49  ;;  %v3518_v6 = vadd.f32 %v3517_v42, %v10315_v22  ;;  %v10322_v22 = vld [vmem:[#allocation11_spill] sm:$0xff] }
 0x1f2   : > { %v3519_v20 = vpop.f32.mrf.mxu0 }
 0x1f3   : > { %10314 = vst [vmem:[#allocation7_spill] sm:$0xff] %v9004_v30  ;;  %v9008_v7 = vpop.f32.mrf.mxu1  ;;  %v9010_v28 = vadd.f32 %v3710_v57, %v3518_v6  ;;  %v9013_v63 = vadd.f32 %v3519_v20, %v10318_v47  ;;  %v7226_v57 = vld [vmem:[%s7830_s28 + $0x2d0] ss:$56 sps:$4 sm:$0xff]   ;;  %v7231_v47 = vld [vmem:[%s7830_s28 + $0x344] ss:$56 sps:$4 sm:$0xff]  }
 0x1f4   : > { %10316 = vst [vmem:[#allocation8_spill] sm:$0xff] %v9008_v7  ;;  %v3523_v35 = vpop.f32.mrf.mxu0  ;;  %4214 = vmatmul.mubr.bf16.gmra.mxu0 %v7223_v39 }
 0x1f5   : > { %10317 = vst [vmem:[#allocation25_spill] sm:$0xff] %v9010_v28  ;;  %10319 = vst [vmem:[#allocation9_spill] sm:$0xff] %v9013_v63  ;;  %v3716_v60 = vpop.f32.mrf.mxu1  ;;  %v3524_v50 = vadd.f32 %v3523_v35, %v10320_v41  ;;  %4223 = vmatprep.mubr.bf16.mxu0 %v7228_v52  ;;  %v10324_v28 = vld [vmem:[#allocation12_spill] sm:$0xff]  ;;  %v10327_v52 = vld [vmem:[#allocation13_spill] sm:$0xff] }
 0x1f6   : > { %v3525_v49 = vpop.f32.mrf.mxu0 }
 0x1f7   : > { %v3718_v14 = vpop.f32.mrf.mxu1  ;;  %v9016_v42 = vadd.f32 %v3716_v60, %v3524_v50  ;;  %v3526_v30 = vadd.f32 %v3525_v49, %v10322_v22  ;;  %v10329_v49 = vld [vmem:[#allocation14_spill] sm:$0xff] }
 0x1f8   : > { %v3527_v56 = vpop.f32.mrf.mxu0 }
 0x1f9   : > { %10321 = vst [vmem:[#allocation10_spill] sm:$0xff] %v9016_v42  ;;  %v3720_v7 = vpop.f32.mrf.mxu1  ;;  %v9020_v6 = vadd.f32 %v3718_v14, %v3526_v30  ;;  %v3528_v20 = vadd.f32 %v3527_v56, %v10324_v28  ;;  %v10330_v28 = vld [vmem:[#allocation15_spill] sm:$0xff] }
 0x1fa   : > { %v3529_v63 = vpop.f32.mrf.mxu0 }
 0x1fb   : > { %10323 = vst [vmem:[#allocation11_spill] sm:$0xff] %v9020_v6  ;;  %v9024_v39 = vpop.f32.mrf.mxu1  ;;  %v9026_v35 = vadd.f32 %v3720_v7, %v3528_v20  ;;  %v9029_v60 = vadd.f32 %v3529_v63, %v10327_v52  ;;  %v7229_v7 = vld [vmem:[%s7830_s28 + $0x340] ss:$56 sps:$4 sm:$0xff]   ;;  %v7234_v52 = vld [vmem:[%s7830_s28 + $0x3b4] ss:$56 sps:$4 sm:$0xff]  }
 0x1fc   : > { %10325 = vst [vmem:[#allocation12_spill] sm:$0xff] %v9024_v39  ;;  %v3533_v41 = vpop.f32.mrf.mxu0  ;;  %4224 = vmatmul.mubr.bf16.gmra.mxu0 %v7226_v57 }
 0x1fd   : > { %10326 = vst [vmem:[#allocation26_spill] sm:$0xff] %v9026_v35  ;;  %10328 = vst [vmem:[#allocation13_spill] sm:$0xff] %v9029_v60  ;;  %v3726_v50 = vpop.f32.mrf.mxu1  ;;  %v3534_v22 = vadd.f32 %v3533_v41, %v10329_v49  ;;  %4233 = vmatprep.mubr.bf16.mxu0 %v7231_v47  ;;  %v10332_v35 = vld [vmem:[#allocation16_spill] sm:$0xff]  ;;  %v10334_v47 = vld [vmem:[#allocation17_spill] sm:$0xff] }
 0x1fe   : > { %v3535_v30 = vpop.f32.mrf.mxu0 }
 0x1ff   : > { %v3728_v14 = vpop.f32.mrf.mxu1  ;;  %v9032_v56 = vadd.f32 %v3726_v50, %v3534_v22  ;;  %v3536_v6 = vadd.f32 %v3535_v30, %v10330_v28 }
 0x200   : > { %v3537_v42 = vpop.f32.mrf.mxu0 }
 0x201   : > { %v3730_v39 = vpop.f32.mrf.mxu1  ;;  %v9036_v20 = vadd.f32 %v3728_v14, %v3536_v6  ;;  %v3538_v63 = vadd.f32 %v3537_v42, %v10332_v35 }
 0x202   : > { %v3539_v60 = vpop.f32.mrf.mxu0 }
 0x203   : > { %10331 = vst [vmem:[#allocation14_spill] sm:$0xff] %v9036_v20  ;;  %v9040_v57 = vpop.f32.mrf.mxu1  ;;  %v9042_v41 = vadd.f32 %v3730_v39, %v3538_v63  ;;  %v9045_v50 = vadd.f32 %v3539_v60, %v10334_v47  ;;  %v7232_v39 = vld [vmem:[%s7830_s28 + $0x3b0] ss:$56 sps:$4 sm:$0xff]   ;;  %v7237_v47 = vld [vmem:[%s7830_s28 + $0x424] ss:$56 sps:$4 sm:$0xff]  }
 0x204   : > { %10333 = vst [vmem:[#allocation15_spill] sm:$0xff] %v9040_v57  ;;  %v3543_v49 = vpop.f32.mrf.mxu0  ;;  %4234 = vmatmul.mubr.bf16.gmra.mxu0 %v7229_v7 }
 0x205   : > { %10335 = vst [vmem:[#allocation16_spill] sm:$0xff] %v9045_v50  ;;  %v3736_v22 = vpop.f32.mrf.mxu1  ;;  %v3544_v30 = vadd.f32 %v3543_v49, %v8727_v26  ;;  %4243 = vmatprep.mubr.bf16.mxu0 %v7234_v52  ;;  %v10338_v52 = vld [vmem:[#allocation18_spill] sm:$0xff] }
 0x206   : > { %v3545_v6 = vpop.f32.mrf.mxu0 }
 0x207   : > { %v3738_v14 = vpop.f32.mrf.mxu1  ;;  %v9048_v42 = vadd.f32 %v3736_v22, %v3544_v30  ;;  %v3546_v35 = vadd.f32 %v3545_v6, %v8732_v16  ;;  %v10340_v30 = vld [vmem:[#allocation19_spill] sm:$0xff] }
 0x208   : > { %v3547_v28 = vpop.f32.mrf.mxu0 }
 0x209   : > { %v3740_v57 = vpop.f32.mrf.mxu1  ;;  %v9052_v63 = vadd.f32 %v3738_v14, %v3546_v35  ;;  %v3548_v60 = vadd.f32 %v3547_v28, %v8745_v44 }
 0x20a   : > { %v3549_v50 = vpop.f32.mrf.mxu0 }
 0x20b   : > { %v9056_v7 = vpop.f32.mrf.mxu1  ;;  %v9058_v26 = vadd.f32 %v3740_v57, %v3548_v60  ;;  %v9061_v49 = vadd.f32 %v3549_v50, %v10338_v52  ;;  %v7235_v57 = vld [vmem:[%s7830_s28 + $0x420] ss:$56 sps:$4 sm:$0xff]   ;;  %v7240_v52 = vld [vmem:[%s7830_s28 + $0x494] ss:$56 sps:$4 sm:$0xff]  }
 0x20c   : > { %10336 = vst [vmem:[#allocation17_spill] sm:$0xff] %v9056_v7  ;;  %v3779_v22 = vpop.f32.mrf.mxu0  ;;  %4244 = vmatmul.mubr.bf16.gmra.mxu0 %v7232_v39 }
 0x20d   : > { %10337 = vst [vmem:[#allocation27_spill] sm:$0xff] %v9058_v26  ;;  %10339 = vst [vmem:[#allocation18_spill] sm:$0xff] %v9061_v49  ;;  %v3972_v16 = vpop.f32.mrf.mxu1  ;;  %v3780_v6 = vadd.f32 %v3779_v22, %v10340_v30  ;;  %4253 = vmatprep.mubr.bf16.mxu0 %v7237_v47 }
 0x20e   : > { %v3781_v14 = vpop.f32.mrf.mxu0 }
 0x20f   : > { %v3974_v35 = vpop.f32.mrf.mxu1  ;;  %v9064_v44 = vadd.f32 %v3972_v16, %v3780_v6  ;;  %v3782_v28 = vadd.f32 %v3781_v14, %v8761_v2 }
 0x210   : > { %v3783_v20 = vpop.f32.mrf.mxu0 }
 0x211   : > { %v3976_v7 = vpop.f32.mrf.mxu1  ;;  %v9068_v60 = vadd.f32 %v3974_v35, %v3782_v28  ;;  %v3784_v50 = vadd.f32 %v3783_v20, %v8767_v59  ;;  %v7238_v28 = vld [vmem:[%s7830_s28 + $0x490] ss:$56 sps:$4 sm:$0xff]  }
 0x212   : > { %v3785_v26 = vpop.f32.mrf.mxu0 }
 0x213   : > { %v3978_v39 = vpop.f32.mrf.mxu1  ;;  %v9072_v49 = vadd.f32 %v3976_v7, %v3784_v50  ;;  %v3786_v47 = vadd.f32 %v3785_v26, %v8772_v3  ;;  %v7243_v26 = vld [vmem:[%s7830_s28 + $0x504] ss:$56 sps:$4 sm:$0xff]  }
 0x214   : > { %v3789_v22 = vpop.f32.mrf.mxu0  ;;  %4254 = vmatmul.mubr.bf16.gmra.mxu0 %v7235_v57 }
 0x215   : > { %v3982_v16 = vpop.f32.mrf.mxu1  ;;  %v9075_v2 = vadd.f32 %v3978_v39, %v3786_v47  ;;  %v3790_v30 = vadd.f32 %v3789_v22, %v8777_v33  ;;  %4263 = vmatprep.mubr.bf16.mxu0 %v7240_v52 }
 0x216   : > { %v3791_v6 = vpop.f32.mrf.mxu0 }
 0x217   : > { %v3984_v14 = vpop.f32.mrf.mxu1  ;;  %v9078_v59 = vadd.f32 %v3982_v16, %v3790_v30  ;;  %v3792_v20 = vadd.f32 %v3791_v6, %v8784_v40 }
 0x218   : > { %v3793_v35 = vpop.f32.mrf.mxu0 }
 0x219   : > { %v3986_v7 = vpop.f32.mrf.mxu1  ;;  %v9082_v50 = vadd.f32 %v3984_v14, %v3792_v20  ;;  %v3794_v3 = vadd.f32 %v3793_v35, %v8791_v17 }
 0x21a   : > { %v3795_v57 = vpop.f32.mrf.mxu0 }
 0x21b   : > { %v3988_v39 = vpop.f32.mrf.mxu1  ;;  %v9086_v47 = vadd.f32 %v3986_v7, %v3794_v3  ;;  %v3796_v33 = vadd.f32 %v3795_v57, %v8796_v23  ;;  %v7241_v7 = vld [vmem:[%s7830_s28 + $0x500] ss:$56 sps:$4 sm:$0xff]   ;;  %s7641_s28 = smov 96  }
 0x21c   : > { %v3799_v52 = vpop.f32.mrf.mxu0  ;;  %4264 = vmatmul.mubr.bf16.gmra.mxu0 %v7238_v28 }
 0x21d   : > { %v3992_v22 = vpop.f32.mrf.mxu1  ;;  %v9089_v16 = vadd.f32 %v3988_v39, %v3796_v33  ;;  %v3800_v40 = vadd.f32 %v3799_v52, %v8801_v53  ;;  %4273 = vmatprep.mubr.bf16.mxu0 %v7243_v26 }
 0x21e   : > { %v3801_v30 = vpop.f32.mrf.mxu0 }
 0x21f   : > { %v3994_v6 = vpop.f32.mrf.mxu1  ;;  %v9092_v14 = vadd.f32 %v3992_v22, %v3800_v40  ;;  %v3802_v17 = vadd.f32 %v3801_v30, %v8808_v19 }
 0x220   : > { %v3803_v20 = vpop.f32.mrf.mxu0 }
 0x221   : > { %v3996_v35 = vpop.f32.mrf.mxu1  ;;  %v9096_v3 = vadd.f32 %v3994_v6, %v3802_v17  ;;  %v3804_v23 = vadd.f32 %v3803_v20, %v8815_v37 }
 0x222   : > { %v3805_v57 = vpop.f32.mrf.mxu0 }
 0x223   : > { %v3998_v28 = vpop.f32.mrf.mxu1  ;;  %v9099_v39 = vadd.f32 %v3996_v35, %v3804_v23  ;;  %v3806_v53 = vadd.f32 %v3805_v57, %v8820_v43 }
 0x224   : > { %v3809_v26 = vpop.f32.mrf.mxu0  ;;  %4274 = vmatmul.mubr.bf16.gmra.mxu0 %v7241_v7 }
 0x225   : > { %v4002_v33 = vpop.f32.mrf.mxu1  ;;  %v9102_v52 = vadd.f32 %v3998_v28, %v3806_v53  ;;  %v3810_v19 = vadd.f32 %v3809_v26, %v8825_v10 }
 0x226   : > { %v3811_v22 = vpop.f32.mrf.mxu0 }
 0x227   : > { %v4004_v40 = vpop.f32.mrf.mxu1  ;;  %v9105_v30 = vadd.f32 %v4002_v33, %v3810_v19  ;;  %v3812_v6 = vadd.f32 %v3811_v22, %v8832_v8 }
 0x228   : > { %v3813_v37 = vpop.f32.mrf.mxu0 }
 0x229   : > { %v4006_v17 = vpop.f32.mrf.mxu1  ;;  %v9108_v20 = vadd.f32 %v4004_v40, %v3812_v6  ;;  %v3814_v35 = vadd.f32 %v3813_v37, %v8839_v58 }
 0x22a   : > { %v3815_v43 = vpop.f32.mrf.mxu0 }
 0x22b   : > { %v4008_v23 = vpop.f32.mrf.mxu1  ;;  %v9111_v57 = vadd.f32 %v4006_v17, %v3814_v35  ;;  %v3816_v7 = vadd.f32 %v3815_v43, %v8844_v4 }
 0x22c   : > { %v3819_v28 = vpop.f32.mrf.mxu0 }
 0x22d   : > { %v4012_v10 = vpop.f32.mrf.mxu1  ;;  %v9114_v53 = vadd.f32 %v4008_v23, %v3816_v7  ;;  %v3820_v26 = vadd.f32 %v3819_v28, %v8849_v0 }
 0x22e   : > { %v3821_v33 = vpop.f32.mrf.mxu0 }
 0x22f   : > { %10341 = vst [vmem:[#allocation19_spill] sm:$0xff] %v9114_v53  ;;  %v4014_v8 = vpop.f32.mrf.mxu1  ;;  %v9117_v19 = vadd.f32 %v4012_v10, %v3820_v26  ;;  %v3822_v22 = vadd.f32 %v3821_v33, %v8856_v55 }
 0x230   : > { %v3823_v40 = vpop.f32.mrf.mxu0 }
 0x231   : > { %v4016_v58 = vpop.f32.mrf.mxu1  ;;  %v9120_v6 = vadd.f32 %v4014_v8, %v3822_v22  ;;  %v3824_v37 = vadd.f32 %v3823_v40, %v8863_v21 }
 0x232   : > { %v3825_v17 = vpop.f32.mrf.mxu0 }
 0x233   : > { %10342 = vst [vmem:[#allocation28_spill] sm:$0xff] %v9120_v6  ;;  %v4018_v4 = vpop.f32.mrf.mxu1  ;;  %v9123_v35 = vadd.f32 %v4016_v58, %v3824_v37  ;;  %v3826_v43 = vadd.f32 %v3825_v17, %v8868_v29 }
 0x234   : > { %v3829_v23 = vpop.f32.mrf.mxu0 }
 0x235   : > { %v4022_v0 = vpop.f32.mrf.mxu1  ;;  %v9126_v7 = vadd.f32 %v4018_v4, %v3826_v43  ;;  %v3830_v28 = vadd.f32 %v3829_v23, %v8873_v13 }
 0x236   : > { %v3831_v10 = vpop.f32.mrf.mxu0 }
 0x237   : > { %10343 = vst [vmem:[#allocation29_spill] sm:$0xff] %v9126_v7  ;;  %v4024_v55 = vpop.f32.mrf.mxu1  ;;  %v9129_v26 = vadd.f32 %v4022_v0, %v3830_v28  ;;  %v3832_v33 = vadd.f32 %v3831_v10, %v8880_v62 }
 0x238   : > { %v3833_v8 = vpop.f32.mrf.mxu0 }
 0x239   : > { %v4026_v21 = vpop.f32.mrf.mxu1  ;;  %v9132_v22 = vadd.f32 %v4024_v55, %v3832_v33  ;;  %v3834_v40 = vadd.f32 %v3833_v8, %v8887_v46 }
 0x23a   : > { %v3835_v58 = vpop.f32.mrf.mxu0 }
 0x23b   : > { %10344 = vst [vmem:[#allocation30_spill] sm:$0xff] %v9132_v22  ;;  %v4028_v29 = vpop.f32.mrf.mxu1  ;;  %v9135_v37 = vadd.f32 %v4026_v21, %v3834_v40  ;;  %v3836_v17 = vadd.f32 %v3835_v58, %v8892_v54 }
 0x23c   : > { %v3839_v4 = vpop.f32.mrf.mxu0 }
 0x23d   : > { %v4032_v13 = vpop.f32.mrf.mxu1  ;;  %v9138_v43 = vadd.f32 %v4028_v29, %v3836_v17  ;;  %v3840_v23 = vadd.f32 %v3839_v4, %v8897_v61 }
 0x23e   : > { %v3841_v0 = vpop.f32.mrf.mxu0 }
 0x23f   : > { %10345 = vst [vmem:[#allocation31_spill] sm:$0xff] %v9138_v43  ;;  %v4034_v62 = vpop.f32.mrf.mxu1  ;;  %v9141_v28 = vadd.f32 %v4032_v13, %v3840_v23  ;;  %v3842_v10 = vadd.f32 %v3841_v0, %v8903_v5 }
 0x240   : > { %v3843_v55 = vpop.f32.mrf.mxu0 }
 0x241   : > { %v4036_v46 = vpop.f32.mrf.mxu1  ;;  %v9144_v33 = vadd.f32 %v4034_v62, %v3842_v10  ;;  %v3844_v8 = vadd.f32 %v3843_v55, %v8909_v9 }
 0x242   : > { %v3845_v21 = vpop.f32.mrf.mxu0 }
 0x243   : > { %10346 = vst [vmem:[#allocation32_spill] sm:$0xff] %v9144_v33  ;;  %v4038_v54 = vpop.f32.mrf.mxu1  ;;  %v9147_v40 = vadd.f32 %v4036_v46, %v3844_v8  ;;  %v3846_v58 = vadd.f32 %v3845_v21, %v8912_v12 }
 0x244   : > { %v3849_v29 = vpop.f32.mrf.mxu0 }
 0x245   : > { %v4042_v61 = vpop.f32.mrf.mxu1  ;;  %v9150_v17 = vadd.f32 %v4038_v54, %v3846_v58  ;;  %v3850_v4 = vadd.f32 %v3849_v29, %v8915_v48 }
 0x246   : > { %v3851_v13 = vpop.f32.mrf.mxu0 }
 0x247   : > { %10347 = vst [vmem:[#allocation33_spill] sm:$0xff] %v9150_v17  ;;  %v4044_v5 = vpop.f32.mrf.mxu1  ;;  %v9153_v23 = vadd.f32 %v4042_v61, %v3850_v4  ;;  %v3852_v0 = vadd.f32 %v3851_v13, %v8920_v27 }
 0x248   : > { %v3853_v62 = vpop.f32.mrf.mxu0 }
 0x249   : > { %v4046_v9 = vpop.f32.mrf.mxu1  ;;  %v9156_v10 = vadd.f32 %v4044_v5, %v3852_v0  ;;  %v3854_v55 = vadd.f32 %v3853_v62, %v8925_v11  ;;  %v3673_v0 = vadd.f32 %v8941_v18, %v8946_v51 }
 0x24a   : > { %v3855_v46 = vpop.f32.mrf.mxu0 }
 0x24b   : > { %10348 = vst [vmem:[#allocation34_spill] sm:$0xff] %v9156_v10  ;;  %v4048_v12 = vpop.f32.mrf.mxu1  ;;  %v9159_v8 = vadd.f32 %v4046_v9, %v3854_v55  ;;  %v3856_v21 = vadd.f32 %v3855_v46, %v8928_v34  ;;  %v10351_v34 = vld [vmem:[#allocation20_spill] sm:$0xff] }
 0x24c   : > { %v3859_v54 = vpop.f32.mrf.mxu0 }
 0x24d   : > { %v4052_v48 = vpop.f32.mrf.mxu1  ;;  %v9162_v58 = vadd.f32 %v4048_v12, %v3856_v21  ;;  %v3860_v29 = vadd.f32 %v3859_v54, %v8931_v38 }
 0x24e   : > { %v3861_v61 = vpop.f32.mrf.mxu0 }
 0x24f   : > { %10349 = vst [vmem:[#allocation35_spill] sm:$0xff] %v9162_v58  ;;  %v4054_v27 = vpop.f32.mrf.mxu1  ;;  %v9165_v4 = vadd.f32 %v4052_v48, %v3860_v29  ;;  %v3862_v13 = vadd.f32 %v3861_v61, %v8936_v25 }
 0x250   : > { %v3863_v5 = vpop.f32.mrf.mxu0 }
 0x251   : > { %v4056_v11 = vpop.f32.mrf.mxu1  ;;  %v9170_v62 = vadd.f32 %v4054_v27, %v3862_v13  ;;  %v3864_v9 = vadd.f32 %v3863_v5, %v10351_v34  ;;  %v3683_v13 = vadd.f32 %v8959_v1, %v8964_v36 }
 0x252   : > { %v3865_v55 = vpop.f32.mrf.mxu0 }
 0x253   : > { %10350 = vst [vmem:[#allocation36_spill] sm:$0xff] %v9170_v62  ;;  %v4058_v46 = vpop.f32.mrf.mxu1  ;;  %v9173_v12 = vadd.f32 %v4056_v11, %v3864_v9  ;;  %v3866_v38 = vadd.f32 %v3865_v55, %v3673_v0 }
 0x254   : > { %v3869_v21 = vpop.f32.mrf.mxu0 }
 0x255   : > { %10352 = vst [vmem:[#allocation20_spill] sm:$0xff] %v9173_v12  ;;  %v4062_v54 = vpop.f32.mrf.mxu1  ;;  %v9175_v48 = vadd.f32 %v4058_v46, %v3866_v38  ;;  %v3870_v25 = vadd.f32 %v3869_v21, %v8949_v24 }
 0x256   : > { %v3871_v29 = vpop.f32.mrf.mxu0 }
 0x257   : > { %10353 = vst [vmem:[#allocation37_spill] sm:$0xff] %v9175_v48  ;;  %v4064_v61 = vpop.f32.mrf.mxu1  ;;  %v9178_v58 = vadd.f32 %v4062_v54, %v3870_v25  ;;  %v3872_v18 = vadd.f32 %v3871_v29, %v8954_v32 }
 0x258   : > { %v3873_v51 = vpop.f32.mrf.mxu0 }
 0x259   : > { %10354 = vst [vmem:[#allocation38_spill] sm:$0xff] %v9178_v58  ;;  %v4066_v27 = vpop.f32.mrf.mxu1  ;;  %v9183_v5 = vadd.f32 %v4064_v61, %v3872_v18  ;;  %v3874_v11 = vadd.f32 %v3873_v51, %v8961_v15  ;;  %v10359_v15 = vld [vmem:[#allocation23_spill] sm:$0xff]  ;;  %v10360_v61 = vld [vmem:[#allocation21_spill] sm:$0xff] }
 0x25a   : > { %v3875_v0 = vpop.f32.mrf.mxu0  ;;  %v3693_v18 = vadd.f32 %v10360_v61, %v10359_v15  ;;  %v10367_v15 = vld [vmem:[#allocation3_spill] sm:$0xff] }
 0x25b   : > { %10355 = vst [vmem:[#allocation39_spill] sm:$0xff] %v9183_v5  ;;  %v4068_v34 = vpop.f32.mrf.mxu1  ;;  %v9186_v9 = vadd.f32 %v4066_v27, %v3874_v11  ;;  %v3876_v24 = vadd.f32 %v3875_v0, %v3683_v13  ;;  %v10362_v27 = vld [vmem:[#allocation22_spill] sm:$0xff] }
 0x25c   : > { %v3879_v55 = vpop.f32.mrf.mxu0 }
 0x25d   : > { %10356 = vst [vmem:[#allocation40_spill] sm:$0xff] %v9186_v9  ;;  %v4072_v46 = vpop.f32.mrf.mxu1  ;;  %v9188_v38 = vadd.f32 %v4068_v34, %v3876_v24  ;;  %v3880_v32 = vadd.f32 %v3879_v55, %v8967_v45 }
 0x25e   : > { %v3881_v21 = vpop.f32.mrf.mxu0 }
 0x25f   : > { %10357 = vst [vmem:[#allocation41_spill] sm:$0xff] %v9188_v38  ;;  %v4074_v54 = vpop.f32.mrf.mxu1  ;;  %v9191_v25 = vadd.f32 %v4072_v46, %v3880_v32  ;;  %v3882_v1 = vadd.f32 %v3881_v21, %v8972_v31  ;;  %v10365_v32 = vld [vmem:[#allocation2_spill] sm:$0xff] }
 0x260   : > { %v3883_v36 = vpop.f32.mrf.mxu0 }
 0x261   : > { %10358 = vst [vmem:[#allocation42_spill] sm:$0xff] %v9191_v25  ;;  %v4076_v29 = vpop.f32.mrf.mxu1  ;;  %v9196_v51 = vadd.f32 %v4074_v54, %v3882_v1  ;;  %v3884_v13 = vadd.f32 %v3883_v36, %v10362_v27  ;;  %v10368_v36 = vld [vmem:[#allocation5_spill] sm:$0xff]  ;;  %v10369_v27 = vld [vmem:[#allocation4_spill] sm:$0xff]  ;;  %v10380_v25 = vld [vmem:[#allocation27_spill] sm:$0xff] }
 0x262   : > { %v3885_v11 = vpop.f32.mrf.mxu0 }
 0x263   : > { %10361 = vst [vmem:[#allocation23_spill] sm:$0xff] %v9196_v51  ;;  %v4078_v0 = vpop.f32.mrf.mxu1  ;;  %v9199_v34 = vadd.f32 %v4076_v29, %v3884_v13  ;;  %v3886_v45 = vadd.f32 %v3885_v11, %v3693_v18  ;;  %v3703_v51 = vadd.f32 %v10369_v27, %v10368_v36  ;;  %v10371_v18 = vld [vmem:[#allocation24_spill] sm:$0xff] }
 0x264   : > { %v3889_v24 = vpop.f32.mrf.mxu0 }
 0x265   : > { %10363 = vst [vmem:[#allocation21_spill] sm:$0xff] %v9199_v34  ;;  %v4082_v55 = vpop.f32.mrf.mxu1  ;;  %v9201_v46 = vadd.f32 %v4078_v0, %v3886_v45  ;;  %v3890_v31 = vadd.f32 %v3889_v24, %v10365_v32  ;;  %v10379_v34 = vld [vmem:[#allocation17_spill] sm:$0xff] }
 0x266   : > { %v3891_v21 = vpop.f32.mrf.mxu0 }
 0x267   : > { %10364 = vst [vmem:[#allocation22_spill] sm:$0xff] %v9201_v46  ;;  %v4084_v38 = vpop.f32.mrf.mxu1  ;;  %v9204_v5 = vadd.f32 %v4082_v55, %v3890_v31  ;;  %v3892_v54 = vadd.f32 %v3891_v21, %v10367_v15  ;;  %v10374_v31 = vld [vmem:[#allocation6_spill] sm:$0xff] }
 0x268   : > { %v3893_v1 = vpop.f32.mrf.mxu0 }
 0x269   : > { %10366 = vst [vmem:[#allocation2_spill] sm:$0xff] %v9204_v5  ;;  %v4086_v61 = vpop.f32.mrf.mxu1  ;;  %v9209_v29 = vadd.f32 %v4084_v38, %v3892_v54  ;;  %v3894_v13 = vadd.f32 %v3893_v1, %v10371_v18  ;;  %v10375_v38 = vld [vmem:[#allocation25_spill] sm:$0xff] }
 0x26a   : > { %v3895_v11 = vpop.f32.mrf.mxu0 }
 0x26b   : > { %10370 = vst [vmem:[#allocation3_spill] sm:$0xff] %v9209_v29  ;;  %v4088_v0 = vpop.f32.mrf.mxu1  ;;  %v9212_v45 = vadd.f32 %v4086_v61, %v3894_v13  ;;  %v3896_v24 = vadd.f32 %v3895_v11, %v3703_v51  ;;  %v10376_v51 = vld [vmem:[#allocation10_spill] sm:$0xff] }
 0x26c   : > { %v3899_v32 = vpop.f32.mrf.mxu0 }
 0x26d   : > { %10372 = vst [vmem:[#allocation5_spill] sm:$0xff] %v9212_v45  ;;  %v4092_v46 = vpop.f32.mrf.mxu1  ;;  %v9214_v55 = vadd.f32 %v4088_v0, %v3896_v24  ;;  %v3900_v21 = vadd.f32 %v3899_v32, %v10374_v31 }
 0x26e   : > { %v3901_v15 = vpop.f32.mrf.mxu0 }
 0x26f   : > { %10373 = vst [vmem:[#allocation4_spill] sm:$0xff] %v9214_v55  ;;  %v4094_v48 = vpop.f32.mrf.mxu1  ;;  %v4093_v62 = vadd.f32 %v4092_v46, %v3900_v21  ;;  %v10377_v46 = vld [vmem:[#allocation26_spill] sm:$0xff] }
 0x270   : > { %v3903_v10 = vpop.f32.mrf.mxu0 }
 0x271   : > { %v4096_v36 = vpop.f32.mrf.mxu1  ;;  %v3904_v54 = vadd.f32 %v3903_v10, %v10375_v38 }
 0x272   : > { %v3905_v27 = vpop.f32.mrf.mxu0 }
 0x273   : > { %v9218_v1 = vpop.f32.mrf.mxu1  ;;  %v4097_v18 = vadd.f32 %v4096_v36, %v3904_v54 }
 0x274   : > { %v3909_v61 = vpop.f32.mrf.mxu0 }
 0x275   : > { %v4102_v13 = vpop.f32.mrf.mxu1  ;;  %v3910_v11 = vadd.f32 %v3909_v61, %v10376_v51 }
 0x276   : > { %v9221_v29 = vpop.f32.mrf.mxu0 }
 0x277   : > { %v9223_v0 = vpop.f32.mrf.mxu1  ;;  %v4103_v24 = vadd.f32 %v4102_v13, %v3910_v11 }
 0x278   : > { %v3913_v32 = vpop.f32.mrf.mxu0 }
 0x279   : > { %v4106_v31 = vpop.f32.mrf.mxu1  ;;  %v3914_v21 = vadd.f32 %v3913_v32, %v10377_v46 }
 0x27a   : > { %v9226_v55 = vpop.f32.mrf.mxu0 }
 0x27b   : > { %v9228_v10 = vpop.f32.mrf.mxu1  ;;  %v4107_v38 = vadd.f32 %v4106_v31, %v3914_v21 }
 0x27c   : > { %v3919_v17 = vpop.f32.mrf.mxu0 }
 0x27d   : > { %v4112_v36 = vpop.f32.mrf.mxu1  ;;  %v3920_v54 = vadd.f32 %v3919_v17, %v9032_v56 }
 0x27e   : > { %v9231_v33 = vpop.f32.mrf.mxu0 }
 0x27f   : > { %v9233_v61 = vpop.f32.mrf.mxu1  ;;  %v9235_v51 = vadd.f32 %v4112_v36, %v3920_v54 }
 0x280   : > { %v3923_v13 = vpop.f32.mrf.mxu0 }
 0x281   : > { %v4116_v11 = vpop.f32.mrf.mxu1  ;;  %v3924_v43 = vadd.f32 %v3923_v13, %v9042_v41  ;;  %v10378_v13 = vld [vmem:[#allocation18_spill] sm:$0xff] }
 0x282   : > { %v9238_v32 = vpop.f32.mrf.mxu0  ;;  %v3743_v7 = vadd.f32 %v10379_v34, %v10378_v13  ;;  %v10382_v13 = vld [vmem:[#allocation9_spill] sm:$0xff] }
 0x283   : > { %v9240_v46 = vpop.f32.mrf.mxu1  ;;  %v9242_v45 = vadd.f32 %v4116_v11, %v3924_v43 }
 0x284   : > { %v3929_v31 = vpop.f32.mrf.mxu0 }
 0x285   : > { %v4122_v21 = vpop.f32.mrf.mxu1  ;;  %v3930_v56 = vadd.f32 %v3929_v31, %v9048_v42 }
 0x286   : > { %v3931_v17 = vpop.f32.mrf.mxu0 }
 0x287   : > { %v9245_v5 = vpop.f32.mrf.mxu1  ;;  %v9247_v22 = vadd.f32 %v4122_v21, %v3930_v56  ;;  %v9250_v36 = vadd.f32 %v3931_v17, %v9052_v63  ;;  %v10381_v56 = vld [vmem:[#allocation7_spill] sm:$0xff] }
 0x288   : > { %v3933_v54 = vpop.f32.mrf.mxu0  ;;  %v3902_v17 = vadd.f32 %v3901_v15, %v10381_v56 }
 0x289   : > { %v4126_v41 = vpop.f32.mrf.mxu1  ;;  %v3934_v43 = vadd.f32 %v3933_v54, %v10380_v25  ;;  %v10383_v25 = vld [vmem:[#allocation8_spill] sm:$0xff] }
 0x28a   : > { %v3935_v11 = vpop.f32.mrf.mxu0  ;;  %v3713_v54 = vadd.f32 %v10383_v25, %v10382_v13 }
 0x28b   : > { %v4128_v6 = vpop.f32.mrf.mxu1  ;;  %v9255_v9 = vadd.f32 %v4126_v41, %v3934_v43  ;;  %v3936_v42 = vadd.f32 %v3935_v11, %v3743_v7  ;;  %v4095_v11 = vadd.f32 %v4094_v48, %v3902_v17 }
 0x28c   : > { %v4165_v31 = vpop.f32.mrf.mxu0 }
 0x28d   : > { %v4285_v58 = vpop.f32.mrf.mxu1  ;;  %v9257_v53 = vadd.f32 %v4128_v6, %v3936_v42  ;;  %v9260_v21 = vadd.f32 %v4165_v31, %v9064_v44  ;;  %v3906_v44 = vadd.f32 %v3905_v27, %v3713_v54 }
 0x28e   : > { %v9262_v63 = vadd.f32 %v4285_v58, %v4093_v62  ;;  %v4167_v12 = vpop.f32.mrf.mxu0 }
 0x28f   : > { %v4287_v34 = vpop.f32.mrf.mxu1  ;;  %v9268_v41 = vadd.f32 %v4167_v12, %v9068_v60  ;;  %v4099_v12 = vadd.f32 %v9218_v1, %v3906_v44 }
 0x290   : > { %v4169_v7 = vpop.f32.mrf.mxu0  ;;  %v9276_v15 = vadd.f32 %v4287_v34, %v4095_v11 }
 0x291   : > { %10384 = vst [vmem:[#allocation24_spill] sm:$0xff] %v9268_v41  ;;  %v4289_v43 = vpop.f32.mrf.mxu1  ;;  %v9271_v6 = vadd.f32 %v4169_v7, %v9072_v49  ;;  %7248 = vtanh.f32 %v9268_v41 }
 0x292   : > { %v9273_v42 = vadd.f32 %v4289_v43, %v4097_v18  ;;  %v4171_v58 = vpop.f32.mrf.mxu0  ;;  %10385 = vst [vmem:[#allocation6_spill] sm:$0xff] %v9276_v15  ;;  %7250 = vtanh.f32 %v9276_v15 }
 0x293   : > { %v4291_v62 = vpop.f32.mrf.mxu1  ;;  %v9285_v27 = vadd.f32 %v4171_v58, %v9075_v2 }
 0x294   : > { %v4175_v31 = vpop.f32.mrf.mxu0  ;;  %v9288_v18 = vadd.f32 %v4291_v62, %v4099_v12 }
 0x295   : > { %v4295_v56 = vpop.f32.mrf.mxu1  ;;  %v9279_v60 = vadd.f32 %v4175_v31, %v9078_v59  ;;  %10386 = vst [vmem:[#allocation25_spill] sm:$0xff] %v9285_v27  ;;  %7252 = vtanh.f32 %v9285_v27 }
 0x296   : > { %v9282_v13 = vadd.f32 %v4295_v56, %v4103_v24  ;;  %v4177_v49 = vpop.f32.mrf.mxu0  ;;  %10387 = vst [vmem:[#allocation10_spill] sm:$0xff] %v9288_v18  ;;  %v10388_v24 = vld [vmem:[#allocation11_spill] sm:$0xff]  ;;  %7254 = vtanh.f32 %v9288_v18 }
 0x297   : > { %v4297_v48 = vpop.f32.mrf.mxu1  ;;  %v3912_v7 = vadd.f32 %v9221_v29, %v10388_v24  ;;  %v9300_v2 = vadd.f32 %v4177_v49, %v9082_v50 }
 0x298   : > { %v4179_v17 = vpop.f32.mrf.mxu0 }
 0x299   : > { %v4299_v34 = vpop.f32.mrf.mxu1  ;;  %v9291_v25 = vadd.f32 %v4179_v17, %v9086_v47  ;;  %10389 = vst [vmem:[#allocation26_spill] sm:$0xff] %v9300_v2  ;;  %v4105_v62 = vadd.f32 %v9223_v0, %v3912_v7  ;;  %7256 = vtanh.f32 %v9300_v2 }
 0x29a   : > { %v9293_v59 = vadd.f32 %v4299_v34, %v4107_v38  ;;  %v4181_v54 = vpop.f32.mrf.mxu0 }
 0x29b   : > { %v4301_v1 = vpop.f32.mrf.mxu1  ;;  %v9313_v12 = vadd.f32 %v4297_v48, %v4105_v62  ;;  %v9343_v15 = vadd.f32 %v4181_v54, %v9089_v16 }
 0x29c   : > { %v4185_v43 = vpop.f32.mrf.mxu0 }
 0x29d   : > { %v4305_v11 = vpop.f32.mrf.mxu1  ;;  %v9303_v44 = vadd.f32 %v4185_v43, %v9092_v14  ;;  %10390 = vst [vmem:[#allocation18_spill] sm:$0xff] %v9313_v12  ;;  %7258 = vtanh.f32 %v9313_v12  ;;  %10393 = vst [vmem:[#allocation17_spill] sm:$0xff] %v9343_v15 }
 0x29e   : > { %v9306_v47 = vadd.f32 %v4305_v11, %v9235_v51  ;;  %v4187_v38 = vpop.f32.mrf.mxu0  ;;  %v7249_v56 = vpop.eup %7248  ;;  %7260 = vtanh.f32 %v9343_v15 }
 0x29f   : > { %v4307_v58 = vpop.f32.mrf.mxu1  ;;  %4964 = vrot.lane.b32.xlu0 %v7249_v56, %s7641_s28  ;;  %v7251_v34 = vpop.eup %7250 }
 0x2a0   : > { %v4189_v29 = vpop.f32.mrf.mxu0 }
 0x2a1   : > { %v4309_v31 = vpop.f32.mrf.mxu1  ;;  %v9311_v50 = vadd.f32 %v4189_v29, %v9099_v39  ;;  %v10391_v29 = vld [vmem:[#allocation13_spill] sm:$0xff] }
 0x2a2   : > { %v9317_v14 = vadd.f32 %v4309_v31, %v9242_v45  ;;  %v4191_v51 = vpop.f32.mrf.mxu0  ;;  %v7253_v45 = vpop.eup %7252  ;;  %v10392_v31 = vld [vmem:[#allocation12_spill] sm:$0xff] }
 0x2a3   : > { %v4311_v49 = vpop.f32.mrf.mxu1  ;;  %5012 = vrot.lane.b32.xlu0 %v7251_v34, %s7641_s28  ;;  %v7255_v62 = vpop.eup %7254  ;;  %v3723_v56 = vadd.f32 %v10392_v31, %v10391_v29 }
 0x2a4   : > { %v4195_v17 = vpop.f32.mrf.mxu0  ;;  %5014 = vrot.lane.b32.xlu1 %v7255_v62, %s7641_s28 }
 0x2a5   : > { %v4315_v0 = vpop.f32.mrf.mxu1  ;;  %v9320_v24 = vadd.f32 %v4195_v17, %v9105_v30 }
 0x2a6   : > { %v9325_v39 = vadd.f32 %v4315_v0, %v9247_v22  ;;  %v4197_v48 = vpop.f32.mrf.mxu0  ;;  %v3916_v0 = vadd.f32 %v9226_v55, %v3723_v56  ;;  %v7257_v18 = vpop.eup %7256  ;;  %v10398_v56 = vld [vmem:[#allocation16_spill] sm:$0xff] }
 0x2a7   : > { %v9327_v7 = vpop.f32.mrf.mxu1  ;;  %4966 = vrot.lane.b32.xlu0 %v7253_v45, %s7641_s28 }
 0x2a8   : > { %v4199_v43 = vpop.f32.mrf.mxu0  ;;  %4968 = vrot.lane.b32.xlu1 %v7257_v18, %s7641_s28  ;;  %v4109_v45 = vadd.f32 %v9228_v10, %v3916_v0  ;;  %v9363_v18 = vadd.f32 %v4187_v38, %v9096_v3  ;;  %v10399_v3 = vld [vmem:[#allocation15_spill] sm:$0xff] }
 0x2a9   : > { %v4319_v11 = vpop.f32.mrf.mxu1  ;;  %v9332_v30 = vadd.f32 %v4199_v43, %v9111_v57  ;;  %v3733_v38 = vadd.f32 %v10399_v3, %v10398_v56 }
 0x2aa   : > { %v9337_v22 = vadd.f32 %v4319_v11, %v9255_v9  ;;  %v9339_v17 = vpop.f32.mrf.mxu0  ;;  %v9353_v43 = vadd.f32 %v4301_v1, %v4109_v45  ;;  %v10395_v11 = vld [vmem:[#allocation14_spill] sm:$0xff]  ;;  %10396 = vst [vmem:[#allocation7_spill] sm:$0xff] %v9363_v18  ;;  %v9386_v45 = vadd.f32 %v4191_v51, %v9102_v52 }
 0x2ab   : > { %v3922_v16 = vadd.f32 %v9231_v33, %v10395_v11 }
 0x2ac   : > { %v4205_v34 = vpop.f32.mrf.mxu0  ;;  %10394 = vst [vmem:[#allocation27_spill] sm:$0xff] %v9353_v43  ;;  %7262 = vtanh.f32 %v9353_v43  ;;  %10400 = vst [vmem:[#allocation8_spill] sm:$0xff] %v9386_v45  ;;  %v9492_v43 = vpop.permute.xlu1 %4806 }
 0x2ad   : > { %v9346_v29 = vadd.f32 %v4205_v34, %v9117_v19  ;;  %v7259_v19 = vpop.eup %7258  ;;  %7264 = vtanh.f32 %v9363_v18 }
 0x2ae   : > { %v9349_v57 = vpop.f32.mrf.mxu0  ;;  %5016 = vrot.lane.b32.xlu0 %v7259_v19, %s7641_s28 }
 0x2b0   : > { %v4209_v9 = vpop.f32.mrf.mxu0 }
 0x2b1   : > { %v9356_v55 = vadd.f32 %v4209_v9, %v9123_v35  ;;  %v4115_v35 = vadd.f32 %v9233_v61, %v3922_v16  ;;  %v7261_v9 = vpop.eup %7260 }
 0x2b2   : > { %v9360_v54 = vpop.f32.mrf.mxu0  ;;  %4970 = vrot.lane.b32.xlu1 %v7261_v9, %s7641_s28  ;;  %v10404_v9 = vld [vmem:[#allocation20_spill] sm:$0xff] }
 0x2b3   : > { %v9374_v33 = vadd.f32 %v4307_v58, %v4115_v35 }
 0x2b4   : > { %v4215_v10 = vpop.f32.mrf.mxu0 }
 0x2b5   : > { %v9368_v1 = vadd.f32 %v4215_v10, %v9129_v26  ;;  %10397 = vst [vmem:[#allocation9_spill] sm:$0xff] %v9374_v33  ;;  %v3926_v26 = vadd.f32 %v9238_v32, %v3733_v38  ;;  %7266 = vtanh.f32 %v9374_v33 }
 0x2b6   : > { %v9371_v62 = vpop.f32.mrf.mxu0  ;;  %7268 = vtanh.f32 %v9386_v45 }
 0x2b7   : > { %v4119_v16 = vadd.f32 %v9240_v46, %v3926_v26 }
 0x2b8   : > { %v4219_v31 = vpop.f32.mrf.mxu0 }
 0x2b9   : > { %v9379_v0 = vadd.f32 %v4219_v31, %v9135_v37  ;;  %v9396_v32 = vadd.f32 %v4311_v49, %v4119_v16  ;;  %v7263_v52 = vpop.eup %7262  ;;  %v9412_v49 = vadd.f32 %v4197_v48, %v9108_v20 }
 0x2ba   : > { %v9381_v34 = vpop.f32.mrf.mxu0  ;;  %5018 = vrot.lane.b32.xlu1 %v7263_v52, %s7641_s28  ;;  %v7265_v10 = vpop.eup %7264 }
 0x2bb   : > { %10401 = vst [vmem:[#allocation11_spill] sm:$0xff] %v9396_v32  ;;  %7270 = vtanh.f32 %v9396_v32  ;;  %4972 = vrot.lane.b32.xlu0 %v7265_v10, %s7641_s28  ;;  %10402 = vst [vmem:[#allocation13_spill] sm:$0xff] %v9412_v49 }
 0x2bc   : > { %v4225_v61 = vpop.f32.mrf.mxu0  ;;  %7272 = vtanh.f32 %v9412_v49 }
 0x2bd   : > { %v9389_v58 = vadd.f32 %v4225_v61, %v9141_v28 }
 0x2be   : > { %v9391_v11 = vpop.f32.mrf.mxu0 }
 0x2c0   : > { %v4229_v37 = vpop.f32.mrf.mxu0 }
 0x2c1   : > { %v9399_v19 = vadd.f32 %v4229_v37, %v9147_v40 }
 0x2c2   : > { %v9401_v51 = vpop.f32.mrf.mxu0  ;;  %v7267_v31 = vpop.eup %7266 }
 0x2c3   : > { %5020 = vrot.lane.b32.xlu0 %v7267_v31, %s7641_s28  ;;  %v7269_v48 = vpop.eup %7268 }
 0x2c4   : > { %v4235_v28 = vpop.f32.mrf.mxu0  ;;  %4974 = vrot.lane.b32.xlu1 %v7269_v48, %s7641_s28 }
 0x2c5   : > { %v9406_v46 = vadd.f32 %v4235_v28, %v9153_v23  ;;  %v4125_v23 = vadd.f32 %v9245_v5, %v9250_v36  ;;  %v10405_v36 = vld [vmem:[#allocation19_spill] sm:$0xff]  ;;  %v10407_v28 = vld [vmem:[#allocation38_spill] sm:$0xff] }
 0x2c6   : > { %v9409_v35 = vpop.f32.mrf.mxu0  ;;  %v9438_v37 = vadd.f32 %v9339_v17, %v10405_v36  ;;  %v10409_v17 = vld [vmem:[#allocation40_spill] sm:$0xff]  ;;  %v9463_v36 = vpop.permute.xlu0 %4804 }
 0x2c7   : > { %v9424_v26 = vadd.f32 %v9327_v7, %v4125_v23 }
 0x2c8   : > { %v4239_v40 = vpop.f32.mrf.mxu0  ;;  %v7271_v5 = vpop.eup %7270  ;;  %10406 = vst [vmem:[#allocation14_spill] sm:$0xff] %v9438_v37 }
 0x2c9   : > { %v9415_v56 = vadd.f32 %v4239_v40, %v9159_v8  ;;  %10403 = vst [vmem:[#allocation12_spill] sm:$0xff] %v9424_v26  ;;  %7274 = vtanh.f32 %v9424_v26  ;;  %5022 = vrot.lane.b32.xlu1 %v7271_v5, %s7641_s28  ;;  %v10416_v26 = vld [vmem:[#allocation30_spill] sm:$0xff] }
 0x2ca   : > { %v9418_v3 = vpop.f32.mrf.mxu0  ;;  %7276 = vtanh.f32 %v9438_v37  ;;  %v9479_v32 = vpop.permute.xlu0 %4808 }
 0x2cc   : > { %v4245_v38 = vpop.f32.mrf.mxu0 }
 0x2cd   : > { %v9427_v20 = vadd.f32 %v4245_v38, %v9165_v4  ;;  %v4321_v4 = vpop.f32.mrf.mxu1  ;;  %v7273_v38 = vpop.eup %7272 }
 0x2ce   : > { %v9429_v61 = vpop.f32.mrf.mxu0  ;;  %v9448_v40 = vadd.f32 %v4321_v4, %v9257_v53  ;;  %4976 = vrot.lane.b32.xlu0 %v7273_v38, %s7641_s28  ;;  %v10412_v4 = vld [vmem:[#allocation42_spill] sm:$0xff]  ;;  %v10415_v38 = vld [vmem:[#allocation21_spill] sm:$0xff]  ;;  %v9496_v12 = vpop.permute.xlu0 %4812 }
 0x2d0   : > { %v4249_v8 = vpop.f32.mrf.mxu0  ;;  %10408 = vst [vmem:[#allocation16_spill] sm:$0xff] %v9448_v40  ;;  %7278 = vtanh.f32 %v9448_v40 }
 0x2d1   : > { %v9434_v16 = vadd.f32 %v4249_v8, %v10404_v9  ;;  %v10410_v8 = vld [vmem:[#allocation28_spill] sm:$0xff] }
 0x2d2   : > { %v9440_v7 = vpop.f32.mrf.mxu0  ;;  %v9458_v9 = vadd.f32 %v9349_v57, %v10410_v8  ;;  %v9510_v45 = vpop.permute.xlu0 %4816 }
 0x2d4   : > { %v4255_v52 = vpop.f32.mrf.mxu0  ;;  %10411 = vst [vmem:[#allocation15_spill] sm:$0xff] %v9458_v9  ;;  %7280 = vtanh.f32 %v9458_v9 }
 0x2d5   : > { %v9444_v10 = vadd.f32 %v4255_v52, %v10407_v28 }
 0x2d6   : > { %v9450_v31 = vpop.f32.mrf.mxu0  ;;  %v7275_v28 = vpop.eup %7274 }
 0x2d7   : > { %5024 = vrot.lane.b32.xlu0 %v7275_v28, %s7641_s28 }
 0x2d8   : > { %v4259_v23 = vpop.f32.mrf.mxu0 }
 0x2d9   : > { %v9453_v48 = vadd.f32 %v4259_v23, %v10409_v17  ;;  %v10413_v17 = vld [vmem:[#allocation29_spill] sm:$0xff] }
 0x2da   : > { %v9461_v5 = vpop.f32.mrf.mxu0  ;;  %v9473_v40 = vadd.f32 %v9360_v54, %v10413_v17  ;;  %v9487_v54 = vadd.f32 %v9371_v62, %v10416_v26  ;;  %v10418_v17 = vld [vmem:[#allocation2_spill] sm:$0xff]  ;;  %v10420_v62 = vld [vmem:[#allocation31_spill] sm:$0xff] }
 0x2db   : > { %v9505_v26 = vadd.f32 %v9381_v34, %v10420_v62  ;;  %v10424_v34 = vld [vmem:[#allocation33_spill] sm:$0xff]  ;;  %v9525_v62 = vpop.permute.xlu0 %4820 }
 0x2dc   : > { %v4265_v53 = vpop.f32.mrf.mxu0  ;;  %10414 = vst [vmem:[#allocation20_spill] sm:$0xff] %v9473_v40  ;;  %7282 = vtanh.f32 %v9473_v40  ;;  %10417 = vst [vmem:[#allocation19_spill] sm:$0xff] %v9487_v54 }
 0x2dd   : > { %v9466_v52 = vadd.f32 %v4265_v53, %v10412_v4  ;;  %v7277_v53 = vpop.eup %7276  ;;  %7284 = vtanh.f32 %v9487_v54  ;;  %10421 = vst [vmem:[#allocation38_spill] sm:$0xff] %v9505_v26 }
 0x2de   : > { %v9469_v23 = vpop.f32.mrf.mxu0  ;;  %4978 = vrot.lane.b32.xlu1 %v7277_v53, %s7641_s28  ;;  %v10419_v53 = vld [vmem:[#allocation5_spill] sm:$0xff]  ;;  %7286 = vtanh.f32 %v9505_v26 }
 0x2df   : > { %v9535_v26 = vpop.permute.xlu0 %4824 }
 0x2e0   : > { %v4269_v57 = vpop.f32.mrf.mxu0 }
 0x2e1   : > { %v9477_v8 = vadd.f32 %v4269_v57, %v10415_v38  ;;  %v7279_v38 = vpop.eup %7278 }
 0x2e2   : > { %v9481_v33 = vpop.f32.mrf.mxu0  ;;  %5026 = vrot.lane.b32.xlu1 %v7279_v38, %s7641_s28  ;;  %v10422_v38 = vld [vmem:[#allocation32_spill] sm:$0xff] }
 0x2e3   : > { %v9515_v37 = vadd.f32 %v9391_v11, %v10422_v38  ;;  %v10426_v38 = vld [vmem:[#allocation34_spill] sm:$0xff]  ;;  %v9545_v49 = vpop.permute.xlu0 %4828 }
 0x2e4   : > { %v4275_v4 = vpop.f32.mrf.mxu0 }
 0x2e5   : > { %v9490_v28 = vadd.f32 %v4275_v4, %v10418_v17  ;;  %v7281_v4 = vpop.eup %7280  ;;  %v9507_v17 = vpop.permute.xlu1 %4810  ;;  %10423 = vst [vmem:[#allocation40_spill] sm:$0xff] %v9515_v37  ;;  %7288 = vtanh.f32 %v9515_v37 }
 0x2e6   : > { %v9494_v57 = vpop.f32.mrf.mxu0  ;;  %4980 = vrot.lane.b32.xlu0 %v7281_v4, %s7641_s28 }
 0x2e8   : > { %v4279_v40 = vpop.f32.mrf.mxu0 }
 0x2e9   : > { %v9501_v9 = vadd.f32 %v4279_v40, %v10419_v53  ;;  %v7283_v54 = vpop.eup %7282  ;;  %v9518_v40 = vpop.permute.xlu1 %4814  ;;  %v9523_v53 = vadd.f32 %v9401_v51, %v10424_v34  ;;  %v10428_v51 = vld [vmem:[#allocation35_spill] sm:$0xff] }
 0x2ea   : > { %4982 = vrot.lane.b32.xlu1 %v7283_v54, %s7641_s28  ;;  %v7285_v4 = vpop.eup %7284  ;;  %v9533_v54 = vadd.f32 %v9409_v35, %v10426_v38  ;;  %v9541_v34 = vadd.f32 %v9418_v3, %v10428_v51  ;;  %v10430_v35 = vld [vmem:[#allocation36_spill] sm:$0xff]  ;;  %v9556_v3 = vpop.permute.xlu0 %4832  ;;  %v10432_v51 = vld [vmem:[#allocation37_spill] sm:$0xff] }
 0x2eb   : > { %10425 = vst [vmem:[#allocation28_spill] sm:$0xff] %v9523_v53  ;;  %7290 = vtanh.f32 %v9523_v53  ;;  %4984 = vrot.lane.b32.xlu0 %v7285_v4, %s7641_s28  ;;  %v7287_v37 = vpop.eup %7286  ;;  %v9551_v38 = vadd.f32 %v9429_v61, %v10430_v35 }
 0x2ec   : > { %10427 = vst [vmem:[#allocation42_spill] sm:$0xff] %v9533_v54  ;;  %7292 = vtanh.f32 %v9533_v54  ;;  %10429 = vst [vmem:[#allocation29_spill] sm:$0xff] %v9541_v34  ;;  %v9561_v54 = vadd.f32 %v9440_v7, %v10432_v51  ;;  %v10436_v51 = vld [vmem:[#allocation41_spill] sm:$0xff] }
 0x2ed   : > { %v9529_v11 = vpop.permute.xlu1 %4818  ;;  %7294 = vtanh.f32 %v9541_v34  ;;  %10431 = vst [vmem:[#allocation21_spill] sm:$0xff] %v9551_v38 }
 0x2ee   : > { %4986 = vrot.lane.b32.xlu1 %v7287_v37, %s7641_s28  ;;  %7296 = vtanh.f32 %v9551_v38  ;;  %10433 = vst [vmem:[#allocation30_spill] sm:$0xff] %v9561_v54  ;;  %v9567_v61 = vpop.permute.xlu0 %4836  ;;  %v6380_v38 = vmul.f32 -1.442695, %v9260_v21  ;;  %v6382_v21 = vmul.f32 -1.442695, %v9271_v6  ;;  %v10440_v6 = vld [vmem:[#allocation22_spill] sm:$0xff] }
 0x2ef   : > { %7298 = vtanh.f32 %v9561_v54  ;;  %v9580_v54 = vadd.f32 %v9461_v5, %v10436_v51 }
 0x2f1   : > { %v9543_v53 = vpop.permute.xlu1 %4822  ;;  %10437 = vst [vmem:[#allocation5_spill] sm:$0xff] %v9580_v54 }
 0x2f2   : > { %v7289_v4 = vpop.eup %7288 }
 0x2f3   : > { %4988 = vrot.lane.b32.xlu0 %v7289_v4, %s7641_s28  ;;  %v10434_v4 = vld [vmem:[#allocation39_spill] sm:$0xff] }
 0x2f4   : > { %v9571_v35 = vadd.f32 %v9450_v31, %v10434_v4  ;;  %v6428_v31 = vmul.f32 -1.442695, %v9262_v63  ;;  %v6430_v63 = vmul.f32 -1.442695, %v9273_v42  ;;  %v6388_v42 = vmul.f32 -1.442695, %v9303_v44 }
 0x2f5   : > { %v9553_v18 = vpop.permute.xlu1 %4826 }
 0x2f6   : > { %10435 = vst [vmem:[#allocation2_spill] sm:$0xff] %v9571_v35  ;;  %7300 = vtanh.f32 %v9571_v35 }
 0x2f7   : > { %7302 = vpow2.f32 %v6380_v38  ;;  %v6384_v38 = vmul.f32 -1.442695, %v9279_v60  ;;  %v6386_v60 = vmul.f32 -1.442695, %v9291_v25  ;;  %v6434_v25 = vmul.f32 -1.442695, %v9293_v59 }
 0x2f8   : > { %v7291_v37 = vpop.eup %7290  ;;  %7304 = vtanh.f32 %v9580_v54 }
 0x2f9   : > { %4990 = vrot.lane.b32.xlu1 %v7291_v37, %s7641_s28  ;;  %v7293_v34 = vpop.eup %7292  ;;  %v9563_v27 = vpop.permute.xlu1 %4830  ;;  %7306 = vpow2.f32 %v6428_v31 }
 0x2fa   : > { %4992 = vrot.lane.b32.xlu0 %v7293_v34, %s7641_s28  ;;  %v7295_v37 = vpop.eup %7294  ;;  %v9582_v34 = vpop.permute.xlu0 %4840  ;;  %7308 = vpow2.f32 %v6382_v21  ;;  %v10443_v21 = vld [vmem:[#allocation3_spill] sm:$0xff] }
 0x2fb   : > { %v7297_v15 = vpop.eup %7296 }
 0x2fc   : > { %v7299_v5 = vpop.eup %7298 }
 0x2fd   : > { %4994 = vrot.lane.b32.xlu1 %v7295_v37, %s7641_s28  ;;  %v9575_v7 = vpop.permute.xlu1 %4834  ;;  %v10438_v37 = vld [vmem:[#allocation23_spill] sm:$0xff] }
 0x2fe   : > { %4996 = vrot.lane.b32.xlu0 %v7297_v15, %s7641_s28  ;;  %v9592_v35 = vadd.f32 %v9469_v23, %v10438_v37  ;;  %v9594_v51 = vpop.permute.xlu0 %4844  ;;  %v9602_v15 = vadd.f32 %v9481_v33, %v10440_v6  ;;  %v6432_v23 = vmul.f32 -1.442695, %v9282_v13  ;;  %v9615_v13 = vadd.f32 %v9494_v57, %v10443_v21 }
 0x2ff   : > { %v6392_v21 = vmul.f32 -1.442695, %v9320_v24 }
 0x300   : > { %10439 = vst [vmem:[#allocation31_spill] sm:$0xff] %v9592_v35  ;;  %7310 = vtanh.f32 %v9592_v35  ;;  %10441 = vst [vmem:[#allocation32_spill] sm:$0xff] %v9602_v15 }
 0x301   : > { %v9588_v4 = vpop.permute.xlu1 %4838  ;;  %4998 = vrot.lane.b32.xlu1 %v7299_v5, %s7641_s28  ;;  %7312 = vpow2.f32 %v6384_v38  ;;  %10444 = vst [vmem:[#allocation34_spill] sm:$0xff] %v9615_v13 }
 0x302   : > { %7314 = vpow2.f32 %v6430_v63  ;;  %v9607_v31 = vpop.permute.xlu0 %4848  ;;  %v4281_v63 = vpop.f32.mrf.mxu0 }
 0x303   : > { %v7301_v54 = vpop.eup %7300  ;;  %10442 = vst [vmem:[#allocation33_spill] sm:$0xff] %v9607_v31  ;;  %7316 = vtanh.f32 %v9602_v15 }
 0x304   : > { %5000 = vrot.lane.b32.xlu0 %v7301_v54, %s7641_s28  ;;  %7318 = vpow2.f32 %v6432_v23  ;;  %v7303_v33 = vpop.eup %7302  ;;  %v10446_v23 = vld [vmem:[#allocation4_spill] sm:$0xff] }
 0x305   : > { %v9605_v37 = vpop.permute.xlu1 %4842  ;;  %v7305_v5 = vpop.eup %7304  ;;  %7320 = vpow2.f32 %v6386_v60  ;;  %v4516_v54 = vadd.f32 1.0, %v7303_v33  ;;  %v9625_v15 = vadd.f32 %v4281_v63, %v10446_v23  ;;  %v6390_v60 = vmul.f32 -1.442695, %v9311_v50 }
 0x306   : > { %5002 = vrot.lane.b32.xlu1 %v7305_v5, %s7641_s28  ;;  %7322 = vpow2.f32 %v6388_v42  ;;  %v9621_v6 = vpop.permute.xlu0 %4852  ;;  %v7307_v44 = vpop.eup %7306 }
 0x307   : > { %10445 = vst [vmem:[#allocation35_spill] sm:$0xff] %v9621_v6  ;;  %7324 = vtanh.f32 %v9615_v13  ;;  %10447 = vst [vmem:[#allocation36_spill] sm:$0xff] %v9625_v15  ;;  %v7309_v57 = vpop.eup %7308  ;;  %v4564_v42 = vadd.f32 1.0, %v7307_v44 }
 0x308   : > { %7326 = vpow2.f32 %v6434_v25  ;;  %v4518_v13 = vadd.f32 1.0, %v7309_v57 }
 0x309   : > { %v9617_v38 = vpop.permute.xlu1 %4846  ;;  %7328 = vrcp.f32 %v4516_v54 }
 0x30a   : > { %7330 = vtanh.f32 %v9625_v15  ;;  %v6394_v15 = vmul.f32 -1.442695, %v9332_v30 }
 0x30b   : > { %7332 = vpow2.f32 %v6392_v21 }
 0x30c   : > { %7334 = vpow2.f32 %v6390_v60 }
 0x30d   : > { %v7311_v35 = vpop.eup %7310  ;;  %v9629_v5 = vpop.permute.xlu1 %4850  ;;  %7336 = vrcp.f32 %v4564_v42  ;;  %v4766_v42 = vld [vmem:[%s8743_s11 + $0xd0] sm:$0xff] }
 0x30e   : > { %10448 = vst [vmem:[#allocation37_spill] sm:$0xff] %v9629_v5  ;;  %5004 = vrot.lane.b32.xlu0 %v7311_v35, %s7641_s28  ;;  %v7313_v33 = vpop.eup %7312  ;;  %7338 = vrcp.f32 %v4518_v13  ;;  %v4767_v5 = vld [vmem:[%s8743_s11 + $0xd8] sm:$0xff] }
 0x30f   : > { %v7315_v63 = vpop.eup %7314  ;;  %v4520_v25 = vadd.f32 1.0, %v7313_v33 }
 0x310   : > { %v7317_v23 = vpop.eup %7316  ;;  %v4566_v44 = vadd.f32 1.0, %v7315_v63 }
 0x311   : > { %v4965_v59 = vpop.permute.xlu0 %4964  ;;  %v7319_v24 = vpop.eup %7318  ;;  %5006 = vrot.lane.b32.xlu1 %v7317_v23, %s7641_s28  ;;  %7340 = vrcp.f32 %v4520_v25 }
 0x312   : > { %v9634_v50 = vpop.permute.xlu1 %4854  ;;  %v7321_v35 = vpop.eup %7320  ;;  %v4568_v41 = vadd.f32 1.0, %v7319_v24  ;;  %7342 = vrcp.f32 %v4566_v44 }
 0x313   : > { %v7323_v57 = vpop.eup %7322  ;;  %v4522_v60 = vadd.f32 1.0, %v7321_v35 }
 0x314   : > { %v7325_v21 = vpop.eup %7324  ;;  %7344 = vrcp.f32 %v4568_v41  ;;  %v4524_v23 = vadd.f32 1.0, %v7323_v57 }
 0x315   : > { %v5013_v54 = vpop.permute.xlu0 %5012  ;;  %5008 = vrot.lane.b32.xlu0 %v7325_v21, %s7641_s28  ;;  %v7327_v13 = vpop.eup %7326  ;;  %7346 = vpow2.f32 %v6394_v15  ;;  %v6396_v21 = vmul.f32 -1.442695, %v9346_v29  ;;  %v6398_v29 = vmul.f32 -1.442695, %v9356_v55 }
 0x316   : > { %v5015_v2 = vpop.permute.xlu1 %5014  ;;  %v9639_v63 = vpop.eup %7328  ;;  %7348 = vrcp.f32 %v4522_v60  ;;  %v4570_v44 = vadd.f32 1.0, %v7327_v13 }
 0x317   : > { %v7331_v24 = vpop.eup %7330  ;;  %v5060_v30 = vmul.f32 %v9639_v63, %v4965_v59  ;;  %7350 = vrcp.f32 %v4524_v23 }
 0x318   : > { %v7333_v25 = vpop.eup %7332  ;;  %5010 = vrot.lane.b32.xlu1 %v7331_v24, %s7641_s28  ;;  %7352 = vrcp.f32 %v4570_v44 }
 0x319   : > { %v4967_v33 = vpop.permute.xlu0 %4966  ;;  %4856 = vrot.lane.b32.xlu0 %v4766_v42, %s7640_s12  ;;  %v7335_v35 = vpop.eup %7334  ;;  %v4528_v6 = vadd.f32 1.0, %v7333_v25  ;;  %7354 = vpow2.f32 %v6396_v21  ;;  %v6400_v25 = vmul.f32 -1.442695, %v9368_v1 }
 0x31a   : > { %v4969_v41 = vpop.permute.xlu1 %4968  ;;  %v9646_v57 = vpop.eup %7336  ;;  %v4526_v60 = vadd.f32 1.0, %v7335_v35 }
 0x31b   : > { %10449 = vst [vmem:[#allocation39_spill] sm:$0xff] %v9646_v57  ;;  %v9648_v31 = vpop.eup %7338  ;;  %v5084_v59 = vmul.f32 %v9646_v57, %v5013_v54  ;;  %7356 = vrcp.f32 %v4528_v6 }
 0x31c   : > { %4858 = vrot.lane.b32.xlu1 %v4767_v5, %s7640_s12  ;;  %v5061_v42 = vmul.f32 %v9648_v31, %v4967_v33  ;;  %7358 = vrcp.f32 %v4526_v60 }
 0x31d   : > { %5124 = vrot.lane.b32.xlu0 %v5060_v30, %s7640_s12  ;;  %7360 = vpow2.f32 %v6398_v29 }
 0x31e   : > { %v9655_v13 = vpop.eup %7340  ;;  %7362 = vpow2.f32 %v6400_v25 }
 0x31f   : > { %v5062_v24 = vmul.f32 %v9655_v13, %v4969_v41  ;;  %v9659_v30 = vpop.eup %7342 }
 0x320   : > { %v5017_v15 = vpop.permute.xlu0 %5016  ;;  %10450 = vst [vmem:[#allocation41_spill] sm:$0xff] %v9659_v30  ;;  %5126 = vrot.lane.b32.xlu1 %v5061_v42, %s7640_s12  ;;  %v5085_v55 = vmul.f32 %v9659_v30, %v5015_v2 }
 0x321   : > { %5172 = vrot.lane.b32.xlu0 %v5084_v59, %s7640_s12  ;;  %v9662_v5 = vpop.eup %7344 }
 0x322   : > { %v7347_v33 = vpop.eup %7346  ;;  %v5086_v6 = vmul.f32 %v9662_v5, %v5017_v15  ;;  %v6402_v15 = vmul.f32 -1.442695, %v9379_v0  ;;  %v6404_v0 = vmul.f32 -1.442695, %v9389_v58 }
 0x323   : > { %v9669_v41 = vpop.eup %7348  ;;  %v4530_v35 = vadd.f32 1.0, %v7347_v33 }
 0x324   : > { %v4971_v23 = vpop.permute.xlu1 %4970  ;;  %5174 = vrot.lane.b32.xlu1 %v5085_v55, %s7640_s12  ;;  %v9671_v21 = vpop.eup %7350 }
 0x325   : > { %5128 = vrot.lane.b32.xlu0 %v5062_v24, %s7640_s12  ;;  %v5063_v59 = vmul.f32 %v9669_v41, %v4971_v23  ;;  %v9679_v1 = vpop.eup %7352  ;;  %7364 = vrcp.f32 %v4530_v35 }
 0x326   : > { %v7355_v42 = vpop.eup %7354  ;;  %7366 = vpow2.f32 %v6402_v15 }
 0x328   : > { %5130 = vrot.lane.b32.xlu1 %v5063_v59, %s7640_s12  ;;  %v9684_v23 = vpop.eup %7356 }
 0x329   : > { %5176 = vrot.lane.b32.xlu0 %v5086_v6, %s7640_s12  ;;  %v9687_v55 = vpop.eup %7358 }
 0x32a   : > { %v7361_v6 = vpop.eup %7360 }
 0x32b   : > { %v4534_v59 = vadd.f32 1.0, %v7361_v6  ;;  %v6410_v6 = vmul.f32 -1.442695, %v9415_v56 }
 0x32c   : > { %v5019_v44 = vpop.permute.xlu1 %5018 }
 0x32d   : > { %v4973_v54 = vpop.permute.xlu0 %4972  ;;  %v5087_v29 = vmul.f32 %v9679_v1, %v5019_v44 }
 0x32e   : > { %v5064_v2 = vmul.f32 %v9671_v21, %v4973_v54  ;;  %v4532_v54 = vadd.f32 1.0, %v7355_v42  ;;  %v7363_v42 = vpop.eup %7362 }
 0x32f   : > { %5178 = vrot.lane.b32.xlu1 %v5087_v29, %s7640_s12  ;;  %v4536_v58 = vadd.f32 1.0, %v7363_v42 }
 0x330   : > { %5132 = vrot.lane.b32.xlu0 %v5064_v2, %s7640_s12  ;;  %7368 = vrcp.f32 %v4532_v54  ;;  %v6406_v2 = vmul.f32 -1.442695, %v9399_v19 }
 0x331   : > { %7370 = vpow2.f32 %v6404_v0 }
 0x332   : > { %7372 = vrcp.f32 %v4534_v59  ;;  %v9697_v15 = vpop.eup %7364 }
 0x333   : > { %7374 = vpow2.f32 %v6406_v2  ;;  %v7367_v54 = vpop.eup %7366 }
 0x334   : > { %7376 = vrcp.f32 %v4536_v58  ;;  %v4538_v19 = vadd.f32 1.0, %v7367_v54  ;;  %v6414_v54 = vmul.f32 -1.442695, %v9434_v16 }
 0x335   : > { %v9674_v60 = vpop.permute.xlu0 %5020 }
 0x336   : > { %v4975_v24 = vpop.permute.xlu1 %4974 }
 0x337   : > { %v5065_v35 = vmul.f32 %v9687_v55, %v4975_v24 }
 0x339   : > { %5134 = vrot.lane.b32.xlu1 %v5065_v35, %s7640_s12 }
 0x33b   : > { %v9693_v44 = vpop.permute.xlu1 %5022 }
 0x33d   : > { %v9707_v35 = vpop.eup %7368 }
 0x33e   : > { %v7371_v2 = vpop.eup %7370 }
 0x33f   : > { %v4540_v58 = vadd.f32 1.0, %v7371_v2  ;;  %v6416_v2 = vmul.f32 -1.442695, %v9444_v10 }
 0x340   : > { %v4977_v33 = vpop.permute.xlu0 %4976 }
 0x341   : > { %v5066_v25 = vmul.f32 %v9684_v23, %v4977_v33  ;;  %v6408_v33 = vmul.f32 -1.442695, %v9406_v46  ;;  %v6412_v46 = vmul.f32 -1.442695, %v9427_v20 }
 0x343   : > { %5136 = vrot.lane.b32.xlu0 %v5066_v25, %s7640_s12  ;;  %7378 = vpow2.f32 %v6408_v33 }
 0x344   : > { %7380 = vpow2.f32 %v6410_v6 }
 0x345   : > { %7382 = vrcp.f32 %v4538_v19 }
 0x346   : > { %7384 = vpow2.f32 %v6412_v46 }
 0x347   : > { %7386 = vrcp.f32 %v4540_v58 }
 0x348   : > { %7388 = vpow2.f32 %v6414_v54 }
 0x349   : > { %v9701_v25 = vpop.permute.xlu0 %5024 }
 0x350   : > { %v4979_v29 = vpop.permute.xlu1 %4978 }
 0x351   : > { %v5067_v24 = vmul.f32 %v9697_v15, %v4979_v29  ;;  %v9712_v29 = vpop.eup %7372 }
 0x352   : > { %v7375_v56 = vpop.eup %7374 }
 0x353   : > { %5138 = vrot.lane.b32.xlu1 %v5067_v24, %s7640_s12  ;;  %v4542_v57 = vadd.f32 1.0, %v7375_v56  ;;  %v9717_v6 = vpop.eup %7376 }
 0x354   : > { %v9705_v0 = vpop.permute.xlu1 %5026  ;;  %v7379_v19 = vpop.eup %7378 }
 0x355   : > { %7390 = vrcp.f32 %v4542_v57  ;;  %v4544_v30 = vadd.f32 1.0, %v7379_v19 }
 0x356   : > { %7392 = vpow2.f32 %v6416_v2 }
 0x357   : > { %7394 = vrcp.f32 %v4544_v30 }
 0x358   : > { %v4981_v59 = vpop.permute.xlu0 %4980 }
 0x359   : > { %v5068_v42 = vmul.f32 %v9707_v35, %v4981_v59 }
 0x35b   : > { %5140 = vrot.lane.b32.xlu0 %v5068_v42, %s7640_s12  ;;  %v7381_v42 = vpop.eup %7380 }
 0x35c   : > { %v4983_v24 = vpop.permute.xlu1 %4982  ;;  %v9722_v46 = vpop.eup %7382  ;;  %v4546_v58 = vadd.f32 1.0, %v7381_v42 }
 0x35d   : > { %v5069_v33 = vmul.f32 %v9712_v29, %v4983_v24  ;;  %v4985_v20 = vpop.permute.xlu0 %4984  ;;  %v6418_v24 = vmul.f32 -1.442695, %v9453_v48  ;;  %v7385_v57 = vpop.eup %7384 }
 0x35e   : > { %v5070_v59 = vmul.f32 %v9717_v6, %v4985_v20  ;;  %7396 = vrcp.f32 %v4546_v58  ;;  %v4548_v19 = vadd.f32 1.0, %v7385_v57 }
 0x35f   : > { %5142 = vrot.lane.b32.xlu1 %v5069_v33, %s7640_s12  ;;  %v9727_v33 = vpop.eup %7386  ;;  %7398 = vpow2.f32 %v6418_v24 }
 0x360   : > { %5144 = vrot.lane.b32.xlu0 %v5070_v59, %s7640_s12  ;;  %v4987_v16 = vpop.permute.xlu1 %4986  ;;  %v7389_v20 = vpop.eup %7388  ;;  %v6420_v59 = vmul.f32 -1.442695, %v9466_v52  ;;  %7400 = vrcp.f32 %v4548_v19 }
 0x361   : > { %v5071_v56 = vmul.f32 %v9722_v46, %v4987_v16  ;;  %v4550_v42 = vadd.f32 1.0, %v7389_v20  ;;  %v6422_v16 = vmul.f32 -1.442695, %v9477_v8 }
 0x362   : > { %v9732_v2 = vpop.eup %7390  ;;  %7402 = vpow2.f32 %v6420_v59 }
 0x363   : > { %5146 = vrot.lane.b32.xlu1 %v5071_v56, %s7640_s12  ;;  %v7393_v58 = vpop.eup %7392  ;;  %7404 = vrcp.f32 %v4550_v42 }
 0x364   : > { %v9737_v56 = vpop.eup %7394  ;;  %7406 = vpow2.f32 %v6422_v16  ;;  %v4552_v57 = vadd.f32 1.0, %v7393_v58 }
 0x365   : > { %v4989_v10 = vpop.permute.xlu0 %4988 }
 0x366   : > { %v5072_v54 = vmul.f32 %v9727_v33, %v4989_v10  ;;  %7408 = vrcp.f32 %v4552_v57 }
 0x368   : > { %5148 = vrot.lane.b32.xlu0 %v5072_v54, %s7640_s12  ;;  %v6424_v54 = vmul.f32 -1.442695, %v9490_v28 }
 0x36a   : > { %7410 = vpow2.f32 %v6424_v54  ;;  %v6436_v54 = vmul.f32 -1.442695, %v9306_v47 }
 0x36b   : > { %v4991_v30 = vpop.permute.xlu1 %4990  ;;  %v9740_v10 = vpop.eup %7396 }
 0x36c   : > { %v5073_v48 = vmul.f32 %v9732_v2, %v4991_v30  ;;  %v4993_v24 = vpop.permute.xlu0 %4992  ;;  %v7399_v19 = vpop.eup %7398  ;;  %v6426_v30 = vmul.f32 -1.442695, %v9501_v9 }
 0x36d   : > { %v5074_v52 = vmul.f32 %v9737_v56, %v4993_v24  ;;  %v4554_v59 = vadd.f32 1.0, %v7399_v19 }
 0x36e   : > { %5150 = vrot.lane.b32.xlu1 %v5073_v48, %s7640_s12  ;;  %v9747_v48 = vpop.eup %7400 }
 0x36f   : > { %5152 = vrot.lane.b32.xlu0 %v5074_v52, %s7640_s12  ;;  %v4995_v20 = vpop.permute.xlu1 %4994  ;;  %v7403_v42 = vpop.eup %7402  ;;  %7412 = vrcp.f32 %v4554_v59 }
 0x370   : > { %v5075_v8 = vmul.f32 %v9740_v10, %v4995_v20  ;;  %v4997_v16 = vpop.permute.xlu0 %4996  ;;  %7414 = vpow2.f32 %v6426_v30  ;;  %v9750_v58 = vpop.eup %7404  ;;  %v4556_v24 = vadd.f32 1.0, %v7403_v42  ;;  %v6438_v30 = vmul.f32 -1.442695, %v9317_v14 }
 0x371   : > { %v5076_v28 = vmul.f32 %v9747_v48, %v4997_v16  ;;  %v7407_v52 = vpop.eup %7406 }
 0x372   : > { %5154 = vrot.lane.b32.xlu1 %v5075_v8, %s7640_s12  ;;  %7416 = vrcp.f32 %v4556_v24  ;;  %v4558_v9 = vadd.f32 1.0, %v7407_v52  ;;  %v6440_v8 = vmul.f32 -1.442695, %v9325_v39  ;;  %v6442_v24 = vmul.f32 -1.442695, %v9337_v22 }
 0x373   : > { %5156 = vrot.lane.b32.xlu0 %v5076_v28, %s7640_s12  ;;  %v4999_v57 = vpop.permute.xlu1 %4998  ;;  %v9756_v20 = vpop.eup %7408  ;;  %7418 = vpow2.f32 %v6436_v54 }
 0x374   : > { %v5077_v19 = vmul.f32 %v9750_v58, %v4999_v57  ;;  %7420 = vrcp.f32 %v4558_v9 }
 0x375   : > { %7422 = vpow2.f32 %v6440_v8 }
 0x376   : > { %5158 = vrot.lane.b32.xlu1 %v5077_v19, %s7640_s12  ;;  %v5001_v42 = vpop.permute.xlu0 %5000  ;;  %7424 = vpow2.f32 %v6438_v30 }
 0x377   : > { %v7411_v59 = vpop.eup %7410  ;;  %v5078_v16 = vmul.f32 %v9756_v20, %v5001_v42 }
 0x378   : > { %v4560_v47 = vadd.f32 1.0, %v7411_v59  ;;  %v5003_v52 = vpop.permute.xlu1 %5002 }
 0x379   : > { %5160 = vrot.lane.b32.xlu0 %v5078_v16, %s7640_s12 }
 0x37a   : > { %7426 = vrcp.f32 %v4560_v47 }
 0x37b   : > { %7428 = vpow2.f32 %v6442_v24 }
 0x37c   : > { %v9762_v28 = vpop.eup %7412 }
 0x37d   : > { %v7415_v57 = vpop.eup %7414  ;;  %v5079_v39 = vmul.f32 %v9762_v28, %v5003_v52 }
 0x37e   : > { %v4562_v14 = vadd.f32 1.0, %v7415_v57 }
 0x37f   : > { %5162 = vrot.lane.b32.xlu1 %v5079_v39, %s7640_s12  ;;  %v9767_v54 = vpop.eup %7416 }
 0x380   : > { %v5005_v19 = vpop.permute.xlu0 %5004  ;;  %v7419_v8 = vpop.eup %7418  ;;  %7430 = vrcp.f32 %v4562_v14 }
 0x381   : > { %v5080_v9 = vmul.f32 %v9767_v54, %v5005_v19  ;;  %v9771_v59 = vpop.eup %7420  ;;  %v4572_v30 = vadd.f32 1.0, %v7419_v8 }
 0x382   : > { %v7423_v16 = vpop.eup %7422 }
 0x383   : > { %5164 = vrot.lane.b32.xlu0 %v5080_v9, %s7640_s12  ;;  %v5007_v22 = vpop.permute.xlu1 %5006  ;;  %v7425_v47 = vpop.eup %7424  ;;  %7432 = vrcp.f32 %v4572_v30  ;;  %v4576_v24 = vadd.f32 1.0, %v7423_v16 }
 0x384   : > { %v5081_v42 = vmul.f32 %v9771_v59, %v5007_v22  ;;  %v4574_v57 = vadd.f32 1.0, %v7425_v47  ;;  %v4768_v22 = vld [vmem:[%s8743_s11 + $0xe0] sm:$0xff]  ;;  %v4770_v47 = vld [vmem:[%s8743_s11 + $0xf0] sm:$0xff] }
 0x385   : > { %7434 = vrcp.f32 %v4576_v24 }
 0x386   : > { %5166 = vrot.lane.b32.xlu1 %v5081_v42, %s7640_s12  ;;  %7436 = vrcp.f32 %v4574_v57 }
 0x387   : > { %v9775_v52 = vpop.eup %7426  ;;  %v5009_v39 = vpop.permute.xlu0 %5008 }
 0x388   : > { %10451 = vst [vmem:[#allocation23_spill] sm:$0xff] %v9775_v52  ;;  %v7429_v14 = vpop.eup %7428  ;;  %v5082_v19 = vmul.f32 %v9775_v52, %v5009_v39  ;;  %v4769_v52 = vld [vmem:[%s8743_s11 + $0xe8] sm:$0xff] }
 0x389   : > { %v4578_v9 = vadd.f32 1.0, %v7429_v14 }
 0x38a   : > { %5168 = vrot.lane.b32.xlu0 %v5082_v19, %s7640_s12  ;;  %v5011_v30 = vpop.permute.xlu1 %5010 }
 0x38b   : > { %v4857_v8 = vpop.permute.xlu0 %4856  ;;  %7438 = vrcp.f32 %v4578_v9  ;;  %v4901_v9 = vmul.f32 %v9648_v31, %v9492_v43 }
 0x38d   : > { %v9780_v42 = vpop.eup %7430 }
 0x38e   : > { %10452 = vst [vmem:[#allocation22_spill] sm:$0xff] %v9780_v42  ;;  %v5083_v16 = vmul.f32 %v9780_v42, %v5011_v30  ;;  %4860 = vrot.lane.b32.xlu0 %v4768_v22, %s7640_s12  ;;  %v4859_v24 = vpop.permute.xlu1 %4858  ;;  %v4771_v30 = vld [vmem:[%s8743_s11 + $0xf8] sm:$0xff] }
 0x38f   : > { %v5125_v39 = vpop.permute.xlu0 %5124 }
 0x390   : > { %5170 = vrot.lane.b32.xlu1 %v5083_v16, %s7640_s12  ;;  %v9788_v57 = vpop.eup %7432  ;;  %v4900_v16 = vmul.f32 %v9639_v63, %v9463_v36  ;;  %v4926_v36 = vmul.f32 %v9662_v5, %v4857_v8 }
 0x391   : > { %10453 = vst [vmem:[#allocation3_spill] sm:$0xff] %v9788_v57  ;;  %v5088_v19 = vmul.f32 %v9788_v57, %v9674_v60 }
 0x392   : > { %4864 = vrot.lane.b32.xlu0 %v4770_v47, %s7640_s12  ;;  %v5127_v22 = vpop.permute.xlu1 %5126  ;;  %v9803_v42 = vpop.eup %7434  ;;  %v9810_v57 = vadd.f32 %v5125_v39, %v4900_v16 }
 0x393   : > { %v9791_v14 = vpop.permute.xlu0 %5172  ;;  %v9801_v47 = vadd.f32 %v5127_v22, %v4901_v9  ;;  %v5090_v60 = vmul.f32 %v9803_v42, %v9701_v25  ;;  %v4902_v25 = vmul.f32 %v9655_v13, %v9479_v32  ;;  %v7245_v32 = vld [vmem:[%s10240_s4 + $0x10] sm:$0xff]  }
 0x394   : > { %4862 = vrot.lane.b32.xlu1 %v4769_v52, %s7640_s12  ;;  %10454 = vst [vmem:[#allocation4_spill] sm:$0xff] %v9791_v14  ;;  %v9806_v14 = vpop.eup %7436 }
 0x395   : > { %v5089_v31 = vmul.f32 %v9806_v14, %v9693_v44  ;;  %v5252_v63 = vpack.c.bf16 %v9801_v47, %v9810_v57  ;;  %v4903_v44 = vmul.f32 %v9669_v41, %v9507_v17  ;;  %v4927_v17 = vmul.f32 %v9679_v1, %v4859_v24 }
 0x396   : > { %5180 = vrot.lane.b32.xlu0 %v5088_v19, %s7640_s12  ;;  %v9812_v43 = vpop.permute.xlu1 %5174  ;;  %v7244_v19 = vld [vmem:[%s10240_s4 + $0x18] sm:$0xff]   ;;  %v4905_v1 = vmul.f32 %v9687_v55, %v9518_v40  ;;  %v4906_v40 = vmul.f32 %v9684_v23, %v9510_v45  ;;  %v4909_v45 = vmul.f32 %v9712_v29, %v9543_v53 }
 0x397   : > { %v5129_v52 = vpop.permute.xlu0 %5128  ;;  %6489 = vmatprep.subr.bf16.mxu1 %v7244_v19 }
 0x398   : > { %4866 = vrot.lane.b32.xlu1 %v4771_v30, %s7640_s12  ;;  %v9828_v30 = vpop.eup %7438  ;;  %v9834_v22 = vadd.f32 %v5129_v52, %v4902_v25  ;;  %6490 = vmatpush3.bf16.msra.mxu1 %v7244_v19  ;;  %v7247_v19 = vld [vmem:[%s10240_s4] sm:$0xff]  }
 0x399   : > { %v5091_v9 = vmul.f32 %v9828_v30, %v9705_v0  ;;  %6491 = vmatprep.subr.bf16.mxu1 %v7245_v32 }
 0x39a   : > { %5184 = vrot.lane.b32.xlu0 %v5090_v60, %s7640_s12  ;;  %v5131_v8 = vpop.permute.xlu1 %5130  ;;  %v7246_v60 = vld [vmem:[%s10240_s4 + $0x8] sm:$0xff]  }
 0x39b   : > { %v5177_v39 = vpop.permute.xlu0 %5176  ;;  %v9836_v16 = vadd.f32 %v5131_v8, %v4903_v44 }
 0x39c   : > { %5182 = vrot.lane.b32.xlu1 %v5089_v31, %s7640_s12  ;;  %v9830_v5 = vadd.f32 %v5177_v39, %v4926_v36  ;;  %6492 = vmatpush3.bf16.msra.mxu1 %v7245_v32  ;;  %v4904_v31 = vmul.f32 %v9671_v21, %v9496_v12  ;;  %v4907_v21 = vmul.f32 %v9697_v15, %v9529_v11 }
 0x39d   : > { %v5253_v13 = vpack.c.bf16 %v9836_v16, %v9834_v22  ;;  %6493 = vmatprep.subr.bf16.mxu1 %v7246_v60  ;;  %v4908_v32 = vmul.f32 %v9707_v35, %v9525_v62  ;;  %v4911_v62 = vmul.f32 %v9722_v46, %v9553_v18 }
 0x39e   : > { %5299 = vrot.lane.b32.xlu0 %v5252_v63, %s7640_s12 }
 0x3a0   : > { %5186 = vrot.lane.b32.xlu1 %v5091_v9, %s7640_s12  ;;  %6494 = vmatpush3.bf16.msra.mxu1 %v7246_v60 }
 0x3a1   : > { %v5179_v41 = vpop.permute.xlu1 %5178  ;;  %6495 = vmatprep.subr.bf16.mxu1 %v7247_v19 }
 0x3a2   : > { %v9846_v0 = vadd.f32 %v5179_v41, %v4927_v17  ;;  %v5133_v52 = vpop.permute.xlu0 %5132  ;;  %v4910_v41 = vmul.f32 %v9717_v6, %v9535_v26  ;;  %v4913_v26 = vmul.f32 %v9732_v2, %v9563_v27 }
 0x3a3   : > { %v9856_v36 = vadd.f32 %v5133_v52, %v4904_v31  ;;  %v4912_v31 = vmul.f32 %v9727_v33, %v9545_v49  ;;  %v4915_v49 = vmul.f32 %v9740_v10, %v9575_v7 }
 0x3a4   : > { %5301 = vrot.lane.b32.xlu1 %v5253_v13, %s7640_s12  ;;  %6496 = vmatpush3.bf16.msra.mxu1 %v7247_v19  ;;  %v4914_v19 = vmul.f32 %v9737_v56, %v9556_v3  ;;  %v4917_v3 = vmul.f32 %v9750_v58, %v9588_v4 }
 0x3ab   : > { %v5135_v24 = vpop.permute.xlu1 %5134 }
 0x3ac   : > { %v9858_v63 = vadd.f32 %v5135_v24, %v4905_v1 }
 0x3ae   : > { %v5254_v25 = vpack.c.bf16 %v9858_v63, %v9856_v36 }
 0x3b0   : > { %5303 = vrot.lane.b32.xlu0 %v5254_v25, %s7640_s12 }
 0x3b5   : > { %v5137_v12 = vpop.permute.xlu0 %5136 }
 0x3b6   : > { %v9870_v39 = vadd.f32 %v5137_v12, %v4906_v40  ;;  %v4916_v40 = vmul.f32 %v9747_v48, %v9567_v61  ;;  %v4919_v61 = vmul.f32 %v9762_v28, %v9605_v37  ;;  %v10455_v37 = vld [vmem:[#allocation41_spill] sm:$0xff] }
 0x3b7   : > { %v4925_v28 = vmul.f32 %v10455_v37, %v9634_v50 }
 0x3c5   : > { %v5139_v55 = vpop.permute.xlu1 %5138 }
 0x3c6   : > { %v9872_v44 = vadd.f32 %v5139_v55, %v4907_v21 }
 0x3c8   : > { %v5255_v8 = vpack.c.bf16 %v9872_v44, %v9870_v39 }
 0x3ca   : > { %5305 = vrot.lane.b32.xlu1 %v5255_v8, %s7640_s12  ;;  %v4918_v8 = vmul.f32 %v9756_v20, %v9582_v34  ;;  %v4921_v34 = vmul.f32 %v9771_v59, %v9617_v38  ;;  %v10459_v59 = vld [vmem:[#allocation33_spill] sm:$0xff] }
 0x3cd   : > { %v5141_v9 = vpop.permute.xlu0 %5140 }
 0x3ce   : > { %v9881_v17 = vadd.f32 %v5141_v9, %v4908_v32 }
 0x3d1   : > { %v5143_v23 = vpop.permute.xlu1 %5142 }
 0x3d2   : > { %v9883_v11 = vadd.f32 %v5143_v23, %v4909_v45  ;;  %v5145_v13 = vpop.permute.xlu0 %5144  ;;  %v4920_v45 = vmul.f32 %v9767_v54, %v9594_v51  ;;  %v10458_v54 = vld [vmem:[#allocation4_spill] sm:$0xff] }
 0x3d3   : > { %v9892_v52 = vadd.f32 %v5145_v13, %v4910_v41  ;;  %v10456_v13 = vld [vmem:[#allocation35_spill] sm:$0xff] }
 0x3d4   : > { %v5256_v15 = vpack.c.bf16 %v9883_v11, %v9881_v17  ;;  %v10457_v41 = vld [vmem:[#allocation39_spill] sm:$0xff] }
 0x3d5   : > { %v5147_v35 = vpop.permute.xlu1 %5146 }
 0x3d6   : > { %5307 = vrot.lane.b32.xlu0 %v5256_v15, %s7640_s12  ;;  %v9894_v53 = vadd.f32 %v5147_v35, %v4911_v62  ;;  %v4924_v62 = vmul.f32 %v10457_v41, %v10456_v13  ;;  %v9956_v35 = vadd.f32 %v9812_v43, %v4925_v28  ;;  %v10462_v43 = vld [vmem:[#allocation22_spill] sm:$0xff] }
 0x3d8   : > { %v5257_v29 = vpack.c.bf16 %v9894_v53, %v9892_v52 }
 0x3da   : > { %5309 = vrot.lane.b32.xlu1 %v5257_v29, %s7640_s12  ;;  %v5149_v60 = vpop.permute.xlu0 %5148  ;;  %v9961_v29 = vadd.f32 %v10458_v54, %v4924_v62 }
 0x3db   : > { %v9903_v1 = vadd.f32 %v5149_v60, %v4912_v31  ;;  %v10460_v60 = vld [vmem:[#allocation23_spill] sm:$0xff] }
 0x3dc   : > { %v5264_v50 = vpack.c.bf16 %v9956_v35, %v9961_v29  ;;  %v4922_v31 = vmul.f32 %v10460_v60, %v10459_v59  ;;  %v10066_v60 = vld [vmem:[%s10241_s5] ss:$0 sm:$0xff] }
 0x3e0   : > { %v5151_v6 = vpop.permute.xlu1 %5150 }
 0x3e1   : > { %v9905_v18 = vadd.f32 %v5151_v6, %v4913_v26  ;;  %v5153_v24 = vpop.permute.xlu0 %5152  ;;  %v10461_v26 = vld [vmem:[#allocation37_spill] sm:$0xff] }
 0x3e2   : > { %v9914_v25 = vadd.f32 %v5153_v24, %v4914_v19  ;;  %v4923_v6 = vmul.f32 %v10462_v43, %v10461_v26 }
 0x3e3   : > { %v5258_v46 = vpack.c.bf16 %v9905_v18, %v9903_v1 }
 0x3e4   : > { %v5155_v33 = vpop.permute.xlu1 %5154 }
 0x3e5   : > { %5311 = vrot.lane.b32.xlu0 %v5258_v46, %s7640_s12  ;;  %v9916_v27 = vadd.f32 %v5155_v33, %v4915_v49  ;;  %v5157_v12 = vpop.permute.xlu0 %5156 }
 0x3e6   : > { %v9925_v21 = vadd.f32 %v5157_v12, %v4916_v40  ;;  %v5265_v40 = vpack.c.bf16 %v9846_v0, %v9830_v5 }
 0x3e7   : > { %v5259_v2 = vpack.c.bf16 %v9916_v27, %v9914_v25 }
 0x3e8   : > { %v5159_v56 = vpop.permute.xlu1 %5158 }
 0x3e9   : > { %5313 = vrot.lane.b32.xlu1 %v5259_v2, %s7640_s12  ;;  %v9927_v7 = vadd.f32 %v5159_v56, %v4917_v3 }
 0x3eb   : > { %v5260_v10 = vpack.c.bf16 %v9927_v7, %v9925_v21  ;;  %v5161_v55 = vpop.permute.xlu0 %5160 }
 0x3ec   : > { %v9936_v9 = vadd.f32 %v5161_v55, %v4918_v8 }
 0x3ed   : > { %5315 = vrot.lane.b32.xlu0 %v5260_v10, %s7640_s12  ;;  %v10463_v10 = vld [vmem:[#allocation3_spill] sm:$0xff] }
 0x3f1   : > { %v5163_v48 = vpop.permute.xlu1 %5162 }
 0x3f2   : > { %v9938_v4 = vadd.f32 %v5163_v48, %v4919_v61 }
 0x3f4   : > { %v5261_v58 = vpack.c.bf16 %v9938_v4, %v9936_v9 }
 0x3f5   : > { %v5165_v32 = vpop.permute.xlu0 %5164 }
 0x3f6   : > { %5317 = vrot.lane.b32.xlu1 %v5261_v58, %s7640_s12  ;;  %v9949_v23 = vadd.f32 %v5165_v32, %v4920_v45 }
 0x3f8   : > { %v5167_v20 = vpop.permute.xlu1 %5166 }
 0x3f9   : > { %v9951_v15 = vadd.f32 %v5167_v20, %v4921_v34 }
 0x3fb   : > { %v5262_v51 = vpack.c.bf16 %v9951_v15, %v9949_v23 }
 0x3fc   : > { %v5169_v38 = vpop.permute.xlu0 %5168 }
 0x3fd   : > { %5319 = vrot.lane.b32.xlu0 %v5262_v51, %s7640_s12  ;;  %v5242_v19 = vadd.f32 %v5169_v38, %v4922_v31  ;;  %v10470_v51 = vld [vmem:[#allocation14_spill] sm:$0xff] }
 0x3fe   : > { %v6395_v54 = vmul.f32 -1.442695, %v10470_v51 }
 0x400   : > { %v4861_v46 = vpop.permute.xlu0 %4860 }
 0x401   : > { %5323 = vrot.lane.b32.xlu0 %v5264_v50, %s7640_s12  ;;  %v4928_v55 = vmul.f32 %v10463_v10, %v4861_v46  ;;  %v10471_v50 = vld [vmem:[#allocation8_spill] sm:$0xff] }
 0x402   : > { %v5171_v24 = vpop.permute.xlu1 %5170  ;;  %v6391_v59 = vmul.f32 -1.442695, %v10471_v50 }
 0x403   : > { %v5243_v49 = vadd.f32 %v5171_v24, %v4923_v6 }
 0x404   : > { %v4865_v2 = vpop.permute.xlu0 %4864 }
 0x405   : > { %v5263_v33 = vpack.c.bf16 %v5243_v49, %v5242_v19  ;;  %v4930_v45 = vmul.f32 %v9803_v42, %v4865_v2 }
 0x406   : > { %v4863_v12 = vpop.permute.xlu1 %4862 }
 0x407   : > { %5321 = vrot.lane.b32.xlu1 %v5263_v33, %s7640_s12  ;;  %v4929_v8 = vmul.f32 %v9806_v14, %v4863_v12 }
 0x408   : > { %v5181_v3 = vpop.permute.xlu0 %5180 }
 0x409   : > { %v5248_v58 = vadd.f32 %v5181_v3, %v4928_v55 }
 0x40a   : > { %v4867_v56 = vpop.permute.xlu1 %4866 }
 0x40b   : > { %5325 = vrot.lane.b32.xlu1 %v5265_v40, %s7640_s12  ;;  %v4931_v34 = vmul.f32 %v9828_v30, %v4867_v56 }
 0x40c   : > { %v5185_v61 = vpop.permute.xlu0 %5184 }
 0x40d   : > { %v5250_v13 = vadd.f32 %v5185_v61, %v4930_v45 }
 0x40e   : > { %v5183_v48 = vpop.permute.xlu1 %5182 }
 0x40f   : > { %v5249_v32 = vadd.f32 %v5183_v48, %v4929_v8  ;;  %v10472_v48 = vld [vmem:[#allocation15_spill] sm:$0xff] }
 0x410   : > { %v5300_v37 = vpop.permute.xlu0 %5299 }
 0x411   : > { %v5266_v20 = vpack.c.bf16 %v5249_v32, %v5248_v58  ;;  %6497 = vmatprep.mubr.msk.bf16.mxu1 %vm5355_vm0, %v5300_v37 }
 0x412   : > { %v5187_v28 = vpop.permute.xlu1 %5186 }
 0x413   : > { %v5251_v41 = vadd.f32 %v5187_v28, %v4931_v34  ;;  %5327 = vrot.lane.b32.xlu0 %v5266_v20, %s7640_s12 }
 0x415   : > { %v5267_v62 = vpack.c.bf16 %v5251_v41, %v5250_v13 }
 0x416   : > { %v5302_v14 = vpop.permute.xlu1 %5301 }
 0x417   : > { %5329 = vrot.lane.b32.xlu1 %v5267_v62, %s7640_s12  ;;  %5661 = vrot.lane.b32.xlu0 %v9810_v57, %s7641_s28 }
 0x418   : > { %6498 = vmatmul.mubr.msk.bf16.vlgmr.msra.gmra.mxu1 %vm5355_vm0, %v5302_v14 }
 0x41b   : > { %5663 = vrot.lane.b32.xlu1 %v9801_v47, %s7641_s28  ;;  %5665 = vrot.lane.b32.xlu0 %v9834_v22, %s7641_s28 }
 0x41f   : > { %5667 = vrot.lane.b32.xlu1 %v9836_v16, %s7641_s28  ;;  %5669 = vrot.lane.b32.xlu0 %v9856_v36, %s7641_s28 }
 0x422   : > { %v5304_v42 = vpop.permute.xlu0 %5303 }
 0x423   : > { %6501 = vmatprep.mubr.msk.bf16.mxu1 %vm5355_vm0, %v5304_v42  ;;  %5671 = vrot.lane.b32.xlu1 %v9858_v63, %s7641_s28 }
 0x424   : > { %5673 = vrot.lane.b32.xlu0 %v9870_v39, %s7641_s28 }
 0x427   : > { %5675 = vrot.lane.b32.xlu1 %v9872_v44, %s7641_s28 }
 0x428   : > { %5677 = vrot.lane.b32.xlu0 %v9881_v17, %s7641_s28 }
 0x42b   : > { %5679 = vrot.lane.b32.xlu1 %v9883_v11, %s7641_s28 }
 0x42c   : > { %5681 = vrot.lane.b32.xlu0 %v9892_v52, %s7641_s28  ;;  %v10464_v52 = vld [vmem:[#allocation26_spill] sm:$0xff] }
 0x42f   : > { %5683 = vrot.lane.b32.xlu1 %v9894_v53, %s7641_s28  ;;  %v6385_v53 = vmul.f32 -1.442695, %v10464_v52 }
 0x430   : > { %5685 = vrot.lane.b32.xlu0 %v9903_v1, %s7641_s28  ;;  %v10465_v1 = vld [vmem:[#allocation24_spill] sm:$0xff] }
 0x431   : > { %7440 = vpow2.f32 %v6385_v53 }
 0x433   : > { %5687 = vrot.lane.b32.xlu1 %v9905_v18, %s7641_s28  ;;  %v6381_v18 = vmul.f32 -1.442695, %v10465_v1 }
 0x434   : > { %5689 = vrot.lane.b32.xlu0 %v9914_v25, %s7641_s28  ;;  %v10466_v25 = vld [vmem:[#allocation17_spill] sm:$0xff] }
 0x435   : > { %7442 = vpow2.f32 %v6381_v18 }
 0x437   : > { %5691 = vrot.lane.b32.xlu1 %v9916_v27, %s7641_s28  ;;  %v6387_v27 = vmul.f32 -1.442695, %v10466_v25 }
 0x438   : > { %5693 = vrot.lane.b32.xlu0 %v9925_v21, %s7641_s28  ;;  %v10467_v21 = vld [vmem:[#allocation25_spill] sm:$0xff] }
 0x439   : > { %7444 = vpow2.f32 %v6387_v27 }
 0x43b   : > { %5695 = vrot.lane.b32.xlu1 %v9927_v7, %s7641_s28  ;;  %v6383_v7 = vmul.f32 -1.442695, %v10467_v21 }
 0x43c   : > { %v5306_v57 = vpop.permute.xlu1 %5305  ;;  %5697 = vrot.lane.b32.xlu0 %v9936_v9, %s7641_s28  ;;  %v10468_v9 = vld [vmem:[#allocation7_spill] sm:$0xff] }
 0x43d   : > { %6502 = vmatmul.mubr.msk.bf16.gmra.mxu1 %vm5355_vm0, %v5306_v57  ;;  %7446 = vpow2.f32 %v6383_v7 }
 0x43f   : > { %5699 = vrot.lane.b32.xlu1 %v9938_v4, %s7641_s28  ;;  %v6389_v4 = vmul.f32 -1.442695, %v10468_v9  ;;  %v10475_v9 = vld [vmem:[#allocation20_spill] sm:$0xff] }
 0x440   : > { %5701 = vrot.lane.b32.xlu0 %v9949_v23, %s7641_s28  ;;  %v10469_v23 = vld [vmem:[#allocation13_spill] sm:$0xff] }
 0x441   : > { %7448 = vpow2.f32 %v6389_v4  ;;  %v6399_v4 = vmul.f32 -1.442695, %v10475_v9 }
 0x443   : > { %5703 = vrot.lane.b32.xlu1 %v9951_v15, %s7641_s28  ;;  %v6393_v15 = vmul.f32 -1.442695, %v10469_v23 }
 0x444   : > { %5705 = vrot.lane.b32.xlu0 %v5242_v19, %s7641_s28 }
 0x445   : > { %7450 = vpow2.f32 %v6393_v15 }
 0x446   : > { %7452 = vpow2.f32 %v6395_v54 }
 0x447   : > { %5707 = vrot.lane.b32.xlu1 %v5243_v49, %s7641_s28 }
 0x448   : > { %v5308_v47 = vpop.permute.xlu0 %5307  ;;  %5709 = vrot.lane.b32.xlu0 %v9961_v29, %s7641_s28 }
 0x449   : > { %6505 = vmatprep.mubr.msk.bf16.mxu1 %vm5355_vm0, %v5308_v47 }
 0x44b   : > { %5711 = vrot.lane.b32.xlu1 %v9956_v35, %s7641_s28  ;;  %v7441_v35 = vpop.eup %7440 }
 0x44c   : > { %v5310_v30 = vpop.permute.xlu1 %5309  ;;  %5713 = vrot.lane.b32.xlu0 %v9830_v5, %s7641_s28  ;;  %v7443_v29 = vpop.eup %7442  ;;  %v4521_v38 = vadd.f32 1.0, %v7441_v35 }
 0x44d   : > { %6506 = vmatmul.mubr.msk.bf16.gmra.mxu1 %vm5355_vm0, %v5310_v30  ;;  %v7445_v31 = vpop.eup %7444  ;;  %v4517_v26 = vadd.f32 1.0, %v7443_v29 }
 0x44e   : > { %v7447_v6 = vpop.eup %7446  ;;  %7454 = vrcp.f32 %v4521_v38  ;;  %v4523_v24 = vadd.f32 1.0, %v7445_v31 }
 0x44f   : > { %5715 = vrot.lane.b32.xlu1 %v9846_v0, %s7641_s28  ;;  %7456 = vpow2.f32 %v6391_v59  ;;  %v4519_v33 = vadd.f32 1.0, %v7447_v6  ;;  %v7449_v3 = vpop.eup %7448 }
 0x450   : > { %5717 = vrot.lane.b32.xlu0 %v5248_v58, %s7641_s28  ;;  %v4525_v55 = vadd.f32 1.0, %v7449_v3  ;;  %v6397_v58 = vmul.f32 -1.442695, %v10472_v48 }
 0x452   : > { %v7451_v10 = vpop.eup %7450 }
 0x453   : > { %5719 = vrot.lane.b32.xlu1 %v5249_v32, %s7641_s28  ;;  %v7453_v8 = vpop.eup %7452  ;;  %v4529_v61 = vadd.f32 1.0, %v7451_v10 }
 0x454   : > { %5721 = vrot.lane.b32.xlu0 %v5250_v13, %s7641_s28  ;;  %v4531_v34 = vadd.f32 1.0, %v7453_v8 }
 0x457   : > { %v5312_v22 = vpop.permute.xlu0 %5311  ;;  %5723 = vrot.lane.b32.xlu1 %v5251_v41, %s7641_s28  ;;  %v10473_v41 = vld [vmem:[#allocation19_spill] sm:$0xff] }
 0x458   : > { %6509 = vmatprep.mubr.msk.bf16.mxu1 %vm5355_vm0, %v5312_v22  ;;  %v6401_v62 = vmul.f32 -1.442695, %v10473_v41 }
 0x45b   : > { %v5314_v16 = vpop.permute.xlu1 %5313  ;;  %v7455_v45 = vpop.eup %7454 }
 0x45c   : > { %6510 = vmatmul.mubr.msk.bf16.gmra.mxu1 %vm5355_vm0, %v5314_v16  ;;  %v7457_v37 = vpop.eup %7456 }
 0x45d   : > { %v4527_v16 = vadd.f32 1.0, %v7457_v37 }
 0x45f   : > { %v5316_v36 = vpop.permute.xlu0 %5315 }
 0x460   : > { %6513 = vmatprep.mubr.msk.bf16.mxu1 %vm5355_vm0, %v5316_v36 }
 0x468   : > { %v5318_v63 = vpop.permute.xlu1 %5317 }
 0x469   : > { %6514 = vmatmul.mubr.msk.bf16.gmra.mxu1 %vm5355_vm0, %v5318_v63 }
 0x46f   : > { %v5320_v5 = vpop.permute.xlu0 %5319 }
 0x470   : > { %6517 = vmatprep.mubr.msk.bf16.mxu1 %vm5355_vm0, %v5320_v5 }
 0x473   : > { %v5324_v39 = vpop.permute.xlu0 %5323 }
 0x479   : > { %v5322_v0 = vpop.permute.xlu1 %5321 }
 0x47a   : > { %6518 = vmatmul.mubr.msk.bf16.gmra.mxu1 %vm5355_vm0, %v5322_v0 }
 0x47b   : > { %6521 = vmatprep.mubr.msk.bf16.mxu1 %vm5355_vm0, %v5324_v39 }
 0x47d   : > { %v5326_v44 = vpop.permute.xlu1 %5325 }
 0x482   : > { %6522 = vmatmul.mubr.msk.bf16.gmra.mxu1 %vm5355_vm0, %v5326_v44 }
 0x485   : > { %v5328_v17 = vpop.permute.xlu0 %5327 }
 0x486   : > { %6525 = vmatprep.mubr.msk.bf16.mxu1 %vm5355_vm0, %v5328_v17 }
 0x489   : > { %v5330_v11 = vpop.permute.xlu1 %5329  ;;  %v5662_v32 = vpop.permute.xlu0 %5661 }
 0x48a   : > { %6526 = vmatmul.mubr.msk.bf16.gmra.mxu1 %vm5355_vm0, %v5330_v11  ;;  %v10474_v11 = vld [vmem:[#allocation38_spill] sm:$0xff] }
 0x48b   : > { %v6403_v52 = vmul.f32 -1.442695, %v10474_v11 }
 0x48d   : > { %v5664_v14 = vpop.permute.xlu1 %5663  ;;  %v5666_v36 = vpop.permute.xlu0 %5665 }
 0x491   : > { %v5668_v23 = vpop.permute.xlu1 %5667  ;;  %v5670_v38 = vpop.permute.xlu0 %5669 }
 0x495   : > { %v5672_v6 = vpop.permute.xlu1 %5671 }
 0x4d8   : > { %v6499_v43 = vpop.f32.mrf.mxu1 }
 0x4d9   : > { %v5447_v46 = vadd.f32 %v6499_v43, %v10066_v60 }
 0x4da   : > { %v5438_v19 = vpop.f32.mrf.mxu1 }
 0x4db   : > { %7458 = vtanh.f32 %v5447_v46  ;;  %v5439_v49 = vadd.f32 %v10066_v60, %v5438_v19 }
 0x4dc   : > { %7460 = vrcp.f32 %v4517_v26  ;;  %v6500_v2 = vpop.f32.mrf.mxu1 }
 0x4dd   : > { %7462 = vtanh.f32 %v5439_v49  ;;  %v5450_v12 = vadd.f32 %v6500_v2, %v10066_v60  ;;  %v10476_v49 = vld [vmem:[#allocation40_spill] sm:$0xff]  ;;  %v5674_v2 = vpop.permute.xlu0 %5673 }
 0x4de   : > { %7464 = vrcp.f32 %v4523_v24  ;;  %v5441_v40 = vpop.f32.mrf.mxu1 }
 0x4df   : > { %7466 = vtanh.f32 %v5450_v12  ;;  %v5442_v56 = vadd.f32 %v10066_v60, %v5441_v40 }
 0x4e0   : > { %7468 = vrcp.f32 %v4519_v33  ;;  %v6405_v33 = vmul.f32 -1.442695, %v10476_v49 }
 0x4e1   : > { %7470 = vtanh.f32 %v5442_v56 }
 0x4e2   : > { %7472 = vrcp.f32 %v4525_v55  ;;  %v10477_v55 = vld [vmem:[#allocation28_spill] sm:$0xff] }
 0x4e3   : > { %7474 = vrcp.f32 %v4529_v61  ;;  %v6407_v8 = vmul.f32 -1.442695, %v10477_v55 }
 0x4e4   : > { %7476 = vpow2.f32 %v6397_v58  ;;  %v10478_v58 = vld [vmem:[#allocation42_spill] sm:$0xff] }
 0x4e8   : > { %v7459_v13 = vpop.eup %7458 }
 0x4e9   : > { %v7461_v57 = vpop.eup %7460  ;;  %v5599_v47 = vmul.f32 %v7459_v13, %v7455_v45 }
 0x4ea   : > { %v7463_v22 = vpop.eup %7462 }
 0x4eb   : > { %v7465_v5 = vpop.eup %7464  ;;  %v5760_v0 = vsel %vm5757_vm1, %v5599_v47, %v5666_v36  ;;  %v5597_v39 = vmul.f32 %v7463_v22, %v7461_v57 }
 0x4ec   : > { %v7467_v17 = vpop.eup %7466  ;;  %v5793_v53 = vsel %vm5790_vm2, %v5760_v0, 0.0 }
 0x4ed   : > { %v7469_v18 = vpop.eup %7468  ;;  %5825 = vst [vmem:[%s10081_s27 + $0x10] sm:$0xff] %v5793_v53  ;;  %v5758_v25 = vsel %vm5757_vm1, %v5597_v39, %v5662_v32  ;;  %v5600_v27 = vmul.f32 %v7467_v17, %v7465_v5  ;;  %v6409_v32 = vmul.f32 -1.442695, %v10478_v58 }
 0x4ee   : > { %v7471_v7 = vpop.eup %7470  ;;  %v5791_v15 = vsel %vm5790_vm2, %v5758_v25, 0.0  ;;  %v5678_v25 = vpop.permute.xlu0 %5677 }
 0x4ef   : > { %5823 = vst [vmem:[%s10081_s27] sm:$0xff] %v5791_v15  ;;  %v5761_v35 = vsel %vm5757_vm1, %v5600_v27, %v5668_v23  ;;  %v5598_v51 = vmul.f32 %v7471_v7, %v7469_v18  ;;  %v7473_v59 = vpop.eup %7472  ;;  %v10481_v15 = vld [vmem:[#allocation30_spill] sm:$0xff] }
 0x4f0   : > { %v5794_v54 = vsel %vm5790_vm2, %v5761_v35, 0.0  ;;  %v7475_v31 = vpop.eup %7474  ;;  %v6415_v35 = vmul.f32 -1.442695, %v10481_v15 }
 0x4f1   : > { %5826 = vst [vmem:[%s10081_s27 + $0x18] sm:$0xff] %v5794_v54  ;;  %v5759_v29 = vsel %vm5757_vm1, %v5598_v51, %v5664_v14  ;;  %v7477_v26 = vpop.eup %7476  ;;  %v10482_v54 = vld [vmem:[#allocation2_spill] sm:$0xff] }
 0x4f2   : > { %v5792_v50 = vsel %vm5790_vm2, %v5759_v29, 0.0  ;;  %v4533_v40 = vadd.f32 1.0, %v7477_v26  ;;  %v6417_v29 = vmul.f32 -1.442695, %v10482_v54 }
 0x4f3   : > { %5824 = vst [vmem:[%s10081_s27 + $0x8] sm:$0xff] %v5792_v50 }
 0x4fd   : > { %v6503_v20 = vpop.f32.mrf.mxu1 }
 0x4fe   : > { %v5463_v28 = vadd.f32 %v6503_v20, %v10066_v60 }
 0x4ff   : > { %v5454_v42 = vpop.f32.mrf.mxu1 }
 0x500   : > { %7478 = vtanh.f32 %v5463_v28  ;;  %v5455_v30 = vadd.f32 %v10066_v60, %v5454_v42  ;;  %v5676_v28 = vpop.permute.xlu1 %5675  ;;  %v10479_v42 = vld [vmem:[#allocation29_spill] sm:$0xff] }
 0x501   : > { %7480 = vrcp.f32 %v4531_v34  ;;  %v6504_v63 = vpop.f32.mrf.mxu1  ;;  %v6411_v57 = vmul.f32 -1.442695, %v10479_v42 }
 0x502   : > { %7482 = vtanh.f32 %v5455_v30  ;;  %v5466_v44 = vadd.f32 %v6504_v63, %v10066_v60 }
 0x503   : > { %7484 = vpow2.f32 %v6401_v62  ;;  %v5457_v1 = vpop.f32.mrf.mxu1 }
 0x504   : > { %7486 = vtanh.f32 %v5466_v44  ;;  %v5458_v21 = vadd.f32 %v10066_v60, %v5457_v1 }
 0x505   : > { %7488 = vrcp.f32 %v4527_v16 }
 0x506   : > { %7490 = vtanh.f32 %v5458_v21  ;;  %v10480_v21 = vld [vmem:[#allocation21_spill] sm:$0xff] }
 0x507   : > { %7492 = vpow2.f32 %v6403_v52  ;;  %v6413_v7 = vmul.f32 -1.442695, %v10480_v21 }
 0x508   : > { %7494 = vpow2.f32 %v6399_v4 }
 0x509   : > { %7496 = vpow2.f32 %v6405_v33 }
 0x50a   : > { %7498 = vrcp.f32 %v4533_v40 }
 0x50b   : > { %7500 = vpow2.f32 %v6407_v8 }
 0x50c   : > { %7502 = vpow2.f32 %v6409_v32 }
 0x50d   : > { %v7479_v43 = vpop.eup %7478  ;;  %v6507_v30 = vpop.f32.mrf.mxu1 }
 0x50e   : > { %v7481_v46 = vpop.eup %7480  ;;  %v5603_v24 = vmul.f32 %v7479_v43, %v7475_v31  ;;  %v5479_v36 = vadd.f32 %v6507_v30, %v10066_v60  ;;  %v5682_v43 = vpop.permute.xlu0 %5681 }
 0x50f   : > { %v7483_v19 = vpop.eup %7482  ;;  %v5470_v0 = vpop.f32.mrf.mxu1 }
 0x510   : > { %v7485_v12 = vpop.eup %7484  ;;  %v5764_v3 = vsel %vm5757_vm1, %v5603_v24, %v5674_v2  ;;  %v5601_v56 = vmul.f32 %v7483_v19, %v7473_v59  ;;  %v5471_v39 = vadd.f32 %v10066_v60, %v5470_v0 }
 0x511   : > { %v7487_v10 = vpop.eup %7486  ;;  %v5797_v61 = vsel %vm5790_vm2, %v5764_v3, 0.0  ;;  %v4537_v37 = vadd.f32 1.0, %v7485_v12  ;;  %v6508_v17 = vpop.f32.mrf.mxu1 }
 0x512   : > { %v7489_v48 = vpop.eup %7488  ;;  %5829 = vst [vmem:[%s10081_s27 + $0x30] sm:$0xff] %v5797_v61  ;;  %v5762_v45 = vsel %vm5757_vm1, %v5601_v56, %v5670_v38  ;;  %v5604_v34 = vmul.f32 %v7487_v10, %v7481_v46  ;;  %v5482_v11 = vadd.f32 %v6508_v17, %v10066_v60  ;;  %v5680_v38 = vpop.permute.xlu1 %5679  ;;  %v10483_v46 = vld [vmem:[#allocation5_spill] sm:$0xff] }
 0x513   : > { %v7491_v20 = vpop.eup %7490  ;;  %v5795_v13 = vsel %vm5790_vm2, %v5762_v45, 0.0  ;;  %7504 = vrcp.f32 %v4537_v37  ;;  %v5473_v52 = vpop.f32.mrf.mxu1  ;;  %v6419_v24 = vmul.f32 -1.442695, %v10483_v46 }
 0x514   : > { %v7493_v41 = vpop.eup %7492  ;;  %5827 = vst [vmem:[%s10081_s27 + $0x20] sm:$0xff] %v5795_v13  ;;  %v5765_v62 = vsel %vm5757_vm1, %v5604_v34, %v5676_v28  ;;  %v5602_v14 = vmul.f32 %v7491_v20, %v7489_v48  ;;  %7506 = vtanh.f32 %v5479_v36  ;;  %v5474_v53 = vadd.f32 %v10066_v60, %v5473_v52  ;;  %v5686_v30 = vpop.permute.xlu0 %5685 }
 0x515   : > { %v5798_v47 = vsel %vm5790_vm2, %v5765_v62, 0.0  ;;  %v7495_v22 = vpop.eup %7494  ;;  %v4539_v63 = vadd.f32 1.0, %v7493_v41  ;;  %7508 = vpow2.f32 %v6411_v57 }
 0x516   : > { %5830 = vst [vmem:[%s10081_s27 + $0x38] sm:$0xff] %v5798_v47  ;;  %v5763_v16 = vsel %vm5757_vm1, %v5602_v14, %v5672_v6  ;;  %v4535_v44 = vadd.f32 1.0, %v7495_v22  ;;  %7510 = vtanh.f32 %v5471_v39  ;;  %v7497_v1 = vpop.eup %7496  ;;  %v5684_v48 = vpop.permute.xlu1 %5683 }
 0x517   : > { %v5796_v5 = vsel %vm5790_vm2, %v5763_v16, 0.0  ;;  %7512 = vrcp.f32 %v4539_v63  ;;  %v7499_v18 = vpop.eup %7498  ;;  %v4541_v4 = vadd.f32 1.0, %v7497_v1 }
 0x518   : > { %5828 = vst [vmem:[%s10081_s27 + $0x28] sm:$0xff] %v5796_v5  ;;  %7514 = vtanh.f32 %v5482_v11  ;;  %v7501_v27 = vpop.eup %7500  ;;  %v10484_v5 = vld [vmem:[#allocation31_spill] sm:$0xff] }
 0x519   : > { %7516 = vrcp.f32 %v4535_v44  ;;  %v7503_v9 = vpop.eup %7502  ;;  %v4543_v45 = vadd.f32 1.0, %v7501_v27  ;;  %v6421_v0 = vmul.f32 -1.442695, %v10484_v5  ;;  %v5690_v27 = vpop.permute.xlu0 %5689 }
 0x51a   : > { %7518 = vtanh.f32 %v5474_v53  ;;  %v4545_v59 = vadd.f32 1.0, %v7503_v9  ;;  %v5688_v17 = vpop.permute.xlu1 %5687 }
 0x51b   : > { %7520 = vpow2.f32 %v6413_v7 }
 0x51c   : > { %7522 = vrcp.f32 %v4541_v4  ;;  %v6511_v33 = vpop.f32.mrf.mxu1 }
 0x51d   : > { %7524 = vpow2.f32 %v6415_v35  ;;  %v5495_v40 = vadd.f32 %v6511_v33, %v10066_v60 }
 0x51e   : > { %7526 = vpow2.f32 %v6417_v29  ;;  %v5486_v8 = vpop.f32.mrf.mxu1 }
 0x51f   : > { %7528 = vrcp.f32 %v4545_v59  ;;  %v5487_v32 = vadd.f32 %v10066_v60, %v5486_v8  ;;  %v10486_v59 = vld [vmem:[#allocation36_spill] sm:$0xff] }
 0x520   : > { %v7505_v23 = vpop.eup %7504  ;;  %7530 = vtanh.f32 %v5495_v40  ;;  %v6512_v37 = vpop.f32.mrf.mxu1 }
 0x521   : > { %v7507_v51 = vpop.eup %7506  ;;  %7532 = vpow2.f32 %v6419_v24  ;;  %v5498_v13 = vadd.f32 %v6512_v37, %v10066_v60  ;;  %v5694_v37 = vpop.permute.xlu0 %5693 }
 0x522   : > { %v7509_v50 = vpop.eup %7508  ;;  %v5607_v31 = vmul.f32 %v7507_v51, %v7505_v23  ;;  %7534 = vtanh.f32 %v5487_v32  ;;  %v5489_v62 = vpop.f32.mrf.mxu1 }
 0x523   : > { %v7511_v26 = vpop.eup %7510  ;;  %v4547_v56 = vadd.f32 1.0, %v7509_v50  ;;  %v5490_v42 = vadd.f32 %v10066_v60, %v5489_v62 }
 0x524   : > { %v7513_v6 = vpop.eup %7512  ;;  %v5768_v19 = vsel %vm5757_vm1, %v5607_v31, %v5682_v43  ;;  %v5605_v49 = vmul.f32 %v7511_v26, %v7499_v18  ;;  %v10485_v18 = vld [vmem:[#allocation34_spill] sm:$0xff]  ;;  %v6427_v31 = vmul.f32 -1.442695, %v10486_v59  ;;  %v5692_v26 = vpop.permute.xlu1 %5691 }
 0x525   : > { %v7515_v2 = vpop.eup %7514  ;;  %v5801_v12 = vsel %vm5790_vm2, %v5768_v19, 0.0  ;;  %7536 = vrcp.f32 %v4547_v56 }
 0x526   : > { %v7517_v3 = vpop.eup %7516  ;;  %5833 = vst [vmem:[%s10081_s27 + $0x50] sm:$0xff] %v5801_v12  ;;  %v5766_v10 = vsel %vm5757_vm1, %v5605_v49, %v5678_v25  ;;  %v5608_v55 = vmul.f32 %v7515_v2, %v7513_v6  ;;  %7538 = vtanh.f32 %v5498_v13  ;;  %v6425_v25 = vmul.f32 -1.442695, %v10485_v18  ;;  %v10487_v49 = vld [vmem:[#allocation32_spill] sm:$0xff]  ;;  %v10491_v13 = vld [vmem:[#allocation10_spill] sm:$0xff] }
 0x527   : > { %v7519_v61 = vpop.eup %7518  ;;  %v5799_v58 = vsel %vm5790_vm2, %v5766_v10, 0.0  ;;  %7540 = vrcp.f32 %v4543_v45  ;;  %v6423_v33 = vmul.f32 -1.442695, %v10487_v49  ;;  %v10490_v45 = vld [vmem:[#allocation27_spill] sm:$0xff] }
 0x528   : > { %5831 = vst [vmem:[%s10081_s27 + $0x40] sm:$0xff] %v5799_v58  ;;  %v5769_v34 = vsel %vm5757_vm1, %v5608_v55, %v5684_v48  ;;  %v5606_v20 = vmul.f32 %v7519_v61, %v7517_v3  ;;  %7542 = vtanh.f32 %v5490_v42  ;;  %v7521_v57 = vpop.eup %7520  ;;  %v10488_v55 = vld [vmem:[#allocation18_spill] sm:$0xff]  ;;  %v10492_v42 = vld [vmem:[#allocation12_spill] sm:$0xff] }
 0x529   : > { %v5802_v28 = vsel %vm5790_vm2, %v5769_v34, 0.0  ;;  %v7523_v47 = vpop.eup %7522  ;;  %v4549_v36 = vadd.f32 1.0, %v7521_v57  ;;  %v6515_v35 = vpop.f32.mrf.mxu1  ;;  %v6433_v8 = vmul.f32 -1.442695, %v10488_v55  ;;  %v10489_v48 = vld [vmem:[#allocation6_spill] sm:$0xff] }
 0x52a   : > { %5834 = vst [vmem:[%s10081_s27 + $0x58] sm:$0xff] %v5802_v28  ;;  %v5767_v41 = vsel %vm5757_vm1, %v5606_v20, %v5680_v38  ;;  %v7525_v22 = vpop.eup %7524  ;;  %v5511_v38 = vadd.f32 %v6515_v35, %v10066_v60  ;;  %v6429_v58 = vmul.f32 -1.442695, %v10489_v48  ;;  %v6435_v34 = vmul.f32 -1.442695, %v10490_v45 }
 0x52b   : > { %v5800_v14 = vsel %vm5790_vm2, %v5767_v41, 0.0  ;;  %v7527_v16 = vpop.eup %7526  ;;  %v4551_v44 = vadd.f32 1.0, %v7525_v22  ;;  %7544 = vrcp.f32 %v4549_v36  ;;  %v5502_v6 = vpop.f32.mrf.mxu1  ;;  %v6431_v41 = vmul.f32 -1.442695, %v10491_v13 }
 0x52c   : > { %5832 = vst [vmem:[%s10081_s27 + $0x48] sm:$0xff] %v5800_v14  ;;  %v7529_v63 = vpop.eup %7528  ;;  %v4553_v52 = vadd.f32 1.0, %v7527_v16  ;;  %7546 = vpow2.f32 %v6421_v0  ;;  %v5503_v19 = vadd.f32 %v10066_v60, %v5502_v6  ;;  %v6441_v57 = vmul.f32 -1.442695, %v10492_v42  ;;  %v5696_v16 = vpop.permute.xlu1 %5695 }
 0x52d   : > { %v7531_v39 = vpop.eup %7530  ;;  %7548 = vrcp.f32 %v4551_v44  ;;  %v6516_v12 = vpop.f32.mrf.mxu1  ;;  %v10495_v44 = vld [vmem:[#allocation16_spill] sm:$0xff] }
 0x52e   : > { %v7533_v11 = vpop.eup %7532  ;;  %v5611_v53 = vmul.f32 %v7531_v39, %v7529_v63  ;;  %7550 = vrcp.f32 %v4553_v52  ;;  %v5514_v3 = vadd.f32 %v6516_v12, %v10066_v60  ;;  %v10494_v63 = vld [vmem:[#allocation11_spill] sm:$0xff] }
 0x52f   : > { %v7535_v1 = vpop.eup %7534  ;;  %v4555_v23 = vadd.f32 1.0, %v7533_v11  ;;  %7552 = vpow2.f32 %v6425_v25  ;;  %v5505_v10 = vpop.f32.mrf.mxu1  ;;  %v6439_v5 = vmul.f32 -1.442695, %v10494_v63 }
 0x530   : > { %v5772_v7 = vsel %vm5757_vm1, %v5611_v53, %v5690_v27  ;;  %v5609_v9 = vmul.f32 %v7535_v1, %v7523_v47  ;;  %7554 = vtanh.f32 %v5511_v38  ;;  %v5506_v61 = vadd.f32 %v10066_v60, %v5505_v10  ;;  %v5698_v11 = vpop.permute.xlu0 %5697  ;;  %v5700_v35 = vpop.permute.xlu1 %5699 }
 0x531   : > { %v5805_v15 = vsel %vm5790_vm2, %v5772_v7, 0.0  ;;  %7556 = vrcp.f32 %v4555_v23 }
 0x532   : > { %v7537_v21 = vpop.eup %7536  ;;  %5837 = vst [vmem:[%s10081_s27 + $0x70] sm:$0xff] %v5805_v15  ;;  %v5770_v54 = vsel %vm5757_vm1, %v5609_v9, %v5686_v30  ;;  %7558 = vtanh.f32 %v5503_v19  ;;  %v10493_v30 = vld [vmem:[#allocation9_spill] sm:$0xff] }
 0x533   : > { %v7539_v4 = vpop.eup %7538  ;;  %v5803_v43 = vsel %vm5790_vm2, %v5770_v54, 0.0  ;;  %7560 = vpow2.f32 %v6427_v31  ;;  %v6437_v22 = vmul.f32 -1.442695, %v10493_v30 }
 0x534   : > { %v7541_v51 = vpop.eup %7540  ;;  %v5612_v29 = vmul.f32 %v7539_v4, %v7537_v21  ;;  %5835 = vst [vmem:[%s10081_s27 + $0x60] sm:$0xff] %v5803_v43  ;;  %7562 = vtanh.f32 %v5514_v3  ;;  %v10185_v55 = vpop.permute.xlu1 %5703 }
 0x535   : > { %v7543_v50 = vpop.eup %7542  ;;  %7564 = vpow2.f32 %v6423_v33 }
 0x536   : > { %v5773_v46 = vsel %vm5757_vm1, %v5612_v29, %v5692_v26  ;;  %v5610_v24 = vmul.f32 %v7543_v50, %v7541_v51  ;;  %7566 = vtanh.f32 %v5506_v61 }
 0x537   : > { %v5806_v2 = vsel %vm5790_vm2, %v5773_v46, 0.0  ;;  %7568 = vpow2.f32 %v6433_v8  ;;  %v10177_v46 = vpop.permute.xlu0 %5701 }
 0x538   : > { %5838 = vst [vmem:[%s10081_s27 + $0x78] sm:$0xff] %v5806_v2  ;;  %v5771_v40 = vsel %vm5757_vm1, %v5610_v24, %v5688_v17  ;;  %v7545_v32 = vpop.eup %7544  ;;  %7570 = vpow2.f32 %v6429_v58  ;;  %v6443_v17 = vmul.f32 -1.442695, %v10495_v44 }
 0x539   : > { %v5804_v56 = vsel %vm5790_vm2, %v5771_v40, 0.0  ;;  %v7547_v20 = vpop.eup %7546  ;;  %7572 = vpow2.f32 %v6435_v34 }
 0x53a   : > { %5836 = vst [vmem:[%s10081_s27 + $0x68] sm:$0xff] %v5804_v56  ;;  %v7549_v28 = vpop.eup %7548  ;;  %7574 = vpow2.f32 %v6431_v41  ;;  %v4557_v7 = vadd.f32 1.0, %v7547_v20  ;;  %v6519_v23 = vpop.f32.mrf.mxu1 }
 0x53b   : > { %v7551_v62 = vpop.eup %7550  ;;  %7576 = vpow2.f32 %v6441_v57  ;;  %v5527_v54 = vadd.f32 %v6519_v23, %v10066_v60  ;;  %v5708_v57 = vpop.permute.xlu1 %5707 }
 0x53c   : > { %v7553_v14 = vpop.eup %7552  ;;  %7578 = vpow2.f32 %v6437_v22  ;;  %v5518_v59 = vpop.f32.mrf.mxu1 }
 0x53d   : > { %v7555_v47 = vpop.eup %7554  ;;  %v4561_v53 = vadd.f32 1.0, %v7553_v14  ;;  %7580 = vpow2.f32 %v6439_v5  ;;  %v5519_v43 = vadd.f32 %v10066_v60, %v5518_v59 }
 0x53e   : > { %v7557_v36 = vpop.eup %7556  ;;  %v5615_v0 = vmul.f32 %v7555_v47, %v7551_v62  ;;  %7582 = vpow2.f32 %v6443_v17  ;;  %v6520_v19 = vpop.f32.mrf.mxu1 }
 0x53f   : > { %v7559_v39 = vpop.eup %7558  ;;  %7584 = vrcp.f32 %v4561_v53  ;;  %v5530_v2 = vadd.f32 %v6520_v19, %v10066_v60 }
 0x540   : > { %v7561_v52 = vpop.eup %7560  ;;  %v5776_v1 = vsel %vm5757_vm1, %v5615_v0, %v5698_v11  ;;  %v5613_v18 = vmul.f32 %v7559_v39, %v7545_v32  ;;  %7586 = vtanh.f32 %v5527_v54  ;;  %v5521_v40 = vpop.f32.mrf.mxu1 }
 0x541   : > { %v7563_v25 = vpop.eup %7562  ;;  %v5809_v27 = vsel %vm5790_vm2, %v5776_v1, 0.0  ;;  %v4563_v29 = vadd.f32 1.0, %v7561_v52  ;;  %7588 = vrcp.f32 %v4557_v7  ;;  %v5522_v56 = vadd.f32 %v10066_v60, %v5521_v40  ;;  %v5706_v32 = vpop.permute.xlu0 %5705 }
 0x542   : > { %v7565_v21 = vpop.eup %7564  ;;  %5841 = vst [vmem:[%s10081_s27 + $0x90] sm:$0xff] %v5809_v27  ;;  %v5774_v9 = vsel %vm5757_vm1, %v5613_v18, %v5694_v37  ;;  %v5616_v4 = vmul.f32 %v7563_v25, %v7557_v36  ;;  %7590 = vtanh.f32 %v5519_v43  ;;  %v6523_v8 = vpop.f32.mrf.mxu1 }
 0x543   : > { %v7567_v15 = vpop.eup %7566  ;;  %v5807_v51 = vsel %vm5790_vm2, %v5774_v9, 0.0  ;;  %v4559_v6 = vadd.f32 1.0, %v7565_v21  ;;  %7592 = vrcp.f32 %v4563_v29  ;;  %v5543_v48 = vadd.f32 %v6523_v8, %v10066_v60  ;;  %v5712_v7 = vpop.permute.xlu1 %5711 }
 0x544   : > { %5839 = vst [vmem:[%s10081_s27 + $0x80] sm:$0xff] %v5807_v51  ;;  %v5777_v38 = vsel %vm5757_vm1, %v5616_v4, %v5700_v35  ;;  %v5614_v50 = vmul.f32 %v7567_v15, %v7549_v28  ;;  %v7569_v31 = vpop.eup %7568  ;;  %7594 = vtanh.f32 %v5530_v2  ;;  %v5534_v45 = vpop.f32.mrf.mxu1 }
 0x545   : > { %v5810_v26 = vsel %vm5790_vm2, %v5777_v38, 0.0  ;;  %v7571_v49 = vpop.eup %7570  ;;  %v4569_v12 = vadd.f32 1.0, %v7569_v31  ;;  %7596 = vrcp.f32 %v4559_v6  ;;  %v5535_v20 = vadd.f32 %v10066_v60, %v5534_v45  ;;  %v5710_v63 = vpop.permute.xlu0 %5709 }
 0x546   : > { %5842 = vst [vmem:[%s10081_s27 + $0x98] sm:$0xff] %v5810_v26  ;;  %v5775_v24 = vsel %vm5757_vm1, %v5614_v50, %v5696_v16  ;;  %v7573_v3 = vpop.eup %7572  ;;  %v4565_v10 = vadd.f32 1.0, %v7571_v49  ;;  %7598 = vtanh.f32 %v5522_v56  ;;  %v6524_v13 = vpop.f32.mrf.mxu1 }
 0x547   : > { %v5808_v33 = vsel %vm5790_vm2, %v5775_v24, 0.0  ;;  %v7575_v61 = vpop.eup %7574  ;;  %7600 = vrcp.f32 %v4569_v12  ;;  %v4571_v58 = vadd.f32 1.0, %v7573_v3  ;;  %v5546_v62 = vadd.f32 %v6524_v13, %v10066_v60  ;;  %v5716_v2 = vpop.permute.xlu1 %5715 }
 0x548   : > { %5840 = vst [vmem:[%s10081_s27 + $0x88] sm:$0xff] %v5808_v33  ;;  %v7577_v34 = vpop.eup %7576  ;;  %7602 = vtanh.f32 %v5543_v48  ;;  %v4567_v28 = vadd.f32 1.0, %v7575_v61  ;;  %v5537_v47 = vpop.f32.mrf.mxu1 }
 0x549   : > { %v7579_v37 = vpop.eup %7578  ;;  %7604 = vrcp.f32 %v4565_v10  ;;  %v4577_v42 = vadd.f32 1.0, %v7577_v34  ;;  %v5538_v22 = vadd.f32 %v10066_v60, %v5537_v47  ;;  %v5714_v29 = vpop.permute.xlu0 %5713 }
 0x54a   : > { %v7581_v41 = vpop.eup %7580  ;;  %7606 = vtanh.f32 %v5535_v20  ;;  %v4573_v36 = vadd.f32 1.0, %v7579_v37  ;;  %v6527_v5 = vpop.f32.mrf.mxu1 }
 0x54b   : > { %v7583_v14 = vpop.eup %7582  ;;  %7608 = vrcp.f32 %v4571_v58  ;;  %v5559_v44 = vadd.f32 %v6527_v5, %v10066_v60  ;;  %v4575_v21 = vadd.f32 1.0, %v7581_v41 }
 0x54c   : > { %v7585_v30 = vpop.eup %7584  ;;  %7610 = vtanh.f32 %v5546_v62  ;;  %v4579_v11 = vadd.f32 1.0, %v7583_v14  ;;  %v5550_v52 = vpop.f32.mrf.mxu1 }
 0x54d   : > { %v7587_v16 = vpop.eup %7586  ;;  %7612 = vrcp.f32 %v4567_v28  ;;  %v5551_v25 = vadd.f32 %v10066_v60, %v5550_v52  ;;  %v5718_v10 = vpop.permute.xlu0 %5717 }
 0x54e   : > { %v7589_v0 = vpop.eup %7588  ;;  %v5619_v39 = vmul.f32 %v7587_v16, %v7585_v30  ;;  %7614 = vtanh.f32 %v5538_v22  ;;  %v6528_v4 = vpop.f32.mrf.mxu1 }
 0x54f   : > { %v7591_v17 = vpop.eup %7590  ;;  %7616 = vrcp.f32 %v4577_v42  ;;  %v5562_v51 = vadd.f32 %v6528_v4, %v10066_v60  ;;  %v5720_v28 = vpop.permute.xlu1 %5719 }
 0x550   : > { %v7593_v53 = vpop.eup %7592  ;;  %v5780_v1 = vsel %vm5757_vm1, %v5619_v39, %v5706_v32  ;;  %v5617_v18 = vmul.f32 %v7591_v17, %v7589_v0  ;;  %7618 = vtanh.f32 %v5559_v44  ;;  %v5553_v50 = vpop.f32.mrf.mxu1 }
 0x551   : > { %v7595_v27 = vpop.eup %7594  ;;  %7620 = vrcp.f32 %v4573_v36  ;;  %v5813_v9 = vsel %vm5790_vm2, %v5780_v1, 0.0  ;;  %v5554_v43 = vadd.f32 %v10066_v60, %v5553_v50 }
 0x552   : > { %v7597_v23 = vpop.eup %7596  ;;  %5845 = vst [vmem:[%s10081_s27 + $0xb0] sm:$0xff] %v5813_v9  ;;  %v5778_v15 = vsel %vm5757_vm1, %v5617_v18, %v10177_v46  ;;  %v5620_v35 = vmul.f32 %v7595_v27, %v7593_v53  ;;  %7622 = vtanh.f32 %v5551_v25 }
 0x553   : > { %v7599_v54 = vpop.eup %7598  ;;  %7624 = vrcp.f32 %v4579_v11  ;;  %v5811_v38 = vsel %vm5790_vm2, %v5778_v15, 0.0  ;;  %v5724_v17 = vpop.permute.xlu1 %5723 }
 0x554   : > { %v7601_v59 = vpop.eup %7600  ;;  %5843 = vst [vmem:[%s10081_s27 + $0xa0] sm:$0xff] %v5811_v38  ;;  %v5781_v31 = vsel %vm5757_vm1, %v5620_v35, %v5708_v57  ;;  %v5618_v26 = vmul.f32 %v7599_v54, %v7597_v23  ;;  %7626 = vtanh.f32 %v5562_v51  ;;  %v5722_v57 = vpop.permute.xlu0 %5721 }
 0x555   : > { %v7603_v6 = vpop.eup %7602  ;;  %7628 = vrcp.f32 %v4575_v21  ;;  %v5814_v46 = vsel %vm5790_vm2, %v5781_v31, 0.0 }
 0x556   : > { %v7605_v24 = vpop.eup %7604  ;;  %5846 = vst [vmem:[%s10081_s27 + $0xb8] sm:$0xff] %v5814_v46  ;;  %v5779_v19 = vsel %vm5757_vm1, %v5618_v26, %v10185_v55  ;;  %v5623_v49 = vmul.f32 %v7603_v6, %v7601_v59  ;;  %7630 = vtanh.f32 %v5554_v43 }
 0x557   : > { %v7607_v33 = vpop.eup %7606  ;;  %v5812_v12 = vsel %vm5790_vm2, %v5779_v19, 0.0 }
 0x558   : > { %v7609_v40 = vpop.eup %7608  ;;  %5844 = vst [vmem:[%s10081_s27 + $0xa8] sm:$0xff] %v5812_v12  ;;  %v5784_v60 = vsel %vm5757_vm1, %v5623_v49, %v5714_v29  ;;  %v5621_v3 = vmul.f32 %v7607_v33, %v7605_v24 }
 0x559   : > { %v7611_v56 = vpop.eup %7610  ;;  %v5817_v8 = vsel %vm5790_vm2, %v5784_v60, 0.0 }
 0x55a   : > { %v7613_v61 = vpop.eup %7612  ;;  %5849 = vst [vmem:[%s10081_s27 + $0xd0] sm:$0xff] %v5817_v8  ;;  %v5782_v55 = vsel %vm5757_vm1, %v5621_v3, %v5710_v63  ;;  %v5624_v48 = vmul.f32 %v7611_v56, %v7609_v40 }
 0x55b   : > { %v7615_v58 = vpop.eup %7614  ;;  %v5815_v32 = vsel %vm5790_vm2, %v5782_v55, 0.0 }
 0x55c   : > { %v7617_v45 = vpop.eup %7616  ;;  %5847 = vst [vmem:[%s10081_s27 + $0xc0] sm:$0xff] %v5815_v32  ;;  %v5785_v34 = vsel %vm5757_vm1, %v5624_v48, %v5716_v2  ;;  %v5622_v20 = vmul.f32 %v7615_v58, %v7613_v61 }
 0x55d   : > { %v7619_v37 = vpop.eup %7618  ;;  %v5818_v13 = vsel %vm5790_vm2, %v5785_v34, 0.0 }
 0x55e   : > { %v7621_v41 = vpop.eup %7620  ;;  %5850 = vst [vmem:[%s10081_s27 + $0xd8] sm:$0xff] %v5818_v13  ;;  %v5783_v62 = vsel %vm5757_vm1, %v5622_v20, %v5712_v7  ;;  %v5627_v14 = vmul.f32 %v7619_v37, %v7617_v45 }
 0x55f   : > { %v7623_v42 = vpop.eup %7622  ;;  %v5816_v47 = vsel %vm5790_vm2, %v5783_v62, 0.0 }
 0x560   : > { %v7625_v30 = vpop.eup %7624  ;;  %5848 = vst [vmem:[%s10081_s27 + $0xc8] sm:$0xff] %v5816_v47  ;;  %v5788_v22 = vsel %vm5757_vm1, %v5627_v14, %v5722_v57  ;;  %v5625_v16 = vmul.f32 %v7623_v42, %v7621_v41 }
 0x561   : > { %v7627_v36 = vpop.eup %7626  ;;  %v5821_v63 = vsel %vm5790_vm2, %v5788_v22, 0.0 }
 0x562   : > { %v7629_v5 = vpop.eup %7628  ;;  %5853 = vst [vmem:[%s10081_s27 + $0xf0] sm:$0xff] %v5821_v63  ;;  %v5786_v0 = vsel %vm5757_vm1, %v5625_v16, %v5718_v10  ;;  %v5628_v39 = vmul.f32 %v7627_v36, %v7625_v30 }
 0x563   : > { %v7631_v44 = vpop.eup %7630  ;;  %v5819_v11 = vsel %vm5790_vm2, %v5786_v0, 0.0 }
 0x564   : > { %5851 = vst [vmem:[%s10081_s27 + $0xe0] sm:$0xff] %v5819_v11  ;;  %v5789_v52 = vsel %vm5757_vm1, %v5628_v39, %v5724_v17  ;;  %v5626_v53 = vmul.f32 %v7631_v44, %v7629_v5 }
 0x565   : > { %v5822_v1 = vsel %vm5790_vm2, %v5789_v52, 0.0 }
 0x566   : > { %5854 = vst [vmem:[%s10081_s27 + $0xf8] sm:$0xff] %v5822_v1  ;;  %v5787_v18 = vsel %vm5757_vm1, %v5626_v53, %v5720_v28 }
 0x567   : > { %v5820_v25 = vsel %vm5790_vm2, %v5787_v18, 0.0 }
 0x568   : > { %5852 = vst [vmem:[%s10081_s27 + $0xe8] sm:$0xff] %v5820_v25 }
 0x569 PF: > { %s16_s21 = sadd.s32 1, %s7638_s21  }
 0x56a   : > { %p13_p4 = scmp.ge.s32.totalorder %s16_s21, 4  }
 0x56c   :  { %15 = sbr.rel (!%p13_p4) target bundleno = 1 (0x1), region = 77 }

</bundles_post_ra>
